<compile_context>
chip_gen: v5e
topology: v5e:2x2
jax: 0.10.0
libtpu: 0.0.40
codegen_flags: <defaults>
</compile_context>

<pallas_src>
from functools import partial

import jax
import jax.numpy as jnp
from jax import lax
from jax.experimental import pallas as pl
from jax.experimental.pallas import tpu as pltpu

_EPS = 1e-5

# dot_general dimension-number conventions (as in the splash-attention TPU kernel).
_TN = (((0,), (0,)), ((), ()))   # contract dim0(lhs) with dim0(rhs)   -> "lhs transposed"
_NT = (((1,), (1,)), ((), ()))   # contract dim1(lhs) with dim1(rhs)   -> "rhs transposed"


# ------------------------------- Pallas kernel -------------------------------

def _bottleneck_kernel(x_ref, w1_ref, b1_ref, w2_ref, b2_ref, w3_ref, b3_ref,
                       o_ref, h1p_ref, col_ref, *, H, W, Nb):
    """Fused Bottleneck forward for a block of Nb images.

    x_ref   : (Nb, Cin, H*W)        f32   channel-major input block
    w1_ref  : (Cin, width)          bf16  conv1 weight (BN1 scale folded)
    b1_ref  : (1, width)            f32   folded BN1 bias
    w2_ref  : (9*width, width)      bf16  conv2 im2col weight (BN2 scale folded)
    b2_ref  : (1, width)            f32   folded BN2 bias
    w3_ref  : (Cout, width)         bf16  conv3 weight (BN3 scale folded), transposed
    b3_ref  : (Cout, 1)             f32   folded BN3 bias
    o_ref   : (Nb, Cout, H*W)       bf16  channel-major output block
    h1p_ref : (H+2, W+2, width)     bf16  VMEM scratch, zero-padded stage-1 output
    col_ref : (H*W, 9*width)        bf16  VMEM scratch, im2col matrix
    """
    HW = H * W
    width = w1_ref.shape[1]

    # Zero only the 1-pixel halo border (interior is overwritten for every image).
    # Re-done every grid step -> safe under megacore grid splitting.
    zrow = jnp.zeros((1, W + 2, width), h1p_ref.dtype)
    h1p_ref[0:1, :, :] = zrow
    h1p_ref[H + 1:H + 2, :, :] = zrow
    zcol = jnp.zeros((H + 2, 1, width), h1p_ref.dtype)
    h1p_ref[:, 0:1, :] = zcol
    h1p_ref[:, W + 1:W + 2, :] = zcol

    for n in range(Nb):                          # static, Nb is small
        x_f32 = x_ref[n]                         # (Cin, HW) f32 (kept for residual)
        x_bf = x_f32.astype(jnp.bfloat16)

        # ---- stage 1: 1x1 conv + bias + ReLU, directly in (HW, width) layout ----
        h1 = lax.dot_general(x_bf, w1_ref[...], _TN,
                             preferred_element_type=jnp.float32)      # (HW, width)
        h1 = jnp.maximum(h1 + b1_ref[...], 0.0).astype(jnp.bfloat16)
        h1p_ref[1:H + 1, 1:W + 1, :] = h1.reshape(H, W, width)

        # ---- stage 2: 3x3 conv (pad=1) as ONE im2col matmul, K = 9*width --------
        for k in range(9):
            ky, kx = k // 3, k % 3
            col_ref[:, k * width:(k + 1) * width] = (
                h1p_ref[ky:ky + H, kx:kx + W, :].reshape(HW, width))
        h2 = jnp.dot(col_ref[...], w2_ref[...],
                     preferred_element_type=jnp.float32)              # (HW, width)
        h2 = jnp.maximum(h2 + b2_ref[...], 0.0).astype(jnp.bfloat16)

        # ---- stage 3: 1x1 conv + bias + f32 residual + ReLU, channel-major out ---
        y = lax.dot_general(w3_ref[...], h2, _NT,
                            preferred_element_type=jnp.float32)       # (Cout, HW)
        y = y + b3_ref[...] + x_f32                                   # Cin == Cout
        o_ref[n] = jnp.maximum(y, 0.0).astype(o_ref.dtype)


# ------------------------------ glue / wrapper --------------------------------

def _fold_bn(bn):
    scale = bn['gamma'] / jnp.sqrt(bn['var'] + _EPS)
    bias = bn['beta'] - bn['mean'] * scale
    return scale.astype(jnp.float32), bias.astype(jnp.float32)


def _pick_nb(N, HW):
    """Images per grid step: Nb*HW ~ 1024 to amortize per-step overhead, but keep
    >= 2 grid steps when N allows (pipelining / megacore)."""
    target = max(1, (1024 + HW - 1) // HW)
    divs = [d for d in range(1, N + 1) if N % d == 0]
    cand = [d for d in divs if d <= target]
    nb = max(cand) if cand else 1
    while nb > 1 and N // nb < 2:
        smaller = [d for d in divs if d < nb]
        nb = max(smaller) if smaller else 1
    return nb


def bottleneck_forward(x_nchw, params):
    N, Cin, H, W = x_nchw.shape
    width = params['w1'].shape[1]
    Cout = params['w3'].shape[1]
    assert Cin == Cout, "downsample=None requires inplanes == planes*expansion"
    HW = H * W
    Nb = _pick_nb(N, HW)

    # Channel-major (N, C, H*W): free reshape of NCHW (no HBM transpose pass).
    # Kept f32: the kernel casts to bf16 in VMEM and uses the f32 copy for the residual.
    x = x_nchw.reshape(N, Cin, HW)

    s1, b1 = _fold_bn(params['bn1'])
    s2, b2 = _fold_bn(params['bn2'])
    s3, b3 = _fold_bn(params['bn3'])

    # Fold BN scales into the (tiny) conv weights once, outside the kernel.
    w1 = (params['w1'] * s1[None, :]).astype(jnp.bfloat16)                      # (Cin, width)
    w2 = (params['w2'] * s2[None, None, None, :]).reshape(
        9 * width, width).astype(jnp.bfloat16)                                  # (9*width, width)
    w3t = (params['w3'] * s3[None, :]).T.astype(jnp.bfloat16)                   # (Cout, width)

    out = pl.pallas_call(
        partial(_bottleneck_kernel, H=H, W=W, Nb=Nb),
        out_shape=jax.ShapeDtypeStruct((N, Cout, HW), jnp.bfloat16),
        grid=(N // Nb,),
        in_specs=[
            pl.BlockSpec((Nb, Cin, HW), lambda n: (n, 0, 0)),
            pl.BlockSpec((Cin, width), lambda n: (0, 0)),
            pl.BlockSpec((1, width), lambda n: (0, 0)),
            pl.BlockSpec((9 * width, width), lambda n: (0, 0)),
            pl.BlockSpec((1, width), lambda n: (0, 0)),
            pl.BlockSpec((Cout, width), lambda n: (0, 0)),
            pl.BlockSpec((Cout, 1), lambda n: (0, 0)),
        ],
        out_specs=pl.BlockSpec((Nb, Cout, HW), lambda n: (n, 0, 0)),
        scratch_shapes=[
            pltpu.VMEM((H + 2, W + 2, width), jnp.bfloat16),   # padded stage-1 output
            pltpu.VMEM((HW, 9 * width), jnp.bfloat16),         # im2col matrix
        ],
        compiler_params=pltpu.CompilerParams(
            dimension_semantics=("parallel",),
            vmem_limit_bytes=32 * 1024 * 1024,
        ),
    )(x, w1, b1.reshape(1, width), w2, b2.reshape(1, width),
      w3t, b3.reshape(Cout, 1))

    return out.reshape(N, Cout, H, W)   # free reshape back to NCHW (bf16)


# ------------------------------ reference (JAX) --------------------------------

def bottleneck_reference(x_nchw, params):
    def bn(x, p):
        g = p['gamma'][None, :, None, None]
        b = p['beta'][None, :, None, None]
        m = p['mean'][None, :, None, None]
        v = p['var'][None, :, None, None]
        return (x - m) / jnp.sqrt(v + _EPS) * g + b

    def conv(x, w_oihw, pad):
        return jax.lax.conv_general_dilated(
            x, w_oihw, window_strides=(1, 1), padding=pad,
            dimension_numbers=('NCHW', 'OIHW', 'NCHW'))

    w1 = jnp.transpose(params['w1'], (1, 0))[:, :, None, None]   # (width, Cin, 1, 1)
    w2 = jnp.transpose(params['w2'], (3, 2, 0, 1))                # (Cout, Cin, 3, 3)
    w3 = jnp.transpose(params['w3'], (1, 0))[:, :, None, None]   # (Cout, width, 1, 1)

    out = jax.nn.relu(bn(conv(x_nchw, w1, 'VALID'), params['bn1']))
    out = jax.nn.relu(bn(conv(out, w2, ((1, 1), (1, 1))), params['bn2']))
    out = bn(conv(out, w3, 'VALID'), params['bn3'])
    return jax.nn.relu(out + x_nchw)


# ---------------------------------- params -------------------------------------

def init_params(key, inplanes, planes, base_width=64, groups=1):
    width = int(planes * (base_width / 64.0)) * groups
    out_ch = planes * 4  # expansion
    ks = jax.random.split(key, 16)

    def bn_params(kg, kb, km, kv, c):
        return dict(
            gamma=jax.random.uniform(kg, (c,), jnp.float32, 0.5, 1.5),
            beta=jax.random.normal(kb, (c,), jnp.float32) * 0.1,
            mean=jax.random.normal(km, (c,), jnp.float32) * 0.1,
            var=jax.random.uniform(kv, (c,), jnp.float32, 0.5, 1.5),
        )

    return dict(
        w1=jax.random.normal(ks[0], (inplanes, width), jnp.float32) * 0.1,
        w2=jax.random.normal(ks[1], (3, 3, width, width), jnp.float32) * 0.1,
        w3=jax.random.normal(ks[2], (width, out_ch), jnp.float32) * 0.1,
        bn1=bn_params(ks[3], ks[4], ks[5], ks[6], width),
        bn2=bn_params(ks[7], ks[8], ks[9], ks[10], width),
        bn3=bn_params(ks[11], ks[12], ks[13], ks[14], out_ch),
    )


# ----------------------------------- main ---------------------------------------

if __name__ == "__main__":
    # Bottleneck(inplanes=128, planes=32): width=32, output channels=128 (=inplanes,
    # so the downsample=None / stride=1 path applies).  H*W=256 keeps the lane
    # dimension dense; shapes stay small (x is 256 KiB).
    inplanes, planes = 128, 32
    N, H, W = 2, 16, 16

    key = jax.random.PRNGKey(0)
    kx, kp = jax.random.split(key)
    x = jax.random.normal(kx, (N, inplanes, H, W), jnp.float32)   # NCHW input
    params = init_params(kp, inplanes, planes)

    out = jax.block_until_ready(jax.jit(bottleneck_forward)(x, params))
    ref = jax.block_until_ready(jax.jit(bottleneck_reference)(x, params))

    assert out.shape == (N, planes * 4, H, W), out.shape
    out_f32 = out.astype(jnp.float32)
    err = float(jnp.max(jnp.abs(out_f32 - ref)))
    tol = 3e-2 * float(jnp.max(jnp.abs(ref))) + 1e-3   # bf16 matmul inputs / bf16 out, f32 accum
    assert err <= tol, (err, tol)
    print("KERNEL_OK")
</pallas_src>

<mosaic_0001>
module attributes {stable_mosaic.version = 11 : i64} {
  func.func @_bottleneck_kernel(%arg0: i32, %arg1: memref<1x128x256xf32, #tpu.memory_space<vmem>>, %arg2: memref<128x32xbf16, #tpu.memory_space<vmem>>, %arg3: memref<1x32xf32, #tpu.memory_space<vmem>>, %arg4: memref<288x32xbf16, #tpu.memory_space<vmem>>, %arg5: memref<1x32xf32, #tpu.memory_space<vmem>>, %arg6: memref<128x32xbf16, #tpu.memory_space<vmem>>, %arg7: memref<128x1xf32, #tpu.memory_space<vmem>>, %arg8: memref<1x128x256xbf16, #tpu.memory_space<vmem>>, %arg9: memref<18x18x32xbf16, #tpu.memory_space<vmem>>, %arg10: memref<256x288xbf16, #tpu.memory_space<vmem>>) attributes {dimension_semantics = [#tpu.dimension_semantics<parallel>], iteration_bounds = array<i64: 2>, scalar_prefetch = 0 : i64, scratch_operands = 2 : i64, tpu.core_type = #tpu.core_type<tc>, window_params = [{transform_indices = @transform_0, window_bounds = array<i64: 1, 128, 256>}, {pipeline_mode = #tpu.pipeline_mode<synchronous>, transform_indices = @transform_1, window_bounds = array<i64: 128, 32>}, {pipeline_mode = #tpu.pipeline_mode<synchronous>, transform_indices = @transform_2, window_bounds = array<i64: 1, 32>}, {pipeline_mode = #tpu.pipeline_mode<synchronous>, transform_indices = @transform_3, window_bounds = array<i64: 288, 32>}, {pipeline_mode = #tpu.pipeline_mode<synchronous>, transform_indices = @transform_4, window_bounds = array<i64: 1, 32>}, {pipeline_mode = #tpu.pipeline_mode<synchronous>, transform_indices = @transform_5, window_bounds = array<i64: 128, 32>}, {pipeline_mode = #tpu.pipeline_mode<synchronous>, transform_indices = @transform_6, window_bounds = array<i64: 128, 1>}, {transform_indices = @transform_7, window_bounds = array<i64: 1, 128, 256>}]} {
    %cst = arith.constant 0.000000e+00 : bf16
    %0 = vector.broadcast %cst : bf16 to vector<1x18x32xbf16>
    %c0 = arith.constant 0 : index
    %c0_0 = arith.constant 0 : index
    %c0_1 = arith.constant 0 : index
    %1 = vector.load %arg9[%c0, %c0_0, %c0_1] : memref<18x18x32xbf16, #tpu.memory_space<vmem>>, vector<1x18x32xbf16>
    tpu.vector_store %arg9[%c0, %c0_0, %c0_1], %0 {strides = array<i32>} : memref<18x18x32xbf16, #tpu.memory_space<vmem>>, vector<1x18x32xbf16>,
    %c17 = arith.constant 17 : index
    %c0_2 = arith.constant 0 : index
    %c0_3 = arith.constant 0 : index
    %2 = vector.load %arg9[%c17, %c0_2, %c0_3] : memref<18x18x32xbf16, #tpu.memory_space<vmem>>, vector<1x18x32xbf16>
    tpu.vector_store %arg9[%c17, %c0_2, %c0_3], %0 {strides = array<i32>} : memref<18x18x32xbf16, #tpu.memory_space<vmem>>, vector<1x18x32xbf16>,
    %cst_4 = arith.constant 0.000000e+00 : bf16
    %3 = vector.broadcast %cst_4 : bf16 to vector<18x1x32xbf16>
    %c0_5 = arith.constant 0 : index
    %c0_6 = arith.constant 0 : index
    %c0_7 = arith.constant 0 : index
    %4 = vector.load %arg9[%c0_5, %c0_6, %c0_7] : memref<18x18x32xbf16, #tpu.memory_space<vmem>>, vector<18x1x32xbf16>
    tpu.vector_store %arg9[%c0_5, %c0_6, %c0_7], %3 {strides = array<i32>} : memref<18x18x32xbf16, #tpu.memory_space<vmem>>, vector<18x1x32xbf16>,
    %c0_8 = arith.constant 0 : index
    %c17_9 = arith.constant 17 : index
    %c0_10 = arith.constant 0 : index
    %5 = vector.load %arg9[%c0_8, %c17_9, %c0_10] : memref<18x18x32xbf16, #tpu.memory_space<vmem>>, vector<18x1x32xbf16>
    tpu.vector_store %arg9[%c0_8, %c17_9, %c0_10], %3 {strides = array<i32>} : memref<18x18x32xbf16, #tpu.memory_space<vmem>>, vector<18x1x32xbf16>,
    %c0_11 = arith.constant 0 : index
    %c0_12 = arith.constant 0 : index
    %c0_13 = arith.constant 0 : index
    %6 = vector.load %arg1[%c0_11, %c0_12, %c0_13] : memref<1x128x256xf32, #tpu.memory_space<vmem>>, vector<1x128x256xf32>
    %7 = vector.shape_cast %6 : vector<1x128x256xf32> to vector<128x256xf32>
    %8 = arith.truncf %7 : vector<128x256xf32> to vector<128x256xbf16>
    %c0_14 = arith.constant 0 : index
    %c0_15 = arith.constant 0 : index
    %9 = vector.load %arg2[%c0_14, %c0_15] : memref<128x32xbf16, #tpu.memory_space<vmem>>, vector<128x32xbf16>
    %cst_16 = arith.constant dense<0.000000e+00> : vector<256x32xf32>
    %10 = tpu.matmul %8, %9, %cst_16 {dimension_numbers = #tpu.dot_dimension_numbers<[0], [0], [1], [1], [0, 1, 1, 1], [], []>} : vector<128x256xbf16>, vector<128x32xbf16>, vector<256x32xf32> -> vector<256x32xf32>
    %c0_17 = arith.constant 0 : index
    %c0_18 = arith.constant 0 : index
    %11 = vector.load %arg3[%c0_17, %c0_18] : memref<1x32xf32, #tpu.memory_space<vmem>>, vector<1x32xf32>
    %12 = vector.broadcast %11 : vector<1x32xf32> to vector<256x32xf32>
    %13 = arith.addf %10, %12 : vector<256x32xf32>
    %cst_19 = arith.constant 0.000000e+00 : f32
    %14 = vector.broadcast %cst_19 : f32 to vector<256x32xf32>
    %15 = arith.maximumf %13, %14 : vector<256x32xf32>
    %16 = arith.truncf %15 : vector<256x32xf32> to vector<256x32xbf16>
    %17 = vector.shape_cast %16 : vector<256x32xbf16> to vector<16x16x32xbf16>
    %c1 = arith.constant 1 : index
    %c1_20 = arith.constant 1 : index
    %c0_21 = arith.constant 0 : index
    %18 = vector.load %arg9[%c1, %c1_20, %c0_21] : memref<18x18x32xbf16, #tpu.memory_space<vmem>>, vector<16x16x32xbf16>
    tpu.vector_store %arg9[%c1, %c1_20, %c0_21], %17 {strides = array<i32>} : memref<18x18x32xbf16, #tpu.memory_space<vmem>>, vector<16x16x32xbf16>,
    %c0_22 = arith.constant 0 : index
    %c0_23 = arith.constant 0 : index
    %c0_24 = arith.constant 0 : index
    %19 = vector.load %arg9[%c0_22, %c0_23, %c0_24] : memref<18x18x32xbf16, #tpu.memory_space<vmem>>, vector<16x16x32xbf16>
    %20 = vector.shape_cast %19 : vector<16x16x32xbf16> to vector<256x32xbf16>
    %c0_25 = arith.constant 0 : index
    %c0_26 = arith.constant 0 : index
    %21 = vector.load %arg10[%c0_25, %c0_26] : memref<256x288xbf16, #tpu.memory_space<vmem>>, vector<256x32xbf16>
    tpu.vector_store %arg10[%c0_25, %c0_26], %20 {strides = array<i32>} : memref<256x288xbf16, #tpu.memory_space<vmem>>, vector<256x32xbf16>,
    %c0_27 = arith.constant 0 : index
    %c1_28 = arith.constant 1 : index
    %c0_29 = arith.constant 0 : index
    %22 = vector.load %arg9[%c0_27, %c1_28, %c0_29] : memref<18x18x32xbf16, #tpu.memory_space<vmem>>, vector<16x16x32xbf16>
    %23 = vector.shape_cast %22 : vector<16x16x32xbf16> to vector<256x32xbf16>
    %c0_30 = arith.constant 0 : index
    %c32 = arith.constant 32 : index
    %24 = vector.load %arg10[%c0_30, %c32] : memref<256x288xbf16, #tpu.memory_space<vmem>>, vector<256x32xbf16>
    tpu.vector_store %arg10[%c0_30, %c32], %23 {strides = array<i32>} : memref<256x288xbf16, #tpu.memory_space<vmem>>, vector<256x32xbf16>,
    %c0_31 = arith.constant 0 : index
    %c2 = arith.constant 2 : index
    %c0_32 = arith.constant 0 : index
    %25 = vector.load %arg9[%c0_31, %c2, %c0_32] : memref<18x18x32xbf16, #tpu.memory_space<vmem>>, vector<16x16x32xbf16>
    %26 = vector.shape_cast %25 : vector<16x16x32xbf16> to vector<256x32xbf16>
    %c0_33 = arith.constant 0 : index
    %c64 = arith.constant 64 : index
    %27 = vector.load %arg10[%c0_33, %c64] : memref<256x288xbf16, #tpu.memory_space<vmem>>, vector<256x32xbf16>
    tpu.vector_store %arg10[%c0_33, %c64], %26 {strides = array<i32>} : memref<256x288xbf16, #tpu.memory_space<vmem>>, vector<256x32xbf16>,
    %c1_34 = arith.constant 1 : index
    %c0_35 = arith.constant 0 : index
    %c0_36 = arith.constant 0 : index
    %28 = vector.load %arg9[%c1_34, %c0_35, %c0_36] : memref<18x18x32xbf16, #tpu.memory_space<vmem>>, vector<16x16x32xbf16>
    %29 = vector.shape_cast %28 : vector<16x16x32xbf16> to vector<256x32xbf16>
    %c0_37 = arith.constant 0 : index
    %c96 = arith.constant 96 : index
    %30 = vector.load %arg10[%c0_37, %c96] : memref<256x288xbf16, #tpu.memory_space<vmem>>, vector<256x32xbf16>
    tpu.vector_store %arg10[%c0_37, %c96], %29 {strides = array<i32>} : memref<256x288xbf16, #tpu.memory_space<vmem>>, vector<256x32xbf16>,
    %c1_38 = arith.constant 1 : index
    %c1_39 = arith.constant 1 : index
    %c0_40 = arith.constant 0 : index
    %31 = vector.load %arg9[%c1_38, %c1_39, %c0_40] : memref<18x18x32xbf16, #tpu.memory_space<vmem>>, vector<16x16x32xbf16>
    %32 = vector.shape_cast %31 : vector<16x16x32xbf16> to vector<256x32xbf16>
    %c0_41 = arith.constant 0 : index
    %c128 = arith.constant 128 : index
    %33 = vector.load %arg10[%c0_41, %c128] : memref<256x288xbf16, #tpu.memory_space<vmem>>, vector<256x32xbf16>
    tpu.vector_store %arg10[%c0_41, %c128], %32 {strides = array<i32>} : memref<256x288xbf16, #tpu.memory_space<vmem>>, vector<256x32xbf16>,
    %c1_42 = arith.constant 1 : index
    %c2_43 = arith.constant 2 : index
    %c0_44 = arith.constant 0 : index
    %34 = vector.load %arg9[%c1_42, %c2_43, %c0_44] : memref<18x18x32xbf16, #tpu.memory_space<vmem>>, vector<16x16x32xbf16>
    %35 = vector.shape_cast %34 : vector<16x16x32xbf16> to vector<256x32xbf16>
    %c0_45 = arith.constant 0 : index
    %c160 = arith.constant 160 : index
    %36 = vector.load %arg10[%c0_45, %c160] : memref<256x288xbf16, #tpu.memory_space<vmem>>, vector<256x32xbf16>
    tpu.vector_store %arg10[%c0_45, %c160], %35 {strides = array<i32>} : memref<256x288xbf16, #tpu.memory_space<vmem>>, vector<256x32xbf16>,
    %c2_46 = arith.constant 2 : index
    %c0_47 = arith.constant 0 : index
    %c0_48 = arith.constant 0 : index
    %37 = vector.load %arg9[%c2_46, %c0_47, %c0_48] : memref<18x18x32xbf16, #tpu.memory_space<vmem>>, vector<16x16x32xbf16>
    %38 = vector.shape_cast %37 : vector<16x16x32xbf16> to vector<256x32xbf16>
    %c0_49 = arith.constant 0 : index
    %c192 = arith.constant 192 : index
    %39 = vector.load %arg10[%c0_49, %c192] : memref<256x288xbf16, #tpu.memory_space<vmem>>, vector<256x32xbf16>
    tpu.vector_store %arg10[%c0_49, %c192], %38 {strides = array<i32>} : memref<256x288xbf16, #tpu.memory_space<vmem>>, vector<256x32xbf16>,
    %c2_50 = arith.constant 2 : index
    %c1_51 = arith.constant 1 : index
    %c0_52 = arith.constant 0 : index
    %40 = vector.load %arg9[%c2_50, %c1_51, %c0_52] : memref<18x18x32xbf16, #tpu.memory_space<vmem>>, vector<16x16x32xbf16>
    %41 = vector.shape_cast %40 : vector<16x16x32xbf16> to vector<256x32xbf16>
    %c0_53 = arith.constant 0 : index
    %c224 = arith.constant 224 : index
    %42 = vector.load %arg10[%c0_53, %c224] : memref<256x288xbf16, #tpu.memory_space<vmem>>, vector<256x32xbf16>
    tpu.vector_store %arg10[%c0_53, %c224], %41 {strides = array<i32>} : memref<256x288xbf16, #tpu.memory_space<vmem>>, vector<256x32xbf16>,
    %c2_54 = arith.constant 2 : index
    %c2_55 = arith.constant 2 : index
    %c0_56 = arith.constant 0 : index
    %43 = vector.load %arg9[%c2_54, %c2_55, %c0_56] : memref<18x18x32xbf16, #tpu.memory_space<vmem>>, vector<16x16x32xbf16>
    %44 = vector.shape_cast %43 : vector<16x16x32xbf16> to vector<256x32xbf16>
    %c0_57 = arith.constant 0 : index
    %c256 = arith.constant 256 : index
    %45 = vector.load %arg10[%c0_57, %c256] : memref<256x288xbf16, #tpu.memory_space<vmem>>, vector<256x32xbf16>
    tpu.vector_store %arg10[%c0_57, %c256], %44 {strides = array<i32>} : memref<256x288xbf16, #tpu.memory_space<vmem>>, vector<256x32xbf16>,
    %c0_58 = arith.constant 0 : index
    %c0_59 = arith.constant 0 : index
    %46 = vector.load %arg10[%c0_58, %c0_59] : memref<256x288xbf16, #tpu.memory_space<vmem>>, vector<256x288xbf16>
    %c0_60 = arith.constant 0 : index
    %c0_61 = arith.constant 0 : index
    %47 = vector.load %arg4[%c0_60, %c0_61] : memref<288x32xbf16, #tpu.memory_space<vmem>>, vector<288x32xbf16>
    %cst_62 = arith.constant dense<0.000000e+00> : vector<256x32xf32>
    %48 = tpu.matmul %46, %47, %cst_62 {dimension_numbers = #tpu.dot_dimension_numbers<[1], [0], [0], [1], [0, 0, 1, 1], [], []>} : vector<256x288xbf16>, vector<288x32xbf16>, vector<256x32xf32> -> vector<256x32xf32>
    %c0_63 = arith.constant 0 : index
    %c0_64 = arith.constant 0 : index
    %49 = vector.load %arg5[%c0_63, %c0_64] : memref<1x32xf32, #tpu.memory_space<vmem>>, vector<1x32xf32>
    %50 = vector.broadcast %49 : vector<1x32xf32> to vector<256x32xf32>
    %51 = arith.addf %48, %50 : vector<256x32xf32>
    %cst_65 = arith.constant 0.000000e+00 : f32
    %52 = vector.broadcast %cst_65 : f32 to vector<256x32xf32>
    %53 = arith.maximumf %51, %52 : vector<256x32xf32>
    %54 = arith.truncf %53 : vector<256x32xf32> to vector<256x32xbf16>
    %c0_66 = arith.constant 0 : index
    %c0_67 = arith.constant 0 : index
    %55 = vector.load %arg6[%c0_66, %c0_67] : memref<128x32xbf16, #tpu.memory_space<vmem>>, vector<128x32xbf16>
    %cst_68 = arith.constant dense<0.000000e+00> : vector<128x256xf32>
    %56 = tpu.matmul %55, %54, %cst_68 {dimension_numbers = #tpu.dot_dimension_numbers<[1], [1], [0], [0], [0, 0, 1, 0], [], []>} : vector<128x32xbf16>, vector<256x32xbf16>, vector<128x256xf32> -> vector<128x256xf32>
    %c0_69 = arith.constant 0 : index
    %c0_70 = arith.constant 0 : index
    %57 = vector.load %arg7[%c0_69, %c0_70] : memref<128x1xf32, #tpu.memory_space<vmem>>, vector<128x1xf32>
    %58 = vector.broadcast %57 : vector<128x1xf32> to vector<128x256xf32>
    %59 = arith.addf %56, %58 : vector<128x256xf32>
    %60 = arith.addf %59, %7 : vector<128x256xf32>
    %cst_71 = arith.constant 0.000000e+00 : f32
    %61 = vector.broadcast %cst_71 : f32 to vector<128x256xf32>
    %62 = arith.maximumf %60, %61 : vector<128x256xf32>
    %63 = arith.truncf %62 : vector<128x256xf32> to vector<128x256xbf16>
    %c0_72 = arith.constant 0 : index
    %c0_73 = arith.constant 0 : index
    %c0_74 = arith.constant 0 : index
    %64 = vector.load %arg8[%c0_72, %c0_73, %c0_74] : memref<1x128x256xbf16, #tpu.memory_space<vmem>>, vector<1x128x256xbf16>
    %65 = vector.shape_cast %64 : vector<1x128x256xbf16> to vector<128x256xbf16>
    %66 = vector.shape_cast %63 : vector<128x256xbf16> to vector<1x128x256xbf16>
    tpu.vector_store %arg8[%c0_72, %c0_73, %c0_74], %66 {strides = array<i32>} : memref<1x128x256xbf16, #tpu.memory_space<vmem>>, vector<1x128x256xbf16>,
    return
  }
  func.func @transform_0(%arg0: i32) -> (i32, i32, i32) {
    %c0_i32 = arith.constant 0 : i32
    %c0_i32_0 = arith.constant 0 : i32
    %c0_i32_1 = arith.constant 0 : i32
    return %arg0, %c0_i32, %c0_i32_0 : i32, i32, i32
  }
  func.func @transform_1(%arg0: i32) -> (i32, i32) {
    %c0_i32 = arith.constant 0 : i32
    %c0_i32_0 = arith.constant 0 : i32
    %c0_i32_1 = arith.constant 0 : i32
    return %c0_i32, %c0_i32_0 : i32, i32
  }
  func.func @transform_2(%arg0: i32) -> (i32, i32) {
    %c0_i32 = arith.constant 0 : i32
    %c0_i32_0 = arith.constant 0 : i32
    %c0_i32_1 = arith.constant 0 : i32
    return %c0_i32, %c0_i32_0 : i32, i32
  }
  func.func @transform_3(%arg0: i32) -> (i32, i32) {
    %c0_i32 = arith.constant 0 : i32
    %c0_i32_0 = arith.constant 0 : i32
    %c0_i32_1 = arith.constant 0 : i32
    return %c0_i32, %c0_i32_0 : i32, i32
  }
  func.func @transform_4(%arg0: i32) -> (i32, i32) {
    %c0_i32 = arith.constant 0 : i32
    %c0_i32_0 = arith.constant 0 : i32
    %c0_i32_1 = arith.constant 0 : i32
    return %c0_i32, %c0_i32_0 : i32, i32
  }
  func.func @transform_5(%arg0: i32) -> (i32, i32) {
    %c0_i32 = arith.constant 0 : i32
    %c0_i32_0 = arith.constant 0 : i32
    %c0_i32_1 = arith.constant 0 : i32
    return %c0_i32, %c0_i32_0 : i32, i32
  }
  func.func @transform_6(%arg0: i32) -> (i32, i32) {
    %c0_i32 = arith.constant 0 : i32
    %c0_i32_0 = arith.constant 0 : i32
    %c0_i32_1 = arith.constant 0 : i32
    return %c0_i32, %c0_i32_0 : i32, i32
  }
  func.func @transform_7(%arg0: i32) -> (i32, i32, i32) {
    %c0_i32 = arith.constant 0 : i32
    %c0_i32_0 = arith.constant 0 : i32
    %c0_i32_1 = arith.constant 0 : i32
    return %arg0, %c0_i32, %c0_i32_0 : i32, i32, i32
  }
}

</mosaic_0001>

<bundles_post_ra>
// kernel: bottleneck_forward.1
= control target key start
LH: loop header
LB: loop body
LE: loop exit
PB: predicated region body
PF: predicated region fallthrough
CT: control target
= control target key end

     0   :  { %s6059_s24 = smov 0   ;;  %s8384_s0 = inlined_call_operand.vmem [shape: f32[2,128,256], index: 0, kind: input, shape index: {}]   ;;  %s8385_s1 = inlined_call_operand.vmem [shape: bf16[128,32], index: 1, kind: input, shape index: {}]   ;;  %s8386_s2 = inlined_call_operand.vmem [shape: f32[1,32], index: 2, kind: input, shape index: {}]   ;;  %s8387_s3 = inlined_call_operand.vmem [shape: bf16[288,32], index: 3, kind: input, shape index: {}]   ;;  %s8388_s4 = inlined_call_operand.vmem [shape: f32[1,32], index: 4, kind: input, shape index: {}]   ;;  %s8389_s5 = inlined_call_operand.vmem [shape: bf16[128,32], index: 5, kind: input, shape index: {}]   ;;  %s8390_s6 = inlined_call_operand.vmem [shape: f32[128,1], index: 6, kind: input, shape index: {}]   ;;  %s8391_s7 = inlined_call_operand.vmem [shape: bf16[2,128,256], index: 7, kind: output, shape index: {}]  }
   0x1 LB: > { %s5439_s25 = sadd.s32 4294967295, %s6013_s24   ;;  %p5443_p0 = scmp.ge.s32.totalorder %s6013_s24, 1  ;;  %s6013_s24 = sphi %s6059_s24, %s17_s24  }
   0x2   : > { %p237_p1 = scmp.lt.s32.totalorder %s6013_s24, 3 }
   0x4   : > { %p238_p2 = pnand %p5443_p0, %p237_p1 }
   0x6   : > { %241 = sbr.rel (%p238_p2) target bundleno = 1494 (0x5d6), region = 48 }
   0xb   : > { %p269_p3 = scmp.lt.s32.totalorder %s5439_s25, 1  ;;  %v5867_v36 = vld [vmem:[%s8385_s1 + $0x38] sm:$0xff]  ;;  %v5866_v37 = vld [vmem:[%s8385_s1 + $0x30] sm:$0xff]  ;;  %v5865_v38 = vld [vmem:[%s8385_s1 + $0x28] sm:$0xff]  ;;  %vm280_vm0 = vcmask 257024   ;;  %vm1856_vm1 = vcmask 1042432  }
   0xc   : > { %542 = vmatpush.bf16.msra.mxu0 %v5867_v36  ;;  %5942 = vmatpush.bf16.msra.mxu1 %v5867_v36  ;;  %v5864_v43 = vld [vmem:[%s8385_s1 + $0x20] sm:$0xff]  ;;  %v5863_v46 = vld [vmem:[%s8385_s1 + $0x18] sm:$0xff]  ;;  %v5862_v47 = vld [vmem:[%s8385_s1 + $0x10] sm:$0xff]  ;;  %vm1857_vm2 = vcmask 1046532   ;;  %vm283_vm3 = vcmask 253952   ;;  %s6016_s23 = smov 64  }
   0xd   : > { %s8451_s25 = smov (!%p269_p3, %s5439_s25), 1  ;;  %v5861_v48 = vld [vmem:[%s8385_s1 + $0x8] sm:$0xff]  ;;  %v5860_v53 = vld [vmem:[%s8385_s1] sm:$0xff]  ;;  %vm290_vm4 = vsmask.f32 256  ;;  %vm6150_vm6 = vmor %vm1856_vm1, %vm1857_vm2  ;;  %s6018_s30 = smov 96  }
   0xe   : > { %s5858_s26 = sshll.u32 %s8451_s25, 8  ;;  %vm6145_vm5 = vmand %vm283_vm3, %vm290_vm4  ;;  %vm346_vm7 = vsmask.f32 7938  ;;  %vm1244_vm9 = vsmask.f32 3328  ;;  %vm1727_vm15 = vcmask 519424  }
   0xf   : > { %s6073_s29 = scalar_lea.vmem %s8384_s0, %s5858_s26  ;;  %vm6164_vm8 = vmand %vm283_vm3, %vm346_vm7  ;;  %vm1245_vm10 = vsmask.f32 7440  ;;  %s6017_s26 = smov 32   ;;  %vm695_vm13 = vsmask.f32 4368  ;;  %vm4602_vm1 = vcmask 261120  }
  0x10   : > { %v402_v0 = vld [vmem:[%s6073_s29] sm:$0xff]  ;;  %v403_v1 = vld [vmem:[%s6073_s29 + $0x8] sm:$0xff]  ;;  %v404_v2 = vld [vmem:[%s6073_s29 + $0x10] sm:$0xff]  ;;  %543 = vmatpush.bf16.msra.mxu0 %v5866_v37  ;;  %5943 = vmatpush.bf16.msra.mxu1 %v5866_v37  ;;  %vm2067_vm2 = vcmask 781824   ;;  %s5859_s12 = sshll.u32 %s8451_s25, 7 }
  0x11   : > { %v405_v3 = vld [vmem:[%s6073_s29 + $0x18] sm:$0xff]  ;;  %v434_v4 = vpack.c.bf16 %v404_v2, %v402_v0  ;;  %v406_v6 = vld [vmem:[%s6073_s29 + $0x20] sm:$0xff]  ;;  %v407_v7 = vld [vmem:[%s6073_s29 + $0x28] sm:$0xff]  ;;  %v6015_v2 = vmov 0   ;;  %s8335_s15 = scalar_lea.vmem %s8391_s7, %s5859_s12 }
  0x12   : > { %v435_v5 = vpack.c.bf16 %v405_v3, %v403_v1  ;;  %v408_v8 = vld [vmem:[%s6073_s29 + $0x30] sm:$0xff]  ;;  %v409_v9 = vld [vmem:[%s6073_s29 + $0x38] sm:$0xff]  ;;  %v410_v12 = vld [vmem:[%s6073_s29 + $0x40] sm:$0xff]  ;;  %281 = vst.msk [vmem:[#allocation2] sm:$0xf] %vm280_vm0, %v6015_v2  ;;  %5964 = vset.pattern.permute.xlu1 %v6015_v2  ;;  %5965 = vset.pattern.permute.xlu2 %v6015_v2 }
  0x13   : > { %v436_v10 = vpack.c.bf16 %v408_v8, %v406_v6  ;;  %v437_v11 = vpack.c.bf16 %v409_v9, %v407_v7  ;;  %v411_v13 = vld [vmem:[%s6073_s29 + $0x48] sm:$0xff]  ;;  %v412_v14 = vld [vmem:[%s6073_s29 + $0x50] sm:$0xff]  ;;  %v413_v15 = vld [vmem:[%s6073_s29 + $0x58] sm:$0xff]  ;;  %282 = vst.msk [vmem:[#allocation2 + $0x4] sm:$0xf] %vm280_vm0, %v6015_v2 }
  0x14   : > { %470 = vxpose.binary.xlu0.c.b16.start [1/16] %v435_v5, %v434_v4, 128  ;;  %v438_v16 = vpack.c.bf16 %v412_v14, %v410_v12  ;;  %v439_v17 = vpack.c.bf16 %v413_v15, %v411_v13  ;;  %v414_v18 = vld [vmem:[%s6073_s29 + $0x60] sm:$0xff]  ;;  %v415_v19 = vld [vmem:[%s6073_s29 + $0x68] sm:$0xff]  ;;  %v416_v20 = vld [vmem:[%s6073_s29 + $0x70] sm:$0xff]  ;;  %286 = vst.msk [vmem:[#allocation2 + $0xcc] sm:$0xf] %vm280_vm0, %v6015_v2 }
  0x15   : > { %v417_v21 = vld [vmem:[%s6073_s29 + $0x78] sm:$0xff]  ;;  %v440_v22 = vpack.c.bf16 %v416_v20, %v414_v18  ;;  %v418_v24 = vld [vmem:[%s6073_s29 + $0x80] sm:$0xff]  ;;  %v419_v25 = vld [vmem:[%s6073_s29 + $0x88] sm:$0xff]  ;;  %544 = vmatpush.bf16.msra.mxu0 %v5865_v38  ;;  %5944 = vmatpush.bf16.msra.mxu1 %v5865_v38  ;;  %287 = vst.msk [vmem:[#allocation2 + $0xd0] sm:$0xf] %vm280_vm0, %v6015_v2 }
  0x16   : > { %v441_v23 = vpack.c.bf16 %v417_v21, %v415_v19  ;;  %v420_v26 = vld [vmem:[%s6073_s29 + $0x90] sm:$0xff]  ;;  %v421_v27 = vld [vmem:[%s6073_s29 + $0x98] sm:$0xff]  ;;  %v422_v30 = vld [vmem:[%s6073_s29 + $0xa0] sm:$0xff]  ;;  %284 = vst.msk [vmem:[#allocation2 + $0x8] sm:$0x1] %vm283_vm3, %v6015_v2 }
  0x17   : > { %v442_v28 = vpack.c.bf16 %v420_v26, %v418_v24  ;;  %v443_v29 = vpack.c.bf16 %v421_v27, %v419_v25  ;;  %v423_v31 = vld [vmem:[%s6073_s29 + $0xa8] sm:$0xff]  ;;  %v424_v32 = vld [vmem:[%s6073_s29 + $0xb0] sm:$0xff]  ;;  %v425_v33 = vld [vmem:[%s6073_s29 + $0xb8] sm:$0xff]  ;;  %288 = vst.msk [vmem:[#allocation2 + $0xd4] sm:$0x1] %vm283_vm3, %v6015_v2  ;;  %vm2260_vm3 = vcmask 1044224  }
  0x18   : > { %v444_v34 = vpack.c.bf16 %v424_v32, %v422_v30  ;;  %v445_v35 = vpack.c.bf16 %v425_v33, %v423_v31  ;;  %v426_v39 = vld [vmem:[%s6073_s29 + $0xc0] sm:$0xff]  ;;  %v427_v40 = vld [vmem:[%s6073_s29 + $0xc8] sm:$0xff]  ;;  %v428_v41 = vld [vmem:[%s6073_s29 + $0xd0] sm:$0xff] }
  0x19   : > { %v429_v42 = vld [vmem:[%s6073_s29 + $0xd8] sm:$0xff]  ;;  %v446_v44 = vpack.c.bf16 %v428_v41, %v426_v39  ;;  %545 = vmatpush.bf16.msra.mxu0 %v5864_v43  ;;  %5945 = vmatpush.bf16.msra.mxu1 %v5864_v43  ;;  %v430_v49 = vld [vmem:[%s6073_s29 + $0xe0] sm:$0xff]  ;;  %v431_v50 = vld [vmem:[%s6073_s29 + $0xe8] sm:$0xff] }
  0x1a   : > { %v447_v45 = vpack.c.bf16 %v429_v42, %v427_v40  ;;  %v432_v51 = vld [vmem:[%s6073_s29 + $0xf0] sm:$0xff]  ;;  %v433_v52 = vld [vmem:[%s6073_s29 + $0xf8] sm:$0xff]  ;;  %v295_v4 = vld [vmem:[#allocation2 + $0xc] sm:$0x1] }
  0x1b   : > { %v448_v54 = vpack.c.bf16 %v432_v51, %v430_v49  ;;  %v449_v55 = vpack.c.bf16 %v433_v52, %v431_v50  ;;  %v1760_v5 = vld [vmem:[#allocation2] sm:$0xe]  ;;  %v292_v7 = vld [vmem:[#allocation2] sm:$0x1]  ;;  %v1761_v8 = vld [vmem:[#allocation2 + $0x4] sm:$0xf] }
  0x1c   : > { %v1861_v12 = vrot.slane %v1761_v8, 5  ;;  %v293_v13 = vsel %vm6145_vm5, 0, %v292_v7  ;;  %v1197_v21 = vld [vmem:[#allocation2 + $0x4] sm:$0xf]  ;;  %vm6170_vm11 = vmor %vm1244_vm9, %vm1245_vm10  ;;  %v351_v33 = vld [vmem:[#allocation2 + $0x14] sm:$0x1] }
  0x1d   : > { %546 = vmatpush.bf16.msra.mxu0 %v5863_v46  ;;  %5946 = vmatpush.bf16.msra.mxu1 %v5863_v46  ;;  %294 = vst [vmem:[#allocation2] sm:$0x1] %v293_v13  ;;  %v348_v24 = vld [vmem:[#allocation2 + $0x8] sm:$0x1]  ;;  %v1257_v25 = vshll.u32 %v1197_v21, 16  ;;  %v1261_v37 = vshrl.u32 %v1197_v21, 16  ;;  %vm6199_vm12 = vmand %vm280_vm0, %vm346_vm7 }
  0x1e   : > { %v349_v26 = vsel %vm6164_vm8, 0, %v348_v24  ;;  %v1863_v36 = vrot.slane %v1861_v12, 4  ;;  %v6190_v50 = vld [vmem:[%s8386_s2] ss:$0 sm:$0xff]  ;;  %vm6209_vm14 = vmor %vm290_vm4, %vm695_vm13 }
  0x1f   : > { %350 = vst [vmem:[#allocation2 + $0x8] sm:$0x1] %v349_v26  ;;  %v1263_v40 = vrot.slane %v1261_v37, 4 }
  0x21   : > { %547 = vmatpush.bf16.msra.mxu0 %v5862_v47  ;;  %5947 = vmatpush.bf16.msra.mxu1 %v5862_v47 }
  0x24   : > { %471 = vxpose.binary.xlu0.c.b16.cont [2/16] %v437_v11, %v436_v10, 128  ;;  %v5480_v10 = vrot.slane %v1760_v5, 9  ;;  %v296_v11 = vsel %vm6145_vm5, 0, %v295_v4 }
  0x25   : > { %548 = vmatpush.bf16.msra.mxu0 %v5861_v48  ;;  %5948 = vmatpush.bf16.msra.mxu1 %v5861_v48  ;;  %297 = vst [vmem:[#allocation2 + $0xc] sm:$0x1] %v296_v11  ;;  %v298_v48 = vld [vmem:[#allocation2 + $0x18] sm:$0x1]  ;;  %v301_v11 = vld [vmem:[#allocation2 + $0x24] sm:$0x1] }
  0x26   : > { %v1862_v14 = vsel %vm6150_vm6, %v5480_v10, %v1861_v12  ;;  %v1198_v41 = vld [vmem:[#allocation2 + $0x8] sm:$0x1]  ;;  %v299_v49 = vsel %vm6145_vm5, 0, %v298_v48 }
  0x27   : > { %1971 = vrot.lane.b32.xlu1 %v1862_v14, %s6016_s23  ;;  %300 = vst [vmem:[#allocation2 + $0x18] sm:$0x1] %v299_v49 }
  0x29   : > { %549 = vmatpush.bf16.msra.mxu0 %v5860_v53  ;;  %5949 = vmatpush.bf16.msra.mxu1 %v5860_v53 }
  0x34   : > { %472 = vxpose.binary.xlu0.c.b16.cont [3/16] %v439_v17, %v438_v16, 128  ;;  %v1196_v16 = vld [vmem:[#allocation2] sm:$0xf] }
  0x35   : > { %v1248_v18 = vshrl.u32 %v1196_v16, 16  ;;  %v1251_v19 = vshll.u32 %v1196_v16, 16 }
  0x44   : > { %473 = vxpose.binary.xlu0.c.b16.cont [4/16] %v441_v23, %v440_v22, 128  ;;  %v1250_v22 = vrot.slane %v1248_v18, 4  ;;  %v1253_v23 = vrot.slane %v1251_v19, 5 }
  0x46   : > { %v1254_v27 = vor.u32 %v1253_v23, %v1250_v22 }
  0x48   : > { %v1255_v30 = vrot.slane %v1254_v27, 4  ;;  %v357_v27 = vld [vmem:[#allocation2 + $0x2c] sm:$0x1] }
  0x54   : > { %474 = vxpose.binary.xlu0.c.b16.cont [5/16] %v443_v29, %v442_v28, 128  ;;  %v1259_v28 = vrot.slane %v1257_v25, 5 }
  0x56   : > { %v1260_v31 = vsel %vm6170_vm11, %v1255_v30, %v1259_v28  ;;  %v1264_v43 = vor.u32 %v1263_v40, %v1259_v28  ;;  %v358_v28 = vsel %vm6164_vm8, 0, %v357_v27 }
  0x57   : > { %1631 = vrot.lane.b32.xlu1 %v1260_v31, %s6017_s26  ;;  %359 = vst [vmem:[#allocation2 + $0x2c] sm:$0x1] %v358_v28 }
  0x64   : > { %475 = vxpose.binary.xlu0.c.b16.cont [6/16] %v445_v35, %v444_v34, 128  ;;  %v352_v34 = vsel %vm6164_vm8, 0, %v351_v33  ;;  %v1762_v35 = vld [vmem:[#allocation2 + $0x8] sm:$0x1] }
  0x65   : > { %353 = vst [vmem:[#allocation2 + $0x14] sm:$0x1] %v352_v34  ;;  %v1864_v38 = vrot.slane %v1762_v35, 5  ;;  %v1027_v34 = vld [vmem:[#allocation2 + $0x18] sm:$0xf] }
  0x67   : > { %v1865_v39 = vsel %vm6150_vm6, %v1863_v36, %v1864_v38 }
  0x68   : > { %1973 = vrot.lane.b32.xlu2 %v1865_v39, %s6016_s23 }
  0x6c   : > { %v1024_v18 = vld [vmem:[#allocation2 + $0x14] sm:$0x1] }
  0x74   : > { %476 = vxpose.binary.xlu0.c.b16.cont [7/16] %v447_v45, %v446_v44, 128  ;;  %v1267_v44 = vshll.u32 %v1198_v41, 16  ;;  %v1265_v45 = vrot.slane %v1264_v43, 4 }
  0x76   : > { %v1269_v46 = vrot.slane %v1267_v44, 5 }
  0x78   : > { %v1270_v47 = vsel %vm6170_vm11, %v1265_v45, %v1269_v46 }
  0x79   : > { %1633 = vrot.lane.b32.xlu2 %v1270_v47, %s6017_s26 }
  0x84   : > { %477 = vxpose.binary.xlu0.c.b16.end [8/16] %v449_v55, %v448_v54, 128  ;;  %v354_v55 = vld [vmem:[#allocation2 + $0x20] sm:$0x1] }
  0xc0   : > { %v478_v56 = vpop.trf.xlu0 }
  0xc1   : > { %550 = vmatmul.bf16.vlgmr.msra.gmra.mxu0 %v478_v56 }
  0xc8   : > { %v6131_v57 = vpop.trf.xlu0 }
  0xd0   : > { %v480_v58 = vpop.trf.xlu0 }
  0xd1   : > { %555 = vmatmul.bf16.gmra.mxu0 %v480_v58  ;;  %v355_v58 = vsel %vm6164_vm8, 0, %v354_v55 }
  0xd2   : > { %356 = vst [vmem:[#allocation2 + $0x20] sm:$0x1] %v355_v58 }
  0xd8   : > { %v6133_v59 = vpop.trf.xlu0 }
  0xe0   : > { %v482_v60 = vpop.trf.xlu0 }
  0xe1   : > { %560 = vmatmul.bf16.gmra.mxu0 %v482_v60 }
  0xe8   : > { %v6135_v61 = vpop.trf.xlu0 }
  0xeb   : > { %5966 = vset.pattern.permute.xlu0 %v6015_v2 }
  0xf0   : > { %v484_v62 = vpop.trf.xlu0 }
  0xf1   : > { %565 = vmatmul.bf16.gmra.mxu0 %v484_v62 }
  0xf8   : > { %v6137_v63 = vpop.trf.xlu0 }
 0x100   : > { %v486_v0 = vpop.trf.xlu0 }
 0x101   : > { %570 = vmatmul.bf16.gmra.mxu0 %v486_v0 }
 0x108   : > { %v487_v1 = vpop.trf.xlu0 }
 0x109   : > { %610 = vmatmul.bf16.vlgmr.msra.gmra.mxu1 %v487_v1 }
 0x110   : > { %v488_v3 = vpop.trf.xlu0 }
 0x111   : > { %575 = vmatmul.bf16.gmra.mxu0 %v488_v3  ;;  %v1020_v3 = vld [vmem:[#allocation2 + $0xc] sm:$0xf] }
 0x118   : > { %v489_v15 = vpop.trf.xlu0 }
 0x119   : > { %615 = vmatmul.bf16.gmra.mxu1 %v489_v15  ;;  %v302_v15 = vsel %vm6145_vm5, 0, %v301_v11 }
 0x11a   : > { %303 = vst [vmem:[#allocation2 + $0x24] sm:$0x1] %v302_v15 }
 0x120   : > { %v490_v20 = vpop.trf.xlu0 }
 0x121   : > { %580 = vmatmul.bf16.gmra.mxu0 %v490_v20 }
 0x128   : > { %v491_v32 = vpop.trf.xlu0 }
 0x129   : > { %620 = vmatmul.bf16.gmra.mxu1 %v491_v32 }
 0x130   : > { %v492_v42 = vpop.trf.xlu0 }
 0x131   : > { %585 = vmatmul.bf16.gmra.mxu0 %v492_v42 }
 0x13e   : > { %v551_v51 = vpop.f32.mrf.mxu0 }
 0x13f   : > { %v552_v52 = vadd.f32 %v6190_v50, %v551_v51 }
 0x141   : > { %v631_v53 = vmax.f32 %v552_v52, 0.0  ;;  %590 = vmatmul.bf16.gmra.mxu0 %v6131_v57 }
 0x143   : > { %v663_v54 = vpack.c.bf16 %v631_v53, %v631_v53 }
 0x145   : > { %v698_v56 = vshrl.u32 %v663_v54, 16  ;;  %v701_v0 = vshll.u32 %v663_v54, 16  ;;  %v304_v54 = vld [vmem:[#allocation2 + $0x30] sm:$0x1] }
 0x146   : > { %v553_v60 = vpop.f32.mrf.mxu0 }
 0x147   : > { %v700_v62 = vrot.slane %v698_v56, 7  ;;  %v554_v1 = vadd.f32 %v6190_v50, %v553_v60  ;;  %v305_v60 = vsel %vm6145_vm5, 0, %v304_v54 }
 0x148   : > { %306 = vst [vmem:[#allocation2 + $0x30] sm:$0x1] %v305_v60 }
 0x149   : > { %v703_v57 = vor.u32 %v701_v0, %v700_v62  ;;  %v632_v4 = vmax.f32 %v554_v1, 0.0  ;;  %v704_v19 = vrot.slane %v700_v62, 4  ;;  %v1031_v0 = vld [vmem:[#allocation2 + $0x20] sm:$0x1] }
 0x14b   : > { %v1021_v5 = vsel %vm6199_vm12, %v703_v57, %v1020_v3  ;;  %v664_v7 = vpack.c.bf16 %v632_v4, %v632_v4 }
 0x14c   : > { %1022 = vst [vmem:[#allocation2 + $0xc] sm:$0xf] %v1021_v5  ;;  %v360_v5 = vld [vmem:[#allocation2 + $0x38] sm:$0x1] }
 0x14d   : > { %v706_v8 = vshrl.u32 %v664_v7, 16  ;;  %v709_v13 = vshll.u32 %v664_v7, 16 }
 0x14e   : > { %v556_v10 = vpop.f32.mrf.mxu0 }
 0x14f   : > { %v708_v12 = vrot.slane %v706_v8, 7  ;;  %v557_v14 = vadd.f32 %v6190_v50, %v556_v10 }
 0x151   : > { %v711_v20 = vor.u32 %v709_v13, %v708_v12  ;;  %v713_v21 = vrot.slane %v708_v12, 4  ;;  %v633_v22 = vmax.f32 %v557_v14, 0.0  ;;  %595 = vmatmul.bf16.gmra.mxu0 %v6133_v59 }
 0x153   : > { %v712_v23 = vsel %vm6209_vm14, %v704_v19, %v711_v20  ;;  %v1025_v24 = vsel %vm6145_vm5, %v713_v21, %v1024_v18  ;;  %v665_v25 = vpack.c.bf16 %v633_v22, %v633_v22  ;;  %v2100_v26 = vld [vmem:[#allocation2 + $0xc] sm:$0xf] }
 0x154   : > { %1023 = vst.msk [vmem:[#allocation2 + $0x10] sm:$0xf] %vm280_vm0, %v712_v23  ;;  %2164 = vrot.lane.b32.xlu1 %v2100_v26, %s6018_s30  ;;  %v2789_v37 = vld [vmem:[#allocation2 + $0xc] sm:$0xe] }
 0x155   : > { %1026 = vst [vmem:[#allocation2 + $0x14] sm:$0x1] %v1025_v24  ;;  %v715_v30 = vshrl.u32 %v665_v25, 16  ;;  %v718_v59 = vshll.u32 %v665_v25, 16  ;;  %v5496_v43 = vrot.slane %v2789_v37, 9 }
 0x156   : > { %v558_v31 = vpop.f32.mrf.mxu0  ;;  %v1763_v53 = vld [vmem:[#allocation2 + $0xc] sm:$0xe] }
 0x157   : > { %v717_v32 = vrot.slane %v715_v30, 7  ;;  %v559_v33 = vadd.f32 %v6190_v50, %v558_v31  ;;  %v5481_v10 = vrot.slane %v1763_v53, 9  ;;  %v1199_v21 = vld [vmem:[#allocation2 + $0xc] sm:$0xf] }
 0x158   : > { %v1275_v37 = vshll.u32 %v1199_v21, 16 }
 0x159   : > { %v720_v35 = vor.u32 %v718_v59, %v717_v32  ;;  %v634_v36 = vmax.f32 %v559_v33, 0.0  ;;  %v721_v55 = vrot.slane %v717_v32, 4  ;;  %v1272_v32 = vshrl.u32 %v1199_v21, 16  ;;  %v307_v33 = vld [vmem:[#allocation2 + $0x3c] sm:$0x1] }
 0x15b   : > { %v1028_v38 = vsel %vm6199_vm12, %v720_v35, %v1027_v34  ;;  %v666_v39 = vpack.c.bf16 %v634_v36, %v634_v36  ;;  %v2101_v40 = vld [vmem:[#allocation2 + $0x10] sm:$0xf]  ;;  %v1034_v34 = vld [vmem:[#allocation2 + $0x24] sm:$0xf] }
 0x15c   : > { %v6225_v41 = vld [vmem:[#allocation2 + $0x10] sm:$0xf]  ;;  %1029 = vst [vmem:[#allocation2 + $0x18] sm:$0xf] %v1028_v38  ;;  %2166 = vrot.lane.b32.xlu2 %v2101_v40, %s6018_s30  ;;  %v1765_v48 = vld [vmem:[#allocation2 + $0x14] sm:$0x1] }
 0x15d   : > { %v1764_v42 = vld [vmem:[#allocation2 + $0x10] sm:$0xf]  ;;  %v2887_v44 = vrot.slane %v6225_v41, 5  ;;  %v723_v46 = vshrl.u32 %v666_v39, 16  ;;  %v726_v47 = vshll.u32 %v666_v39, 16  ;;  %v1871_v1 = vrot.slane %v1765_v48, 5 }
 0x15e   : > { %v1868_v45 = vrot.slane %v1764_v42, 5  ;;  %v561_v49 = vpop.f32.mrf.mxu0  ;;  %v1200_v62 = vld [vmem:[#allocation2 + $0x10] sm:$0xf]  ;;  %v2791_v35 = vld [vmem:[#allocation2 + $0x14] sm:$0x1]  ;;  %v308_v38 = vsel %vm6145_vm5, 0, %v307_v33 }
 0x15f   : > { %v2888_v51 = vsel %vm6150_vm6, %v5496_v43, %v2887_v44  ;;  %v725_v56 = vrot.slane %v723_v46, 7  ;;  %v562_v58 = vadd.f32 %v6190_v50, %v561_v49  ;;  %v1135_v7 = vld [vmem:[#allocation2 + $0x10] sm:$0xf]  ;;  %v1281_v11 = vshll.u32 %v1200_v62, 16  ;;  %309 = vst [vmem:[#allocation2 + $0x3c] sm:$0x1] %v308_v38 }
 0x160   : > { %v1870_v52 = vrot.slane %v1868_v45, 4  ;;  %2997 = vrot.lane.b32.xlu1 %v2888_v51, %s6017_s26  ;;  %v1285_v12 = vshrl.u32 %v1200_v62, 16  ;;  %1167 = vst.msk [vmem:[#allocation3 + $0x24] sm:$0xf] %vm280_vm0, %v1135_v7  ;;  %v1869_v24 = vsel %vm6150_vm6, %v5481_v10, %v1868_v45  ;;  %v2889_v43 = vrot.slane %v2887_v44, 4 }
 0x161   : > { %v728_v3 = vor.u32 %v726_v47, %v725_v56  ;;  %v730_v57 = vrot.slane %v725_v56, 4  ;;  %v635_v4 = vmax.f32 %v562_v58, 0.0  ;;  %600 = vmatmul.bf16.gmra.mxu0 %v6135_v61  ;;  %v361_v61 = vsel %vm6164_vm8, 0, %v360_v5  ;;  %v1201_v45 = vld [vmem:[#allocation2 + $0x14] sm:$0x1] }
 0x162   : > { %v1872_v8 = vsel %vm6150_vm6, %v1870_v52, %v1871_v1  ;;  %v6251_v28 = vrot.slane %v1281_v11, 5  ;;  %v1287_v30 = vrot.slane %v1285_v12, 4  ;;  %362 = vst [vmem:[#allocation2 + $0x38] sm:$0x1] %v361_v61  ;;  %v1274_v51 = vrot.slane %v1272_v32, 4 }
 0x163   : > { %v729_v13 = vsel %vm6209_vm14, %v721_v55, %v728_v3  ;;  %v1032_v14 = vsel %vm6145_vm5, %v730_v57, %v1031_v0  ;;  %v667_v15 = vpack.c.bf16 %v635_v4, %v635_v4  ;;  %v1202_v18 = vld [vmem:[#allocation2 + $0x18] sm:$0xf]  ;;  %v2890_v52 = vrot.slane %v2791_v35, 5  ;;  %v363_v1 = vld [vmem:[#allocation2 + $0x44] sm:$0x1] }
 0x164   : > { %1030 = vst.msk [vmem:[#allocation2 + $0x1c] sm:$0xf] %vm280_vm0, %v729_v13  ;;  %1977 = vrot.lane.b32.xlu2 %v1872_v8, %s6016_s23  ;;  %v1296_v19 = vshrl.u32 %v1202_v18, 16  ;;  %v1299_v20 = vshll.u32 %v1202_v18, 16  ;;  %v3126_v42 = vld [vmem:[#allocation2 + $0x18] sm:$0xf]  ;;  %v1288_v46 = vor.u32 %v1287_v30, %v6251_v28 }
 0x165   : > { %1033 = vst [vmem:[#allocation2 + $0x20] sm:$0x1] %v1032_v14  ;;  %v732_v22 = vshrl.u32 %v667_v15, 16  ;;  %v735_v23 = vshll.u32 %v667_v15, 16  ;;  %v1277_v55 = vrot.slane %v1275_v37, 5  ;;  %v1291_v56 = vshll.u32 %v1201_v45, 16 }
 0x166   : > { %v563_v25 = vpop.f32.mrf.mxu0  ;;  %v1298_v26 = vrot.slane %v1296_v19, 4  ;;  %v1301_v27 = vrot.slane %v1299_v20, 5  ;;  %v2891_v60 = vsel %vm6150_vm6, %v2889_v43, %v2890_v52  ;;  %v1289_v0 = vrot.slane %v1288_v46, 4  ;;  %v1038_v7 = vld [vmem:[#allocation2 + $0x2c] sm:$0x1] }
 0x167   : > { %v734_v59 = vrot.slane %v732_v22, 7  ;;  %v564_v31 = vadd.f32 %v6190_v50, %v563_v25  ;;  %v364_v5 = vsel %vm6164_vm8, 0, %v363_v1  ;;  %v1278_v10 = vor.u32 %v1277_v55, %v1274_v51  ;;  %v2293_v20 = vld [vmem:[#allocation2 + $0xc] sm:$0xf]  ;;  %v1041_v32 = vld [vmem:[#allocation2 + $0x30] sm:$0xf] }
 0x168   : > { %1975 = vrot.lane.b32.xlu1 %v1869_v24, %s6016_s23  ;;  %v1302_v36 = vor.u32 %v1301_v27, %v1298_v26  ;;  %365 = vst [vmem:[#allocation2 + $0x44] sm:$0x1] %v364_v5  ;;  %v1293_v14 = vrot.slane %v1291_v56, 5  ;;  %v2342_v27 = vshrl.u32 %v2293_v20, 16  ;;  %v3318_v33 = vld [vmem:[#allocation2 + $0x18] sm:$0xf] }
 0x169   : > { %v737_v39 = vor.u32 %v735_v23, %v734_v59  ;;  %v636_v40 = vmax.f32 %v564_v31, 0.0  ;;  %v738_v3 = vrot.slane %v734_v59, 4  ;;  %v1279_v21 = vrot.slane %v1278_v10, 4  ;;  %v310_v23 = vld [vmem:[#allocation2 + $0x48] sm:$0x1] }
 0x16a   : > { %v1303_v53 = vrot.slane %v1302_v36, 4  ;;  %v1294_v19 = vsel %vm6170_vm11, %v1289_v0, %v1293_v14  ;;  %v311_v26 = vsel %vm6145_vm5, 0, %v310_v23  ;;  %v2345_v31 = vshll.u32 %v2293_v20, 16  ;;  %v331_v43 = vld [vmem:[#allocation2 + $0x9c] sm:$0x1]  ;;  %v5933_v46 = vld [vmem:[%s8387_s3 + $0x88] sm:$0xff] }
 0x16b   : > { %v1035_v47 = vsel %vm6199_vm12, %v737_v39, %v1034_v34  ;;  %v668_v48 = vpack.c.bf16 %v636_v40, %v636_v40  ;;  %v6262_v49 = vld [vmem:[#allocation2 + $0x1c] sm:$0xf]  ;;  %v1284_v25 = vsel %vm6170_vm11, %v1279_v21, %v6251_v28  ;;  %312 = vst [vmem:[#allocation2 + $0x48] sm:$0x1] %v311_v26  ;;  %v2344_v36 = vrot.slane %v2342_v27, 4  ;;  %5950 = vmatpush.bf16.msra.mxu3 %v5933_v46 }
 0x16c   : > { %1036 = vst [vmem:[#allocation2 + $0x24] sm:$0xf] %v1035_v47  ;;  %3190 = vrot.lane.b32.xlu2 %v3126_v42, %s6016_s23  ;;  %v1305_v54 = vshll.u32 %v6262_v49, 16  ;;  %v3127_v38 = vld [vmem:[#allocation2 + $0x1c] sm:$0xf]  ;;  %v3367_v39 = vshrl.u32 %v3318_v33, 16 }
 0x16d   : > { %v740_v41 = vshrl.u32 %v668_v48, 16  ;;  %v743_v44 = vshll.u32 %v668_v48, 16  ;;  %v2347_v40 = vrot.slane %v2345_v31, 5  ;;  %v2102_v42 = vld [vmem:[#allocation2 + $0x18] sm:$0xf]  ;;  %v3370_v45 = vshll.u32 %v3318_v33, 16 }
 0x16e   : > { %v566_v58 = vpop.f32.mrf.mxu0  ;;  %v6268_v62 = vrot.slane %v1305_v54, 5  ;;  %v2792_v51 = vld [vmem:[#allocation2 + $0x18] sm:$0xe]  ;;  %v366_v54 = vld [vmem:[#allocation2 + $0x50] sm:$0x1]  ;;  %v1309_v26 = vshrl.u32 %v6262_v49, 16 }
 0x16f   : > { %v742_v57 = vrot.slane %v740_v41, 7  ;;  %v567_v4 = vadd.f32 %v6190_v50, %v566_v58  ;;  %v1766_v52 = vld [vmem:[#allocation2 + $0x18] sm:$0xe]  ;;  %v2793_v41 = vld [vmem:[#allocation2 + $0x1c] sm:$0xf]  ;;  %v2348_v5 = vor.u32 %v2347_v40, %v2344_v36 }
 0x170   : > { %2999 = vrot.lane.b32.xlu1 %v2891_v60, %s6017_s26  ;;  %v1308_v8 = vsel %vm6170_vm11, %v1303_v53, %v6268_v62  ;;  %v332_v53 = vsel %vm6145_vm5, 0, %v331_v43  ;;  %v1767_v0 = vld [vmem:[#allocation2 + $0x1c] sm:$0xf]  ;;  %v1045_v1 = vld [vmem:[#allocation2 + $0x38] sm:$0x1]  ;;  %v5482_v14 = vrot.slane %v1766_v52, 9 }
 0x171   : > { %v745_v11 = vor.u32 %v743_v44, %v742_v57  ;;  %v747_v12 = vrot.slane %v742_v57, 4  ;;  %v637_v13 = vmax.f32 %v567_v4, 0.0  ;;  %605 = vmatmul.bf16.gmra.mxu0 %v6137_v63  ;;  %1639 = vrot.lane.b32.xlu0 %v1308_v8, %s6017_s26  ;;  %333 = vst [vmem:[#allocation2 + $0x9c] sm:$0x1] %v332_v53  ;;  %v367_v44 = vsel %vm6164_vm8, 0, %v366_v54 }
 0x172   : > { %368 = vst [vmem:[#allocation2 + $0x50] sm:$0x1] %v367_v44  ;;  %v3369_v57 = vrot.slane %v3367_v39, 4  ;;  %v3372_v4 = vrot.slane %v3370_v45, 5  ;;  %v2103_v20 = vld [vmem:[#allocation2 + $0x1c] sm:$0xf] }
 0x173   : > { %v746_v15 = vsel %vm6209_vm14, %v738_v3, %v745_v11  ;;  %v1039_v18 = vsel %vm6145_vm5, %v747_v12, %v1038_v7  ;;  %v669_v61 = vpack.c.bf16 %v637_v13, %v637_v13  ;;  %v3319_v3 = vld [vmem:[#allocation2 + $0x1c] sm:$0xf]  ;;  %v5932_v11 = vld [vmem:[%s8387_s3 + $0x80] sm:$0xff]  ;;  %v5497_v12 = vrot.slane %v2792_v51, 9  ;;  %v6333_v45 = vld [vmem:[#allocation2 + $0x10] sm:$0xf] }
 0x174   : > { %1037 = vst.msk [vmem:[#allocation2 + $0x28] sm:$0xf] %vm280_vm0, %v746_v15  ;;  %1637 = vrot.lane.b32.xlu2 %v1294_v19, %s6017_s26  ;;  %v2894_v13 = vrot.slane %v2793_v41, 5  ;;  %v1875_v15 = vrot.slane %v1767_v0, 5  ;;  %v3376_v21 = vshll.u32 %v3319_v3, 16  ;;  %5951 = vmatpush.bf16.msra.mxu3 %v5932_v11  ;;  %v3380_v33 = vshrl.u32 %v3319_v3, 16 }
 0x175   : > { %1040 = vst [vmem:[#allocation2 + $0x2c] sm:$0x1] %v1039_v18  ;;  %v749_v63 = vshrl.u32 %v669_v61, 16  ;;  %v752_v22 = vshll.u32 %v669_v61, 16  ;;  %v1048_v27 = vld [vmem:[#allocation2 + $0x3c] sm:$0xf] }
 0x176   : > { %v568_v24 = vpop.f32.mrf.mxu0  ;;  %v1876_v31 = vsel %vm6150_vm6, %v5482_v14, %v1875_v15  ;;  %v2896_v40 = vrot.slane %v2894_v13, 4  ;;  %v6336_v51 = vrot.slane %v1875_v15, 4  ;;  %v3382_v53 = vrot.slane %v3380_v33, 4  ;;  %v1768_v11 = vld [vmem:[#allocation2 + $0x20] sm:$0x1] }
 0x177   : > { %v751_v30 = vrot.slane %v749_v63, 7  ;;  %v569_v59 = vadd.f32 %v6190_v50, %v568_v24  ;;  %v3373_v63 = vor.u32 %v3372_v4, %v3369_v57 }
 0x178   : > { %1635 = vrot.lane.b32.xlu1 %v1284_v25, %s6017_s26  ;;  %v2794_v25 = vld [vmem:[#allocation2 + $0x20] sm:$0x1] }
 0x179   : > { %v754_v34 = vor.u32 %v752_v22, %v751_v30  ;;  %v638_v35 = vmax.f32 %v569_v59, 0.0  ;;  %v755_v56 = vrot.slane %v751_v30, 4  ;;  %v6315_v22 = vrot.slane %v2348_v5, 4 }
 0x17a   : > { %v2895_v59 = vsel %vm6150_vm6, %v5497_v12, %v2894_v13  ;;  %v3374_v39 = vrot.slane %v3373_v63, 4  ;;  %v387_v12 = vld [vmem:[#allocation2 + $0xa4] sm:$0x1]  ;;  %v6349_v13 = vpop.permute.xlu2 %1973 }
 0x17b   : > { %v1042_v37 = vsel %vm6199_vm12, %v754_v34, %v1041_v32  ;;  %v670_v28 = vpack.c.bf16 %v638_v35, %v638_v35  ;;  %v6322_v34 = vld [vmem:[#allocation2 + $0x20] sm:$0x1] }
 0x17c   : > { %1043 = vst [vmem:[#allocation2 + $0x30] sm:$0xf] %v1042_v37  ;;  %3192 = vrot.lane.b32.xlu2 %v3127_v38, %s6016_s23  ;;  %v6329_v37 = vrot.slane %v3376_v21, 5  ;;  %v313_v38 = vld [vmem:[#allocation2 + $0x54] sm:$0x1]  ;;  %v3386_v54 = vshll.u32 %v6322_v34, 16 }
 0x17d   : > { %v757_v47 = vshrl.u32 %v670_v28, 16  ;;  %v760_v48 = vshll.u32 %v670_v28, 16  ;;  %v314_v43 = vsel %vm6145_vm5, 0, %v313_v38  ;;  %v369_v21 = vld [vmem:[#allocation2 + $0x5c] sm:$0x1] }
 0x17e   : > { %v571_v55 = vpop.f32.mrf.mxu0  ;;  %315 = vst [vmem:[#allocation2 + $0x54] sm:$0x1] %v314_v43 }
 0x17f   : > { %v759_v58 = vrot.slane %v757_v47, 7  ;;  %v572_v60 = vadd.f32 %v6190_v50, %v571_v55  ;;  %v1311_v55 = vrot.slane %v1309_v26, 4 }
 0x180   : > { %2168 = vrot.lane.b32.xlu1 %v2102_v42, %s6018_s30  ;;  %v2897_v42 = vrot.slane %v2794_v25, 5 }
 0x181   : > { %v762_v7 = vor.u32 %v760_v48, %v759_v58  ;;  %v764_v8 = vrot.slane %v759_v58, 4  ;;  %v639_v10 = vmax.f32 %v572_v60, 0.0  ;;  %v2351_v60 = vshll.u32 %v6333_v45, 16 }
 0x182   : > { %v2898_v3 = vsel %vm6150_vm6, %v2896_v40, %v2897_v42 }
 0x183   : > { %v763_v18 = vsel %vm6209_vm14, %v755_v56, %v762_v7  ;;  %v1046_v61 = vsel %vm6145_vm5, %v764_v8, %v1045_v1  ;;  %v671_v19 = vpack.c.bf16 %v639_v10, %v639_v10  ;;  %v3884_v28 = vld [vmem:[#allocation2 + $0x30] sm:$0xe]  ;;  %v3379_v1 = vsel %vm6170_vm11, %v3374_v39, %v6329_v37 }
 0x184   : > { %1044 = vst.msk [vmem:[#allocation2 + $0x34] sm:$0xf] %vm280_vm0, %v763_v18  ;;  %2170 = vrot.lane.b32.xlu2 %v2103_v20, %s6018_s30  ;;  %v5514_v52 = vrot.slane %v3884_v28, 9  ;;  %v1878_v28 = vrot.slane %v1768_v11, 5  ;;  %v6369_v39 = vrot.slane %v3386_v54, 5  ;;  %v6371_v40 = vrot.slane %v2351_v60, 5 }
 0x185   : > { %1047 = vst [vmem:[#allocation2 + $0x38] sm:$0x1] %v1046_v61  ;;  %v766_v23 = vshrl.u32 %v671_v19, 16  ;;  %v769_v24 = vshll.u32 %v671_v19, 16  ;;  %v388_v19 = vsel %vm6164_vm8, 0, %v387_v12 }
 0x186   : > { %v573_v30 = vpop.f32.mrf.mxu0  ;;  %v611_v32 = vpop.f32.mrf.mxu1  ;;  %389 = vst [vmem:[#allocation2 + $0xa4] sm:$0x1] %v388_v19 }
 0x187   : > { %v6324_v35 = vrot.slane %v766_v23, 7  ;;  %v574_v36 = vadd.f32 %v6190_v50, %v573_v30  ;;  %v612_v49 = vadd.f32 %v6190_v50, %v611_v32  ;;  %v1052_v23 = vld [vmem:[#allocation2 + $0x44] sm:$0x1]  ;;  %v1312_v32 = vor.u32 %v1311_v55, %v6268_v62 }
 0x188   : > { %3001 = vrot.lane.b32.xlu1 %v2895_v59, %s6017_s26  ;;  %v3383_v59 = vor.u32 %v3382_v53, %v6329_v37  ;;  %v2355_v55 = vshrl.u32 %v6333_v45, 16  ;;  %v1133_v45 = vld [vmem:[#allocation2 + $0x4] sm:$0xf] }
 0x189   : > { %v771_v46 = vor.u32 %v769_v24, %v6324_v35  ;;  %v640_v47 = vmax.f32 %v574_v36, 0.0  ;;  %v655_v48 = vmax.f32 %v612_v49, 0.0  ;;  %v772_v0 = vrot.slane %v6324_v35, 4  ;;  %v1204_v49 = vld [vmem:[#allocation2 + $0x20] sm:$0x1] }
 0x18a   : > { %1165 = vst.msk [vmem:[#allocation3 + $0xc] sm:$0xf] %vm280_vm0, %v1133_v45 }
 0x18b   : > { %v1049_v41 = vsel %vm6199_vm12, %v771_v46, %v1048_v27  ;;  %v672_v44 = vpack.c.bf16 %v640_v47, %v640_v47  ;;  %v687_v56 = vpack.c.bf16 %v655_v48, %v655_v48  ;;  %v3885_v58 = vld [vmem:[#allocation2 + $0x34] sm:$0xf]  ;;  %v1104_v27 = vld [vmem:[#allocation2 + $0x9c] sm:$0xf]  ;;  %v6381_v47 = vrot.slane %v3383_v59, 4 }
 0x18c   : > { %1050 = vst [vmem:[#allocation2 + $0x3c] sm:$0xf] %v1049_v41  ;;  %1979 = vrot.lane.b32.xlu2 %v1876_v31, %s6016_s23  ;;  %v3886_v57 = vld [vmem:[#allocation2 + $0x38] sm:$0x1]  ;;  %v3990_v4 = vrot.slane %v3885_v58, 5  ;;  %v370_v31 = vsel %vm6164_vm8, 0, %v369_v21 }
 0x18d   : > { %v774_v5 = vshrl.u32 %v672_v44, 16  ;;  %v777_v7 = vshll.u32 %v672_v44, 16  ;;  %v902_v8 = vshrl.u32 %v687_v56, 16  ;;  %v905_v10 = vshll.u32 %v687_v56, 16  ;;  %371 = vst [vmem:[#allocation2 + $0x5c] sm:$0x1] %v370_v31 }
 0x18e   : > { %v576_v14 = vpop.f32.mrf.mxu0  ;;  %v3991_v15 = vsel %vm6150_vm6, %v5514_v52, %v3990_v4  ;;  %v3992_v18 = vrot.slane %v3990_v4, 4  ;;  %v3993_v61 = vrot.slane %v3886_v57, 5  ;;  %v613_v20 = vpop.f32.mrf.mxu1  ;;  %v6383_v48 = vrot.slane %v1312_v32, 4  ;;  %v1055_v41 = vld [vmem:[#allocation2 + $0x48] sm:$0xf] }
 0x18f   : > { %v776_v63 = vrot.slane %v774_v5, 7  ;;  %v577_v24 = vadd.f32 %v6190_v50, %v576_v14  ;;  %v6356_v25 = vrot.slane %v902_v8, 7  ;;  %4122 = vst.msk [vmem:[#allocation3 + $0x38] sm:$0xf] %vm280_vm0, %v3991_v15  ;;  %v614_v26 = vadd.f32 %v6190_v50, %v613_v20  ;;  %v2104_v57 = vld [vmem:[#allocation2 + $0x24] sm:$0xf] }
 0x190   : > { %3750 = vrot.lane.b32.xlu1 %v3379_v1, %s6018_s30  ;;  %v3994_v30 = vsel %vm6150_vm6, %v3992_v18, %v3993_v61  ;;  %v1315_v52 = vshll.u32 %v1204_v49, 16  ;;  %v1879_v56 = vsel %vm6150_vm6, %v6336_v51, %v1878_v28  ;;  %v2354_v5 = vsel %vm6170_vm11, %v6315_v22, %v6371_v40  ;;  %v1108_v15 = vld [vmem:[#allocation2 + $0xa4] sm:$0x1] }
 0x191   : > { %v779_v33 = vor.u32 %v777_v7, %v776_v63  ;;  %v781_v34 = vrot.slane %v776_v63, 4  ;;  %v641_v35 = vmax.f32 %v577_v24, 0.0  ;;  %v907_v36 = vor.u32 %v905_v10, %v6356_v25  ;;  %4123 = vst.msk [vmem:[#allocation3 + $0x44] sm:$0xf] %vm280_vm0, %v3994_v30  ;;  %v1634_v10 = vpop.permute.xlu2 %1633  ;;  %v6403_v21 = vld [vmem:[#allocation2 + $0x24] sm:$0xf]  ;;  %v6410_v30 = vpop.permute.xlu1 %1971 }
 0x192   : > { %v656_v38 = vmax.f32 %v614_v26, 0.0  ;;  %v908_v51 = vrot.slane %v6356_v25, 4  ;;  %v6400_v18 = vrot.slane %v1315_v52, 5  ;;  %1729 = vst.msk [vmem:[#allocation3 + $0xc] sm:$0xf] %vm1727_vm15, %v1634_v10 }
 0x193   : > { %v780_v37 = vsel %vm6209_vm14, %v772_v0, %v779_v33  ;;  %v1053_v62 = vsel %vm6145_vm5, %v781_v34, %v1052_v23  ;;  %v673_v42 = vpack.c.bf16 %v641_v35, %v641_v35  ;;  %v1105_v43 = vsel %vm6199_vm12, %v907_v36, %v1104_v27  ;;  %v3887_v4 = vld [vmem:[#allocation2 + $0x3c] sm:$0xe]  ;;  %2757 = vst.msk [vmem:[#allocation3 + $0x4] sm:$0xf] %vm280_vm0, %v2354_v5  ;;  %v316_v26 = vld [vmem:[#allocation2 + $0x60] sm:$0x1] }
 0x194   : > { %1051 = vst.msk [vmem:[#allocation2 + $0x40] sm:$0xf] %vm280_vm0, %v780_v37  ;;  %3003 = vrot.lane.b32.xlu2 %v2898_v3, %s6017_s26  ;;  %v688_v46 = vpack.c.bf16 %v656_v38, %v656_v38  ;;  %v5515_v22 = vrot.slane %v3887_v4, 9  ;;  %v3128_v32 = vld [vmem:[#allocation2 + $0x24] sm:$0xf]  ;;  %v6418_v35 = vrot.slane %v2355_v55, 4 }
 0x195   : > { %1054 = vst [vmem:[#allocation2 + $0x44] sm:$0x1] %v1053_v62  ;;  %v783_v53 = vshrl.u32 %v673_v42, 16  ;;  %v786_v54 = vshll.u32 %v673_v42, 16  ;;  %v6422_v38 = vld [vmem:[#allocation2 + $0x3c] sm:$0xe] }
 0x196   : > { %1106 = vst [vmem:[#allocation2 + $0x9c] sm:$0xf] %v1105_v43  ;;  %v578_v44 = vpop.f32.mrf.mxu0  ;;  %v5562_v58 = vld [vmem:[#allocation3 + $0x38] sm:$0xf]  ;;  %v910_v60 = vshrl.u32 %v688_v46, 16  ;;  %v913_v0 = vshll.u32 %v688_v46, 16  ;;  %v616_v61 = vpop.f32.mrf.mxu1 }
 0x197   : > { %v6389_v1 = vrot.slane %v783_v53, 7  ;;  %v579_v3 = vadd.f32 %v6190_v50, %v578_v44  ;;  %v617_v27 = vadd.f32 %v6190_v50, %v616_v61  ;;  %v3391_v37 = vshrl.u32 %v6403_v21, 16  ;;  %v6425_v62 = vld [vmem:[#allocation2 + $0x24] sm:$0xf]  ;;  %v1059_v42 = vld [vmem:[#allocation2 + $0x50] sm:$0x1] }
 0x198   : > { %1981 = vrot.lane.b32.xlu1 %v1879_v56, %s6016_s23  ;;  %v5876_v7 = vld [vmem:[#allocation3 + $0x40] sm:$0xf0]  ;;  %v912_v8 = vrot.slane %v910_v60, 7  ;;  %v317_v56 = vsel %vm6145_vm5, 0, %v316_v26  ;;  %v5485_v10 = vrot.slane %v6422_v38, 9 }
 0x199   : > { %v788_v11 = vor.u32 %v786_v54, %v6389_v1  ;;  %v642_v12 = vmax.f32 %v579_v3, 0.0  ;;  %v5563_v14 = vor.u32 %v5876_v7, %v5562_v58  ;;  %v789_v36 = vrot.slane %v6389_v1, 4  ;;  %v334_v54 = vld [vmem:[#allocation2 + $0xa8] sm:$0x1]  ;;  %v5923_v60 = vld [vmem:[%s8387_s3 + $0x38] sm:$0xff]  ;;  %v5922_v3 = vld [vmem:[%s8387_s3 + $0x30] sm:$0xff] }
 0x19a   : > { %v915_v19 = vor.u32 %v913_v0, %v912_v8  ;;  %v917_v20 = vrot.slane %v912_v8, 4  ;;  %v335_v58 = vsel %vm6145_vm5, 0, %v334_v54  ;;  %318 = vst [vmem:[#allocation2 + $0x60] sm:$0x1] %v317_v56  ;;  %v657_v1 = vmax.f32 %v617_v27, 0.0  ;;  %4651 = vmatpush.bf16.msrb.mxu1 %v5923_v60 }
 0x19b   : > { %v1056_v63 = vsel %vm6199_vm12, %v788_v11, %v1055_v41  ;;  %v674_v23 = vpack.c.bf16 %v642_v12, %v642_v12  ;;  %5794 = vmatmul.msk.bf16.vlgmr.msra.gmra.mxu3 %vm4602_vm1, %v5563_v14  ;;  %v2109_v24 = vld [vmem:[#allocation2 + $0x40] sm:$0xf]  ;;  %v3389_v7 = vsel %vm6170_vm11, %v6381_v47, %v6369_v39  ;;  %336 = vst [vmem:[#allocation2 + $0xa8] sm:$0x1] %v335_v58  ;;  %v1320_v12 = vshrl.u32 %v6425_v62, 16 }
 0x19c   : > { %v3888_v25 = vld [vmem:[#allocation2 + $0x40] sm:$0xf]  ;;  %1057 = vst [vmem:[#allocation2 + $0x48] sm:$0xf] %v1056_v63  ;;  %2172 = vrot.lane.b32.xlu2 %v2104_v57, %s6018_s30  ;;  %2182 = vrot.lane.b32.xlu0 %v2109_v24, %s6018_s30  ;;  %v916_v59 = vsel %vm6209_vm14, %v908_v51, %v915_v19  ;;  %v1109_v31 = vsel %vm6145_vm5, %v917_v20, %v1108_v15  ;;  %v3889_v33 = vld [vmem:[#allocation2 + $0x44] sm:$0x1] }
 0x19d   : > { %v3997_v34 = vrot.slane %v3888_v25, 5  ;;  %v791_v49 = vshrl.u32 %v674_v23, 16  ;;  %v794_v28 = vshll.u32 %v674_v23, 16  ;;  %1107 = vst.msk [vmem:[#allocation2 + $0xa0] sm:$0xf] %vm280_vm0, %v916_v59  ;;  %v4000_v53 = vrot.slane %v3889_v33, 5  ;;  %v1632_v23 = vpop.permute.xlu1 %1631 }
 0x19e   : > { %v581_v43 = vpop.f32.mrf.mxu0  ;;  %1110 = vst [vmem:[#allocation2 + $0xa4] sm:$0x1] %v1109_v31  ;;  %v3148_v44 = vld [vmem:[#allocation2 + $0x9c] sm:$0xf]  ;;  %v3394_v57 = vshll.u32 %v6403_v21, 16  ;;  %v689_v11 = vpack.c.bf16 %v657_v1, %v657_v1  ;;  %4652 = vmatpush.bf16.msrb.mxu1 %v5922_v3  ;;  %v1318_v25 = vsel %vm6170_vm11, %v6383_v48, %v6400_v18  ;;  %v493_v1 = vpop.trf.xlu0 }
 0x19f   : > { %v3998_v46 = vsel %vm6150_vm6, %v5515_v22, %v3997_v34  ;;  %v3999_v52 = vrot.slane %v3997_v34, 4  ;;  %v793_v55 = vrot.slane %v791_v49, 7  ;;  %v582_v41 = vadd.f32 %v6190_v50, %v581_v43  ;;  %v372_v51 = vld [vmem:[#allocation2 + $0x68] sm:$0x1]  ;;  %v6450_v8 = vld [vmem:[#allocation2 + $0x40] sm:$0xf]  ;;  %625 = vmatmul.bf16.gmra.mxu1 %v493_v1 }
 0x1a0   : > { %3194 = vrot.lane.b32.xlu1 %v3128_v32, %s6016_s23  ;;  %4124 = vst.msk [vmem:[#allocation3 + $0x50] sm:$0xf] %vm280_vm0, %v3998_v46  ;;  %v373_v39 = vsel %vm6164_vm8, 0, %v372_v51  ;;  %v919_v47 = vshrl.u32 %v689_v11, 16  ;;  %v922_v19 = vshll.u32 %v689_v11, 16  ;;  %v1896_v63 = vrot.slane %v6450_v8, 5 }
 0x1a1   : > { %v4001_v0 = vsel %vm6150_vm6, %v3999_v52, %v4000_v53  ;;  %v796_v4 = vor.u32 %v794_v28, %v793_v55  ;;  %v798_v45 = vrot.slane %v793_v55, 4  ;;  %v643_v5 = vmax.f32 %v582_v41, 0.0  ;;  %2069 = vst.msk [vmem:[#allocation3 + $0xc] sm:$0xf] %vm2067_vm2, %v6349_v13  ;;  %v1132_v20 = vld [vmem:[#allocation2] sm:$0xf] }
 0x1a2   : > { %4125 = vst.msk [vmem:[#allocation3 + $0x5c] sm:$0xf] %vm280_vm0, %v4001_v0  ;;  %v5921_v13 = vld [vmem:[%s8387_s3 + $0x28] sm:$0xff]  ;;  %v6473_v27 = vrot.slane %v919_v47, 7  ;;  %v6475_v59 = vld [vmem:[#allocation2 + $0x24] sm:$0xe] }
 0x1a3   : > { %v797_v14 = vsel %vm6209_vm14, %v789_v36, %v796_v4  ;;  %v1060_v15 = vsel %vm6145_vm5, %v798_v45, %v1059_v42  ;;  %v675_v61 = vpack.c.bf16 %v643_v5, %v643_v5  ;;  %v6477_v31 = vld [vmem:[#allocation2 + $0x28] sm:$0xf]  ;;  %374 = vst [vmem:[#allocation2 + $0x68] sm:$0x1] %v373_v39  ;;  %v6479_v32 = vrot.slane %v3391_v37, 4  ;;  %4653 = vmatpush.bf16.msrb.mxu1 %v5921_v13  ;;  %v5920_v52 = vld [vmem:[%s8387_s3 + $0x20] sm:$0xff] }
 0x1a4   : > { %1058 = vst.msk [vmem:[#allocation2 + $0x4c] sm:$0xf] %vm280_vm0, %v797_v14  ;;  %3752 = vrot.lane.b32.xlu2 %v3389_v7, %s6018_s30  ;;  %3234 = vrot.lane.b32.xlu0 %v3148_v44, %s6016_s23  ;;  %v3890_v36 = vld [vmem:[#allocation2 + $0x48] sm:$0xe]  ;;  %v6486_v48 = vrot.slane %v3394_v57, 5  ;;  %v924_v28 = vor.u32 %v922_v19, %v6473_v27  ;;  %v6504_v44 = vrot.slane %v1320_v12, 4 }
 0x1a5   : > { %1061 = vst [vmem:[#allocation2 + $0x50] sm:$0x1] %v1060_v15  ;;  %v800_v22 = vshrl.u32 %v675_v61, 16  ;;  %v803_v21 = vshll.u32 %v675_v61, 16  ;;  %v1062_v18 = vld [vmem:[#allocation2 + $0x54] sm:$0xf] }
 0x1a6   : > { %v583_v24 = vpop.f32.mrf.mxu0  ;;  %1164 = vst.msk [vmem:[#allocation3] sm:$0xf] %vm280_vm0, %v1132_v20  ;;  %v3129_v43 = vld [vmem:[#allocation2 + $0x28] sm:$0xf]  ;;  %v5516_v55 = vrot.slane %v3890_v36, 9  ;;  %v1882_v60 = vrot.slane %v6477_v31, 5 }
 0x1a7   : > { %v5574_v26 = vld [vmem:[#allocation3 + $0x50] sm:$0xf]  ;;  %v6481_v33 = vrot.slane %v800_v22, 7  ;;  %v584_v34 = vadd.f32 %v6190_v50, %v583_v24  ;;  %1728 = vst.msk [vmem:[#allocation3] sm:$0xf] %vm1727_vm15, %v1632_v23  ;;  %v1897_v50 = vsel %vm6150_vm6, %v5485_v10, %v1896_v63  ;;  %4654 = vmatpush.bf16.msrb.mxu1 %v5920_v52  ;;  %v5919_v15 = vld [vmem:[%s8387_s3 + $0x18] sm:$0xff] }
 0x1a8   : > { %1641 = vrot.lane.b32.xlu1 %v1318_v25, %s6017_s26  ;;  %v1111_v46 = vld [vmem:[#allocation2 + $0xa8] sm:$0xf]  ;;  %2068 = vst.msk [vmem:[#allocation3] sm:$0xf] %vm2067_vm2, %v6410_v30  ;;  %v319_v41 = vld [vmem:[#allocation2 + $0x6c] sm:$0x1] }
 0x1a9   : > { %v5879_v49 = vld [vmem:[#allocation3 + $0x58] sm:$0xf0]  ;;  %v805_v38 = vor.u32 %v803_v21, %v6481_v33  ;;  %v644_v37 = vmax.f32 %v584_v34, 0.0  ;;  %v1112_v53 = vsel %vm6199_vm12, %v924_v28, %v1111_v46  ;;  %v6502_v54 = vld [vmem:[#allocation2 + $0x28] sm:$0xf]  ;;  %v5483_v30 = vrot.slane %v6475_v59, 9 }
 0x1aa   : > { %v5575_v42 = vor.u32 %v5879_v49, %v5574_v26  ;;  %1113 = vst [vmem:[#allocation2 + $0xa8] sm:$0xf] %v1112_v53  ;;  %v2105_v3 = vld [vmem:[#allocation2 + $0x28] sm:$0xf]  ;;  %v320_v45 = vsel %vm6145_vm5, 0, %v319_v41  ;;  %v2901_v11 = vrot.slane %v6502_v54, 5  ;;  %v2358_v21 = vor.u32 %v6418_v35, %v6371_v40 }
 0x1ab   : > { %v1063_v56 = vsel %vm6199_vm12, %v805_v38, %v1062_v18  ;;  %v676_v58 = vpack.c.bf16 %v644_v37, %v644_v37  ;;  %v3891_v0 = vld [vmem:[#allocation2 + $0x4c] sm:$0xf]  ;;  %v2295_v5 = vld [vmem:[#allocation2 + $0x14] sm:$0x1]  ;;  %v2795_v10 = vld [vmem:[#allocation2 + $0x24] sm:$0xe]  ;;  %v3397_v35 = vor.u32 %v6486_v48, %v6479_v32  ;;  %4655 = vmatpush.bf16.msrb.mxu1 %v5919_v15  ;;  %v1883_v38 = vsel %vm6150_vm6, %v5483_v30, %v1882_v60 }
 0x1ac   : > { %5795 = vmatmul.msk.bf16.gmra.mxu3 %vm4602_vm1, %v5575_v42  ;;  %1064 = vst [vmem:[#allocation2 + $0x54] sm:$0xf] %v1063_v56  ;;  %3196 = vrot.lane.b32.xlu2 %v3129_v43, %s6016_s23  ;;  %v3892_v57 = vld [vmem:[#allocation2 + $0x50] sm:$0x1]  ;;  %v4004_v4 = vrot.slane %v3891_v0, 5  ;;  %v1323_v20 = vshll.u32 %v6425_v62, 16 }
 0x1ad   : > { %1991 = vrot.lane.b32.xlu0 %v1897_v50, %s6016_s23  ;;  %v808_v51 = vshrl.u32 %v676_v58, 16  ;;  %v811_v7 = vshll.u32 %v676_v58, 16  ;;  %v4007_v12 = vrot.slane %v3892_v57, 5  ;;  %v6516_v14 = vld [vmem:[#allocation2 + $0x28] sm:$0xf]  ;;  %v806_v23 = vrot.slane %v6481_v33, 4 }
 0x1ae   : > { %v1066_v61 = vld [vmem:[#allocation2 + $0x5c] sm:$0x1]  ;;  %v586_v39 = vpop.f32.mrf.mxu0  ;;  %v4005_v47 = vsel %vm6150_vm6, %v5516_v55, %v4004_v4  ;;  %v4006_v19 = vrot.slane %v4004_v4, 4  ;;  %321 = vst [vmem:[#allocation2 + $0x6c] sm:$0x1] %v320_v45  ;;  %v5918_v49 = vld [vmem:[%s8387_s3 + $0x10] sm:$0xff] }
 0x1af   : > { %v375_v22 = vld [vmem:[#allocation2 + $0x74] sm:$0x1]  ;;  %v810_v13 = vrot.slane %v808_v51, 7  ;;  %v6530_v24 = vld [vmem:[%s8386_s2] ss:$0 sm:$0xff]  ;;  %v2361_v28 = vshll.u32 %v2295_v5, 16  ;;  %4656 = vmatpush.bf16.msrb.mxu1 %v5918_v49 }
 0x1b0   : > { %v587_v25 = vadd.f32 %v6530_v24, %v586_v39  ;;  %2174 = vrot.lane.b32.xlu1 %v2105_v3, %s6018_s30  ;;  %4126 = vst.msk [vmem:[#allocation3 + $0x68] sm:$0xf] %vm280_vm0, %v4005_v47  ;;  %v2797_v26 = vld [vmem:[#allocation2 + $0x2c] sm:$0x1]  ;;  %v376_v62 = vsel %vm6164_vm8, 0, %v375_v22  ;;  %v4008_v40 = vsel %vm6150_vm6, %v4006_v19, %v4007_v12  ;;  %v5498_v37 = vrot.slane %v2795_v10, 9 }
 0x1b1   : > { %v2125_v59 = vld [vmem:[#allocation2 + $0xa0] sm:$0xf]  ;;  %377 = vst [vmem:[#allocation2 + $0x74] sm:$0x1] %v376_v62  ;;  %v1136_v33 = vld [vmem:[#allocation2 + $0x18] sm:$0xf]  ;;  %v813_v34 = vor.u32 %v811_v7, %v810_v13 }
 0x1b2   : > { %v815_v36 = vrot.slane %v810_v13, 4  ;;  %v645_v18 = vmax.f32 %v587_v25, 0.0  ;;  %4127 = vst.msk [vmem:[#allocation3 + $0x74] sm:$0xf] %vm280_vm0, %v4008_v40  ;;  %v3400_v32 = vshll.u32 %v6516_v14, 16  ;;  %v1325_v48 = vrot.slane %v1323_v20, 5 }
 0x1b3   : > { %v814_v42 = vsel %vm6209_vm14, %v806_v23, %v813_v34  ;;  %v6554_v46 = vld [vmem:[#allocation2 + $0x28] sm:$0xf]  ;;  %v2359_v52 = vrot.slane %v2358_v21, 4  ;;  %1168 = vst.msk [vmem:[#allocation3 + $0x30] sm:$0xf] %vm280_vm0, %v1136_v33  ;;  %v2904_v53 = vrot.slane %v2797_v26, 5  ;;  %v2902_v1 = vsel %vm6150_vm6, %v5498_v37, %v2901_v11 }
 0x1b4   : > { %v1067_v43 = vsel %vm6145_vm5, %v815_v36, %v1066_v61  ;;  %v677_v50 = vpack.c.bf16 %v645_v18, %v645_v18  ;;  %1065 = vst.msk [vmem:[#allocation2 + $0x58] sm:$0xf] %vm280_vm0, %v814_v42  ;;  %1983 = vrot.lane.b32.xlu2 %v1883_v38, %s6016_s23  ;;  %v3352_v54 = vld [vmem:[#allocation2 + $0xa0] sm:$0xf]  ;;  %v2903_v56 = vrot.slane %v2901_v11, 4  ;;  %v2363_v58 = vrot.slane %v2361_v28, 5 }
 0x1b5   : > { %2214 = vrot.lane.b32.xlu0 %v2125_v59, %s6018_s30  ;;  %1068 = vst [vmem:[#allocation2 + $0x5c] sm:$0x1] %v1067_v43  ;;  %v3398_v57 = vrot.slane %v3397_v35, 4  ;;  %v6562_v4 = vrot.slane %v3400_v32, 5  ;;  %v1326_v45 = vor.u32 %v1325_v48, %v6504_v44  ;;  %v5917_v5 = vld [vmem:[%s8387_s3 + $0x8] sm:$0xff]  ;;  %v3640_v11 = vshll.u32 %v3352_v54, 16 }
 0x1b6   : > { %v817_v55 = vshrl.u32 %v677_v50, 16  ;;  %v820_v41 = vshll.u32 %v677_v50, 16  ;;  %v2167_v30 = vpop.permute.xlu2 %2166  ;;  %v588_v0 = vpop.f32.mrf.mxu0  ;;  %v3893_v10 = vld [vmem:[#allocation2 + $0x54] sm:$0xe]  ;;  %v2364_v12 = vsel %vm6170_vm11, %v2359_v52, %v2363_v58  ;;  %v1069_v15 = vld [vmem:[#allocation2 + $0x60] sm:$0xf]  ;;  %v2905_v22 = vsel %vm6150_vm6, %v2903_v56, %v2904_v53  ;;  %4657 = vmatpush.bf16.msrb.mxu1 %v5917_v5 }
 0x1b7   : > { %v5586_v3 = vld [vmem:[#allocation3 + $0x68] sm:$0xf]  ;;  %2262 = vst.msk [vmem:[#allocation3 + $0xc] sm:$0xf] %vm2260_vm3, %v2167_v30  ;;  %v589_v7 = vadd.f32 %v6530_v24, %v588_v0  ;;  %v1329_v44 = vshll.u32 %v6554_v46, 16  ;;  %v3644_v39 = vshrl.u32 %v3352_v54, 16  ;;  %v618_v50 = vpop.f32.mrf.mxu1 }
 0x1b8   : > { %v6568_v51 = vrot.slane %v817_v55, 7  ;;  %3005 = vrot.lane.b32.xlu1 %v2902_v1, %s6017_s26  ;;  %v2111_v21 = vld [vmem:[#allocation2 + $0x4c] sm:$0xf]  ;;  %v5916_v23 = vld [vmem:[%s8387_s3] sm:$0xff]  ;;  %v322_v13 = vld [vmem:[#allocation2 + $0x78] sm:$0x1]  ;;  %v619_v30 = vadd.f32 %v6530_v24, %v618_v50 }
 0x1b9   : > { %v5882_v61 = vld [vmem:[#allocation3 + $0x70] sm:$0xf0]  ;;  %v646_v19 = vmax.f32 %v589_v7, 0.0  ;;  %v3404_v25 = vshrl.u32 %v6516_v14, 16  ;;  %v1333_v26 = vshrl.u32 %v6554_v46, 16  ;;  %v5517_v62 = vrot.slane %v3893_v10, 9 }
 0x1ba   : > { %v822_v47 = vor.u32 %v820_v41, %v6568_v51  ;;  %v5587_v20 = vor.u32 %v5882_v61, %v5586_v3  ;;  %v323_v59 = vsel %vm6145_vm5, 0, %v322_v13  ;;  %2758 = vst.msk [vmem:[#allocation3 + $0x10] sm:$0xf] %vm280_vm0, %v2364_v12  ;;  %v1327_v33 = vrot.slane %v1326_v45, 4  ;;  %v1771_v48 = vld [vmem:[#allocation2 + $0x2c] sm:$0x1]  ;;  %4658 = vmatpush.bf16.msrb.mxu1 %v5916_v23 }
 0x1bb   : > { %v678_v35 = vpack.c.bf16 %v646_v19, %v646_v19  ;;  %v3894_v34 = vld [vmem:[#allocation2 + $0x58] sm:$0xf]  ;;  %v6590_v36 = vrot.slane %v3640_v11, 5  ;;  %324 = vst [vmem:[#allocation2 + $0x78] sm:$0x1] %v323_v59  ;;  %v3403_v14 = vsel %vm6170_vm11, %v3398_v57, %v6562_v4  ;;  %v3646_v28 = vrot.slane %v3644_v39, 4 }
 0x1bc   : > { %v1070_v40 = vsel %vm6199_vm12, %v822_v47, %v1069_v15  ;;  %5796 = vmatmul.msk.bf16.gmra.mxu3 %vm4602_vm1, %v5587_v20  ;;  %3007 = vrot.lane.b32.xlu2 %v2905_v22, %s6017_s26  ;;  %v3895_v18 = vld [vmem:[#allocation2 + $0x5c] sm:$0x1]  ;;  %v4011_v49 = vrot.slane %v3894_v34, 5  ;;  %v6597_v32 = vrot.slane %v1329_v44, 5  ;;  %v390_v43 = vld [vmem:[#allocation2 + $0xb0] sm:$0x1] }
 0x1bd   : > { %1071 = vst [vmem:[#allocation2 + $0x60] sm:$0xf] %v1070_v40  ;;  %2186 = vrot.lane.b32.xlu0 %v2111_v21, %s6018_s30  ;;  %v825_v38 = vshrl.u32 %v678_v35, 16  ;;  %v828_v37 = vshll.u32 %v678_v35, 16  ;;  %v4014_v42 = vrot.slane %v3895_v18, 5  ;;  %v391_v58 = vsel %vm6164_vm8, 0, %v390_v43 }
 0x1be   : > { %v1073_v52 = vld [vmem:[#allocation2 + $0x68] sm:$0x1]  ;;  %v6599_v53 = vpop.permute.xlu2 %1977  ;;  %v591_v54 = vpop.f32.mrf.mxu0  ;;  %v4012_v55 = vsel %vm6150_vm6, %v5517_v62, %v4011_v49  ;;  %v4013_v41 = vrot.slane %v4011_v49, 4  ;;  %v3353_v56 = vld [vmem:[#allocation2 + $0xa4] sm:$0x1]  ;;  %v823_v0 = vrot.slane %v6568_v51, 4  ;;  %v3647_v10 = vor.u32 %v3646_v28, %v6590_v36 }
 0x1bf   : > { %v827_v1 = vrot.slane %v825_v38, 7  ;;  %v592_v3 = vadd.f32 %v6530_v24, %v591_v54  ;;  %4128 = vst.msk [vmem:[#allocation3 + $0x80] sm:$0xf] %vm280_vm0, %v4012_v55  ;;  %v1134_v57 = vld [vmem:[#allocation2 + $0xc] sm:$0xf]  ;;  %v1884_v5 = vrot.slane %v1882_v60, 4  ;;  %v1332_v44 = vsel %vm6170_vm11, %v1327_v33, %v6597_v32  ;;  %v621_v54 = vpop.f32.mrf.mxu1 }
 0x1c0   : > { %3754 = vrot.lane.b32.xlu1 %v3403_v14, %s6018_s30  ;;  %v3150_v45 = vld [vmem:[#allocation2 + $0xa8] sm:$0xf]  ;;  %v4015_v7 = vsel %vm6150_vm6, %v4013_v41, %v4014_v42  ;;  %392 = vst [vmem:[#allocation2 + $0xb0] sm:$0x1] %v391_v58  ;;  %v658_v11 = vmax.f32 %v619_v30, 0.0  ;;  %v3650_v61 = vshll.u32 %v3353_v56, 16  ;;  %v622_v58 = vadd.f32 %v6530_v24, %v621_v54 }
 0x1c1   : > { %v830_v51 = vor.u32 %v828_v37, %v827_v1  ;;  %v832_v12 = vrot.slane %v827_v1, 4  ;;  %v647_v15 = vmax.f32 %v592_v3, 0.0  ;;  %4129 = vst.msk [vmem:[#allocation3 + $0x8c] sm:$0xf] %vm280_vm0, %v4015_v7  ;;  %v1885_v39 = vrot.slane %v1771_v48, 5 }
 0x1c2   : > { %v690_v31 = vpack.c.bf16 %v658_v11, %v658_v11  ;;  %v6619_v60 = vld [vmem:[#allocation2 + $0x2c] sm:$0x1]  ;;  %v6621_v47 = vrot.slane %v3404_v25, 4  ;;  %v378_v19 = vld [vmem:[#allocation2 + $0x80] sm:$0x1]  ;;  %v925_v13 = vrot.slane %v6473_v27, 4 }
 0x1c3   : > { %v831_v20 = vsel %vm6209_vm14, %v823_v0, %v830_v51  ;;  %v1074_v22 = vsel %vm6145_vm5, %v832_v12, %v1073_v52  ;;  %v679_v21 = vpack.c.bf16 %v647_v15, %v647_v15  ;;  %v379_v23 = vsel %vm6164_vm8, 0, %v378_v19  ;;  %1166 = vst.msk [vmem:[#allocation3 + $0x18] sm:$0xf] %vm280_vm0, %v1134_v57  ;;  %v1076_v34 = vld [vmem:[#allocation2 + $0x6c] sm:$0xf] }
 0x1c4   : > { %1072 = vst.msk [vmem:[#allocation2 + $0x64] sm:$0xf] %vm280_vm0, %v831_v20  ;;  %1643 = vrot.lane.b32.xlu2 %v1332_v44, %s6017_s26  ;;  %v927_v25 = vshrl.u32 %v690_v31, 16  ;;  %v930_v62 = vshll.u32 %v690_v31, 16  ;;  %v3648_v40 = vrot.slane %v3647_v10, 4  ;;  %v3652_v35 = vrot.slane %v3650_v61, 5 }
 0x1c5   : > { %3238 = vrot.lane.b32.xlu0 %v3150_v45, %s6016_s23  ;;  %1075 = vst [vmem:[#allocation2 + $0x68] sm:$0x1] %v1074_v22  ;;  %v834_v59 = vshrl.u32 %v679_v21, 16  ;;  %v3410_v33 = vshll.u32 %v6619_v60, 16  ;;  %v1886_v27 = vsel %vm6150_vm6, %v1884_v5, %v1885_v39  ;;  %v1335_v38 = vrot.slane %v1333_v26, 4 }
 0x1c6   : > { %v2165_v14 = vpop.permute.xlu1 %2164  ;;  %v6635_v18 = vpop.permute.xlu2 %3190  ;;  %v5598_v49 = vld [vmem:[#allocation3 + $0x80] sm:$0xf]  ;;  %v929_v28 = vrot.slane %v927_v25, 7  ;;  %380 = vst [vmem:[#allocation2 + $0x80] sm:$0x1] %v379_v23  ;;  %v837_v48 = vshll.u32 %v679_v21, 16  ;;  %v3407_v52 = vor.u32 %v6621_v47, %v6562_v4  ;;  %v3653_v3 = vsel %vm6170_vm11, %v3648_v40, %v3652_v35 }
 0x1c7   : > { %v6641_v37 = vrot.slane %v834_v59, 7  ;;  %2261 = vst.msk [vmem:[#allocation3] sm:$0xf] %vm2260_vm3, %v2165_v14  ;;  %v593_v42 = vpop.f32.mrf.mxu0  ;;  %v2106_v43 = vld [vmem:[#allocation2 + $0x30] sm:$0xf]  ;;  %v659_v51 = vmax.f32 %v622_v58, 0.0  ;;  %v1336_v15 = vor.u32 %v1335_v38, %v6597_v32 }
 0x1c8   : > { %1985 = vrot.lane.b32.xlu1 %v1886_v27, %s6016_s23  ;;  %v1115_v50 = vld [vmem:[#allocation2 + $0xb0] sm:$0x1]  ;;  %v594_v55 = vadd.f32 %v6530_v24, %v593_v42  ;;  %v5885_v41 = vld [vmem:[#allocation3 + $0x88] sm:$0xf0]  ;;  %v932_v56 = vor.u32 %v930_v62, %v929_v28  ;;  %v934_v46 = vrot.slane %v929_v28, 4  ;;  %v3408_v47 = vrot.slane %v3407_v52, 4 }
 0x1c9   : > { %v337_v26 = vld [vmem:[#allocation2 + $0xb4] sm:$0x1]  ;;  %v1207_v30 = vld [vmem:[#allocation2 + $0x2c] sm:$0x1]  ;;  %v839_v0 = vor.u32 %v837_v48, %v6641_v37  ;;  %v5599_v1 = vor.u32 %v5885_v41, %v5598_v49  ;;  %v1778_v57 = vld [vmem:[#allocation2 + $0x48] sm:$0xe]  ;;  %v691_v19 = vpack.c.bf16 %v659_v51, %v659_v51 }
 0x1ca   : > { %v338_v4 = vsel %vm6145_vm5, 0, %v337_v26  ;;  %v3896_v45 = vld [vmem:[#allocation2 + $0x60] sm:$0xe]  ;;  %v648_v5 = vmax.f32 %v594_v55, 0.0  ;;  %v933_v7 = vsel %vm6209_vm14, %v925_v13, %v932_v56  ;;  %v1116_v10 = vsel %vm6145_vm5, %v934_v46, %v1115_v50  ;;  %v6658_v11 = vld [vmem:[#allocation2 + $0x4c] sm:$0xf] }
 0x1cb   : > { %339 = vst [vmem:[#allocation2 + $0xb4] sm:$0x1] %v338_v4  ;;  %v1077_v12 = vsel %vm6199_vm12, %v839_v0, %v1076_v34  ;;  %v3897_v61 = vld [vmem:[#allocation2 + $0x64] sm:$0xf]  ;;  %v5518_v44 = vrot.slane %v3896_v45, 9  ;;  %v5486_v21 = vrot.slane %v1778_v57, 9 }
 0x1cc   : > { %5797 = vmatmul.msk.bf16.gmra.mxu3 %vm4602_vm1, %v5599_v1  ;;  %1114 = vst.msk [vmem:[#allocation2 + $0xac] sm:$0xf] %vm280_vm0, %v933_v7  ;;  %v680_v39 = vpack.c.bf16 %v648_v5, %v648_v5  ;;  %2176 = vrot.lane.b32.xlu2 %v2106_v43, %s6018_s30  ;;  %v3130_v31 = vld [vmem:[#allocation2 + $0x30] sm:$0xf]  ;;  %v5869_v60 = vld [vmem:[#allocation3 + $0x8] sm:$0xf0] }
 0x1cd   : > { %1078 = vst [vmem:[#allocation2 + $0x6c] sm:$0xf] %v1077_v12  ;;  %3796 = vrot.lane.b32.xlu0 %v3653_v3, %s6018_s30  ;;  %v3898_v20 = vld [vmem:[#allocation2 + $0x68] sm:$0x1]  ;;  %v4018_v22 = vrot.slane %v3897_v61, 5  ;;  %v1903_v23 = vrot.slane %v6658_v11, 5 }
 0x1ce   : > { %1117 = vst [vmem:[#allocation2 + $0xb0] sm:$0x1] %v1116_v10  ;;  %v1339_v13 = vshll.u32 %v1207_v30, 16  ;;  %v4021_v32 = vrot.slane %v3898_v20, 5  ;;  %v842_v25 = vshrl.u32 %v680_v39, 16  ;;  %v1638_v62 = vpop.permute.xlu2 %1637  ;;  %v3412_v40 = vrot.slane %v3410_v33, 5 }
 0x1cf   : > { %v5530_v59 = vld [vmem:[#allocation3] sm:$0xf]  ;;  %v936_v35 = vshrl.u32 %v691_v19, 16  ;;  %v939_v34 = vshll.u32 %v691_v19, 16  ;;  %v1080_v14 = vld [vmem:[#allocation2 + $0x74] sm:$0x1]  ;;  %v596_v27 = vpop.f32.mrf.mxu0  ;;  %v4019_v38 = vsel %vm6150_vm6, %v5518_v44, %v4018_v22  ;;  %v1904_v41 = vsel %vm6150_vm6, %v5486_v21, %v1903_v23 }
 0x1d0   : > { %1731 = vst.msk [vmem:[#allocation3 + $0x24] sm:$0xf] %vm1727_vm15, %v1638_v62  ;;  %3198 = vrot.lane.b32.xlu1 %v3130_v31, %s6016_s23  ;;  %v5531_v49 = vor.u32 %v5869_v60, %v5530_v59  ;;  %v1337_v28 = vrot.slane %v1336_v15, 4  ;;  %v4020_v48 = vrot.slane %v4018_v22, 4  ;;  %v844_v42 = vrot.slane %v842_v25, 7 }
 0x1d1   : > { %v845_v43 = vshll.u32 %v680_v39, 16  ;;  %2071 = vst.msk [vmem:[#allocation3 + $0x24] sm:$0xf] %vm2067_vm2, %v6599_v53  ;;  %v597_v33 = vadd.f32 %v6530_v24, %v596_v27  ;;  %v6675_v50 = vrot.slane %v936_v35, 7  ;;  %v6677_v52 = vld [vmem:[#allocation2 + $0x18] sm:$0xf]  ;;  %v3413_v1 = vsel %vm6170_vm11, %v3408_v47, %v3412_v40 }
 0x1d2   : > { %v840_v54 = vrot.slane %v6641_v37, 4  ;;  %v2998_v55 = vpop.permute.xlu1 %2997  ;;  %4659 = vmatmul.bf16.vlgmr.msrb.gmra.mxu1 %v5531_v49  ;;  %v1341_v56 = vrot.slane %v1339_v13, 5  ;;  %v4022_v46 = vsel %vm6150_vm6, %v4020_v48, %v4021_v32  ;;  %4130 = vst.msk [vmem:[#allocation3 + $0x98] sm:$0xf] %vm280_vm0, %v4019_v38  ;;  %v325_v53 = vld [vmem:[#allocation2 + $0x84] sm:$0x1] }
 0x1d3   : > { %v847_v26 = vor.u32 %v845_v43, %v844_v42  ;;  %v849_v58 = vrot.slane %v844_v42, 4  ;;  %v649_v30 = vmax.f32 %v597_v33, 0.0  ;;  %3093 = vst.msk [vmem:[#allocation3 + $0x4] sm:$0xf] %vm1727_vm15, %v2998_v55  ;;  %v941_v37 = vor.u32 %v939_v34, %v6675_v50  ;;  %v1118_v0 = vld [vmem:[#allocation2 + $0xb4] sm:$0xf] }
 0x1d4   : > { %3286 = vst.msk [vmem:[#allocation3 + $0x4] sm:$0xf] %vm2067_vm2, %v6635_v18  ;;  %3756 = vrot.lane.b32.xlu2 %v3413_v1, %s6018_s30  ;;  %v381_v45 = vld [vmem:[#allocation2 + $0x8c] sm:$0x1]  ;;  %v326_v5 = vsel %vm6145_vm5, 0, %v325_v53  ;;  %v2366_v7 = vshrl.u32 %v6677_v52, 16  ;;  %v1342_v15 = vsel %vm6170_vm11, %v1337_v28, %v1341_v56 }
 0x1d5   : > { %v848_v3 = vsel %vm6209_vm14, %v840_v54, %v847_v26  ;;  %v1081_v57 = vsel %vm6145_vm5, %v849_v58, %v1080_v14  ;;  %v681_v4 = vpack.c.bf16 %v649_v30, %v649_v30  ;;  %1995 = vrot.lane.b32.xlu0 %v1904_v41, %s6016_s23  ;;  %4131 = vst.msk [vmem:[#allocation3 + $0xa4] sm:$0xf] %vm280_vm0, %v4022_v46  ;;  %v2369_v10 = vshll.u32 %v6677_v52, 16  ;;  %v6711_v61 = vld [vmem:[#allocation2 + $0x30] sm:$0xe]  ;;  %v5931_v34 = vld [vmem:[%s8387_s3 + $0x78] sm:$0xff] }
 0x1d6   : > { %1079 = vst.msk [vmem:[#allocation2 + $0x70] sm:$0xf] %vm280_vm0, %v848_v3  ;;  %v1119_v18 = vsel %vm6199_vm12, %v941_v37, %v1118_v0  ;;  %v6707_v12 = vpop.permute.xlu2 %3192  ;;  %v382_v44 = vsel %vm6164_vm8, 0, %v381_v45  ;;  %v3324_v39 = vld [vmem:[#allocation2 + $0x30] sm:$0xf]  ;;  %v6726_v14 = vrot.slane %v2366_v7, 4  ;;  %4740 = vmatpush.bf16.msra.mxu2 %v5931_v34 }
 0x1d7   : > { %1082 = vst [vmem:[#allocation2 + $0x74] sm:$0x1] %v1081_v57  ;;  %v851_v51 = vshrl.u32 %v681_v4, 16  ;;  %v1083_v31 = vld [vmem:[#allocation2 + $0x78] sm:$0xf]  ;;  %v598_v60 = vpop.f32.mrf.mxu0  ;;  %v3415_v20 = vshrl.u32 %v3324_v39, 16 }
 0x1d8   : > { %1120 = vst [vmem:[#allocation2 + $0xb4] sm:$0xf] %v1119_v18  ;;  %1645 = vrot.lane.b32.xlu1 %v1342_v15, %s6017_s26  ;;  %v3136_v47 = vld [vmem:[#allocation2 + $0x54] sm:$0xf]  ;;  %v3418_v22 = vshll.u32 %v3324_v39, 16  ;;  %v854_v13 = vshll.u32 %v681_v4, 16  ;;  %v599_v32 = vadd.f32 %v6530_v24, %v598_v60 }
 0x1d9   : > { %v6716_v19 = vld [vmem:[#allocation2 + $0x34] sm:$0xf]  ;;  %v6718_v21 = vrot.slane %v851_v51, 7  ;;  %v5610_v25 = vld [vmem:[#allocation3 + $0x98] sm:$0xf]  ;;  %v3417_v40 = vrot.slane %v3415_v20, 4 }
 0x1da   : > { %327 = vst [vmem:[#allocation2 + $0x84] sm:$0x1] %v326_v5  ;;  %v6721_v62 = vpop.permute.xlu1 %1975  ;;  %v3131_v59 = vld [vmem:[#allocation2 + $0x34] sm:$0xf]  ;;  %v3420_v35 = vrot.slane %v3418_v22, 5  ;;  %v650_v49 = vmax.f32 %v599_v32, 0.0 }
 0x1db   : > { %383 = vst [vmem:[#allocation2 + $0x8c] sm:$0x1] %v382_v44  ;;  %v856_v27 = vor.u32 %v854_v13, %v6718_v21  ;;  %v3424_v28 = vshll.u32 %v6716_v19, 16  ;;  %v3899_v38 = vld [vmem:[#allocation2 + $0x6c] sm:$0xe]  ;;  %v5499_v33 = vrot.slane %v6711_v61, 9 }
 0x1dc   : > { %v2297_v48 = vld [vmem:[#allocation2 + $0x1c] sm:$0xf]  ;;  %v6730_v43 = vld [vmem:[#allocation2 + $0x34] sm:$0xf]  ;;  %v3421_v52 = vor.u32 %v3420_v35, %v3417_v40  ;;  %v6733_v54 = vrot.slane %v2369_v10, 5  ;;  %v682_v41 = vpack.c.bf16 %v650_v49, %v650_v49  ;;  %3200 = vrot.lane.b32.xlu2 %v3131_v59, %s6016_s23  ;;  %v5519_v26 = vrot.slane %v3899_v38, 9 }
 0x1dd   : > { %v5888_v42 = vld [vmem:[#allocation3 + $0xa0] sm:$0xf0]  ;;  %v1084_v55 = vsel %vm6199_vm12, %v856_v27, %v1083_v31  ;;  %3210 = vrot.lane.b32.xlu0 %v3136_v47, %s6016_s23  ;;  %v2107_v46 = vld [vmem:[#allocation2 + $0x34] sm:$0xf]  ;;  %v3900_v53 = vld [vmem:[#allocation2 + $0x70] sm:$0xf] }
 0x1de   : > { %v5611_v56 = vor.u32 %v5888_v42, %v5610_v25  ;;  %v6739_v58 = vld [vmem:[#allocation2 + $0x30] sm:$0xe]  ;;  %1085 = vst [vmem:[#allocation2 + $0x78] sm:$0xf] %v1084_v55  ;;  %v3901_v30 = vld [vmem:[#allocation2 + $0x74] sm:$0x1]  ;;  %v2171_v57 = vpop.permute.xlu2 %2170  ;;  %v2372_v25 = vor.u32 %v6733_v54, %v6726_v14 }
 0x1df   : > { %v4025_v37 = vrot.slane %v3900_v53, 5  ;;  %v2375_v0 = vshll.u32 %v2297_v48, 16  ;;  %v857_v1 = vrot.slane %v6718_v21, 4  ;;  %v859_v3 = vshrl.u32 %v682_v41, 16  ;;  %v6746_v18 = vld [vmem:[#allocation2 + $0x34] sm:$0xf]  ;;  %v601_v10 = vpop.f32.mrf.mxu0 }
 0x1e0   : > { %5798 = vmatmul.msk.bf16.gmra.mxu3 %vm4602_vm1, %v5611_v56  ;;  %v2908_v4 = vrot.slane %v6730_v43, 5  ;;  %v6744_v45 = vrot.slane %v3424_v28, 5  ;;  %v862_v5 = vshll.u32 %v682_v41, 16  ;;  %v1087_v7 = vld [vmem:[#allocation2 + $0x80] sm:$0x1]  ;;  %2178 = vrot.lane.b32.xlu1 %v2107_v46, %s6018_s30  ;;  %v3422_v15 = vrot.slane %v3421_v52, 4 }
 0x1e1   : > { %2264 = vst.msk [vmem:[#allocation3 + $0x24] sm:$0xf] %vm2260_vm3, %v2171_v57  ;;  %v2113_v51 = vld [vmem:[#allocation2 + $0x58] sm:$0xf]  ;;  %v4026_v61 = vsel %vm6150_vm6, %v5519_v26, %v4025_v37  ;;  %v5484_v44 = vrot.slane %v6739_v58, 9  ;;  %v861_v39 = vrot.slane %v859_v3, 7  ;;  %v602_v31 = vadd.f32 %v6530_v24, %v601_v10 }
 0x1e2   : > { %v4028_v60 = vrot.slane %v3901_v30, 5  ;;  %4132 = vst.msk [vmem:[#allocation3 + $0xb0] sm:$0xf] %vm280_vm0, %v4026_v61  ;;  %v2379_v47 = vshrl.u32 %v2297_v48, 16  ;;  %v3000_v20 = vpop.permute.xlu1 %2999  ;;  %v4027_v22 = vrot.slane %v4025_v37, 4  ;;  %v6755_v13 = vrot.slane %v2375_v0, 5 }
 0x1e3   : > { %v2298_v21 = vld [vmem:[#allocation2 + $0x20] sm:$0x1]  ;;  %v328_v32 = vld [vmem:[#allocation2 + $0x90] sm:$0x1]  ;;  %v864_v59 = vor.u32 %v862_v5, %v861_v39  ;;  %v866_v40 = vrot.slane %v861_v39, 4  ;;  %v651_v35 = vmax.f32 %v602_v31, 0.0  ;;  %v2909_v49 = vsel %vm6150_vm6, %v5499_v33, %v2908_v4  ;;  %v1640_v28 = vpop.permute.xlu0 %1639 }
 0x1e4   : > { %3094 = vst.msk [vmem:[#allocation3 + $0x10] sm:$0xf] %vm1727_vm15, %v3000_v20  ;;  %v2381_v34 = vrot.slane %v2379_v47, 4  ;;  %v5930_v27 = vld [vmem:[%s8387_s3 + $0x70] sm:$0xff]  ;;  %v3427_v38 = vsel %vm6170_vm11, %v3422_v15, %v6744_v45  ;;  %v1889_v48 = vrot.slane %v6746_v18, 5  ;;  %v2385_v42 = vshll.u32 %v2298_v21, 16  ;;  %3009 = vrot.lane.b32.xlu2 %v2909_v49, %s6017_s26 }
 0x1e5   : > { %3287 = vst.msk [vmem:[#allocation3 + $0x10] sm:$0xf] %vm2067_vm2, %v6707_v12  ;;  %v6771_v43 = vld [vmem:[#allocation2 + $0x38] sm:$0x1]  ;;  %v865_v52 = vsel %vm6209_vm14, %v857_v1, %v864_v59  ;;  %v1088_v55 = vsel %vm6145_vm5, %v866_v40, %v1087_v7  ;;  %v683_v12 = vpack.c.bf16 %v651_v35, %v651_v35  ;;  %2190 = vrot.lane.b32.xlu0 %v2113_v51, %s6018_s30  ;;  %v1208_v33 = vld [vmem:[#allocation2 + $0x30] sm:$0xf] }
 0x1e6   : > { %1732 = vst.msk [vmem:[#allocation3 + $0x30] sm:$0xf] %vm1727_vm15, %v1640_v28  ;;  %v6780_v41 = vld [vmem:[#allocation2 + $0x34] sm:$0xf]  ;;  %v4029_v56 = vsel %vm6150_vm6, %v4027_v22, %v4028_v60  ;;  %v2382_v46 = vor.u32 %v2381_v34, %v6755_v13  ;;  %v2387_v53 = vrot.slane %v2385_v42, 5  ;;  %4741 = vmatpush.bf16.msra.mxu2 %v5930_v27  ;;  %v1344_v26 = vshrl.u32 %v1208_v33, 16  ;;  %v1980_v0 = vpop.permute.xlu2 %1979 }
 0x1e7   : > { %1086 = vst.msk [vmem:[#allocation2 + $0x7c] sm:$0xf] %vm280_vm0, %v865_v52  ;;  %v3355_v30 = vld [vmem:[#allocation2 + $0xac] sm:$0xf]  ;;  %v868_v37 = vshrl.u32 %v683_v12, 16  ;;  %v329_v1 = vsel %vm6145_vm5, 0, %v328_v32  ;;  %v603_v7 = vpop.f32.mrf.mxu0 }
 0x1e8   : > { %1089 = vst [vmem:[#allocation2 + $0x80] sm:$0x1] %v1088_v55  ;;  %v1347_v3 = vshll.u32 %v1208_v33, 16  ;;  %v1353_v57 = vshll.u32 %v6780_v41, 16  ;;  %v1090_v5 = vld [vmem:[#allocation2 + $0x84] sm:$0xf]  ;;  %3758 = vrot.lane.b32.xlu1 %v3427_v38, %s6018_s30  ;;  %v604_v47 = vadd.f32 %v6530_v24, %v603_v7 }
 0x1e9   : > { %2072 = vst.msk [vmem:[#allocation3 + $0x30] sm:$0xf] %vm2067_vm2, %v1980_v0  ;;  %v3152_v10 = vld [vmem:[#allocation2 + $0xb4] sm:$0xf]  ;;  %v2383_v51 = vrot.slane %v2382_v46, 4  ;;  %v2910_v15 = vrot.slane %v2908_v4, 4  ;;  %v1890_v4 = vsel %vm6150_vm6, %v5484_v44, %v1889_v48 }
 0x1ea   : > { %v2911_v61 = vrot.slane %v6771_v43, 5  ;;  %v1346_v39 = vrot.slane %v1344_v26, 4  ;;  %v6792_v31 = vrot.slane %v868_v37, 7  ;;  %v871_v60 = vshll.u32 %v683_v12, 16  ;;  %4133 = vst.msk [vmem:[#allocation3 + $0xbc] sm:$0xf] %vm280_vm0, %v4029_v56  ;;  %v1636_v21 = vpop.permute.xlu1 %1635 }
 0x1eb   : > { %v1349_v20 = vrot.slane %v1347_v3, 5  ;;  %v5929_v22 = vld [vmem:[%s8387_s3 + $0x68] sm:$0xff]  ;;  %v2388_v32 = vsel %vm6170_vm11, %v2383_v51, %v2387_v53  ;;  %330 = vst [vmem:[#allocation2 + $0x90] sm:$0x1] %v329_v1  ;;  %v6807_v59 = vrot.slane %v1353_v57, 5  ;;  %v3664_v35 = vshll.u32 %v3355_v30, 16 }
 0x1ec   : > { %v3356_v40 = vld [vmem:[#allocation2 + $0xb0] sm:$0x1]  ;;  %v873_v34 = vor.u32 %v871_v60, %v6792_v31  ;;  %v652_v27 = vmax.f32 %v604_v47, 0.0  ;;  %1730 = vst.msk [vmem:[#allocation3 + $0x18] sm:$0xf] %vm1727_vm15, %v1636_v21  ;;  %v1357_v28 = vshrl.u32 %v6780_v41, 16  ;;  %4742 = vmatpush.bf16.msra.mxu2 %v5929_v22  ;;  %1987 = vrot.lane.b32.xlu2 %v1890_v4, %s6016_s23  ;;  %v2912_v41 = vsel %vm6150_vm6, %v2910_v15, %v2911_v61 }
 0x1ed   : > { %v1350_v49 = vor.u32 %v1349_v20, %v1346_v39  ;;  %v384_v58 = vld [vmem:[#allocation2 + $0x98] sm:$0x1]  ;;  %2070 = vst.msk [vmem:[#allocation3 + $0x18] sm:$0xf] %vm2067_vm2, %v6721_v62  ;;  %v6814_v44 = vrot.slane %v3664_v35, 5  ;;  %v3668_v38 = vshrl.u32 %v3355_v30, 16  ;;  %3242 = vrot.lane.b32.xlu0 %v3152_v10, %s6016_s23 }
 0x1ee   : > { %v3674_v42 = vshll.u32 %v3356_v40, 16  ;;  %v385_v43 = vsel %vm6164_vm8, 0, %v384_v58  ;;  %v874_v52 = vrot.slane %v6792_v31, 4  ;;  %v1091_v55 = vsel %vm6199_vm12, %v873_v34, %v1090_v5  ;;  %2760 = vst.msk [vmem:[#allocation3 + $0x28] sm:$0xf] %vm280_vm0, %v2388_v32  ;;  %v5928_v53 = vld [vmem:[%s8387_s3 + $0x60] sm:$0xff]  ;;  %v3004_v30 = vpop.permute.xlu2 %3003 }
 0x1ef   : > { %v684_v12 = vpack.c.bf16 %v652_v27, %v652_v27  ;;  %v1351_v62 = vrot.slane %v1350_v49, 4  ;;  %1092 = vst [vmem:[#allocation2 + $0x84] sm:$0xf] %v1091_v55  ;;  %v5622_v33 = vld [vmem:[#allocation3 + $0xb0] sm:$0xf]  ;;  %v3670_v56 = vrot.slane %v3668_v38, 4  ;;  %v606_v7 = vpop.f32.mrf.mxu0 }
 0x1f0   : > { %v1774_v46 = vld [vmem:[#allocation2 + $0x38] sm:$0x1]  ;;  %v3676_v37 = vrot.slane %v3674_v42, 5  ;;  %386 = vst [vmem:[#allocation2 + $0x98] sm:$0x1] %v385_v43  ;;  %v1891_v0 = vrot.slane %v1889_v48, 4  ;;  %3011 = vrot.lane.b32.xlu1 %v2912_v41, %s6017_s26  ;;  %4743 = vmatpush.bf16.msra.mxu2 %v5928_v53  ;;  %v607_v14 = vadd.f32 %v6530_v24, %v606_v7 }
 0x1f1   : > { %v876_v26 = vshrl.u32 %v684_v12, 16  ;;  %v2373_v1 = vrot.slane %v2372_v25, 4  ;;  %v879_v3 = vshll.u32 %v684_v12, 16  ;;  %v1094_v57 = vld [vmem:[#allocation2 + $0x8c] sm:$0x1]  ;;  %v3671_v10 = vor.u32 %v3670_v56, %v6814_v44  ;;  %v5927_v18 = vld [vmem:[%s8387_s3 + $0x58] sm:$0xff] }
 0x1f2   : > { %v5891_v5 = vld [vmem:[#allocation3 + $0xb8] sm:$0xf0]  ;;  %3096 = vst.msk [vmem:[#allocation3 + $0x28] sm:$0xf] %vm1727_vm15, %v3004_v30  ;;  %v3902_v25 = vld [vmem:[#allocation2 + $0x78] sm:$0xe]  ;;  %v2169_v61 = vpop.permute.xlu1 %2168  ;;  %v1356_v39 = vsel %vm6170_vm11, %v1351_v62, %v6807_v59 }
 0x1f3   : > { %v878_v48 = vrot.slane %v876_v26, 7  ;;  %v5623_v51 = vor.u32 %v5891_v5, %v5622_v33  ;;  %v2378_v54 = vsel %vm6170_vm11, %v2373_v1, %v6755_v13  ;;  %v3903_v15 = vld [vmem:[#allocation2 + $0x7c] sm:$0xf]  ;;  %v3672_v31 = vrot.slane %v3671_v10, 4  ;;  %v3904_v47 = vld [vmem:[#allocation2 + $0x80] sm:$0x1] }
 0x1f4   : > { %v1892_v60 = vrot.slane %v1774_v46, 5  ;;  %2759 = vst.msk [vmem:[#allocation3 + $0x1c] sm:$0xf] %vm280_vm0, %v2378_v54  ;;  %v653_v21 = vmax.f32 %v607_v14, 0.0  ;;  %v4032_v13 = vrot.slane %v3903_v15, 5  ;;  %v5520_v32 = vrot.slane %v3902_v25, 9  ;;  %4744 = vmatpush.bf16.msra.mxu2 %v5927_v18  ;;  %1647 = vrot.lane.b32.xlu2 %v1356_v39, %s6017_s26 }
 0x1f5   : > { %v881_v20 = vor.u32 %v879_v3, %v878_v48  ;;  %v883_v22 = vrot.slane %v878_v48, 4  ;;  %5799 = vmatmul.msk.bf16.gmra.mxu3 %vm4602_vm1, %v5623_v51  ;;  %2263 = vst.msk [vmem:[#allocation3 + $0x18] sm:$0xf] %vm2260_vm3, %v2169_v61  ;;  %v3677_v4 = vsel %vm6170_vm11, %v3672_v31, %v3676_v37  ;;  %v4035_v40 = vrot.slane %v3904_v47, 5  ;;  %v1781_v35 = vld [vmem:[#allocation2 + $0x54] sm:$0xe] }
 0x1f6   : > { %v1359_v34 = vrot.slane %v1357_v28, 4  ;;  %v5926_v27 = vld [vmem:[%s8387_s3 + $0x50] sm:$0xff]  ;;  %v685_v38 = vpack.c.bf16 %v653_v21, %v653_v21  ;;  %3800 = vrot.lane.b32.xlu0 %v3677_v4, %s6018_s30  ;;  %v4034_v42 = vrot.slane %v4032_v13, 4  ;;  %v6861_v43 = vld [vmem:[#allocation2 + $0x58] sm:$0xf]  ;;  %v4033_v28 = vsel %vm6150_vm6, %v5520_v32, %v4032_v13  ;;  %v2173_v41 = vpop.permute.xlu2 %2172  ;;  %v5924_v25 = vld [vmem:[%s8387_s3 + $0x40] sm:$0xff] }
 0x1f7   : > { %v882_v49 = vsel %vm6209_vm14, %v874_v52, %v881_v20  ;;  %v1095_v58 = vsel %vm6145_vm5, %v883_v22, %v1094_v57  ;;  %v5487_v55 = vrot.slane %v1781_v35, 9  ;;  %v1910_v12 = vrot.slane %v6861_v43, 5  ;;  %v1210_v53 = vld [vmem:[#allocation2 + $0x38] sm:$0x1]  ;;  %v1097_v26 = vld [vmem:[#allocation2 + $0x90] sm:$0xf]  ;;  %v608_v30 = vpop.f32.mrf.mxu0 }
 0x1f8   : > { %1093 = vst.msk [vmem:[#allocation2 + $0x88] sm:$0xf] %vm280_vm0, %v882_v49  ;;  %v1360_v52 = vor.u32 %v1359_v34, %v6807_v59  ;;  %v3428_v62 = vshrl.u32 %v6716_v19, 16  ;;  %v885_v33 = vshrl.u32 %v685_v38, 16  ;;  %v1893_v56 = vsel %vm6150_vm6, %v1891_v0, %v1892_v60  ;;  %v3132_v37 = vld [vmem:[#allocation2 + $0x3c] sm:$0xf]  ;;  %4745 = vmatpush.bf16.msra.mxu2 %v5926_v27 }
 0x1f9   : > { %1096 = vst [vmem:[#allocation2 + $0x8c] sm:$0x1] %v1095_v58  ;;  %v4036_v46 = vsel %vm6150_vm6, %v4034_v42, %v4035_v40  ;;  %1989 = vrot.lane.b32.xlu1 %v1893_v56, %s6016_s23  ;;  %v1363_v59 = vshll.u32 %v1210_v53, 16  ;;  %v5925_v19 = vld [vmem:[%s8387_s3 + $0x48] sm:$0xff]  ;;  %v888_v0 = vshll.u32 %v685_v38, 16  ;;  %v609_v3 = vadd.f32 %v6530_v24, %v608_v30 }
 0x1fa   : > { %2265 = vst.msk [vmem:[#allocation3 + $0x30] sm:$0xf] %vm2260_vm3, %v2173_v41  ;;  %v6878_v1 = vrot.slane %v885_v33, 7  ;;  %v5872_v57 = vld [vmem:[#allocation3 + $0x20] sm:$0xf0]  ;;  %v3002_v5 = vpop.permute.xlu1 %3001  ;;  %v1911_v7 = vsel %vm6150_vm6, %v5487_v55, %v1910_v12  ;;  %v1361_v18 = vrot.slane %v1360_v52, 4 }
 0x1fb   : > { %4134 = vst.msk [vmem:[#allocation3 + $0xc8] sm:$0xf] %vm280_vm0, %v4033_v28  ;;  %v654_v51 = vmax.f32 %v609_v3, 0.0  ;;  %v1365_v24 = vrot.slane %v1363_v59, 5  ;;  %v3905_v15 = vld [vmem:[#allocation2 + $0x84] sm:$0xe] }
 0x1fc   : > { %4135 = vst.msk [vmem:[#allocation3 + $0xd4] sm:$0xf] %vm280_vm0, %v4036_v46  ;;  %v5542_v10 = vld [vmem:[#allocation3 + $0x18] sm:$0xf]  ;;  %v890_v48 = vor.u32 %v888_v0, %v6878_v1  ;;  %v891_v54 = vrot.slane %v6878_v1, 4  ;;  %4746 = vmatpush.bf16.msra.mxu2 %v5925_v19  ;;  %v3430_v61 = vrot.slane %v3428_v62, 4  ;;  %3202 = vrot.lane.b32.xlu2 %v3132_v37, %s6016_s23 }
 0x1fd   : > { %3095 = vst.msk [vmem:[#allocation3 + $0x1c] sm:$0xf] %vm1727_vm15, %v3002_v5  ;;  %v5543_v14 = vor.u32 %v5872_v57, %v5542_v10  ;;  %v686_v31 = vpack.c.bf16 %v654_v51, %v654_v51  ;;  %v3326_v47 = vld [vmem:[#allocation2 + $0x38] sm:$0x1]  ;;  %v5521_v21 = vrot.slane %v3905_v15, 9  ;;  %v1366_v35 = vsel %vm6170_vm11, %v1361_v18, %v1365_v24  ;;  %v5970_v33 = vld [vmem:[%s8387_s3 + $0x88] sm:$0xff] }
 0x1fe   : > { %v1098_v39 = vsel %vm6199_vm12, %v890_v48, %v1097_v26  ;;  %1999 = vrot.lane.b32.xlu0 %v1911_v7, %s6016_s23  ;;  %v3334_v20 = vld [vmem:[#allocation2 + $0x58] sm:$0xf]  ;;  %v3753_v40 = vpop.permute.xlu2 %3752  ;;  %v3335_v27 = vld [vmem:[#allocation2 + $0x5c] sm:$0x1]  ;;  %v3431_v52 = vor.u32 %v3430_v61, %v6744_v45  ;;  %v3138_v53 = vld [vmem:[#allocation2 + $0x60] sm:$0xf] }
 0x1ff   : > { %v3906_v60 = vld [vmem:[#allocation2 + $0x88] sm:$0xf]  ;;  %1099 = vst [vmem:[#allocation2 + $0x90] sm:$0xf] %v1098_v39  ;;  %4664 = vmatmul.bf16.gmra.mxu1 %v5543_v14  ;;  %v893_v4 = vshrl.u32 %v686_v31, 16  ;;  %v896_v32 = vshll.u32 %v686_v31, 16 }
 0x200   : > { %v3907_v22 = vld [vmem:[#allocation2 + $0x8c] sm:$0x1]  ;;  %v4039_v13 = vrot.slane %v3906_v60, 5  ;;  %3847 = vst.msk [vmem:[#allocation3 + $0x10] sm:$0xf] %vm2260_vm3, %v3753_v40  ;;  %4747 = vmatpush.bf16.msra.mxu2 %v5924_v25  ;;  %v3496_v42 = vshll.u32 %v3334_v20, 16 }
 0x201   : > { %v4042_v34 = vrot.slane %v3907_v22, 5  ;;  %1649 = vrot.lane.b32.xlu1 %v1366_v35, %s6017_s26  ;;  %v895_v28 = vrot.slane %v893_v4, 7  ;;  %v3500_v62 = vshrl.u32 %v3334_v20, 16  ;;  %v1101_v41 = vld [vmem:[#allocation2 + $0x98] sm:$0x1]  ;;  %v3434_v30 = vshll.u32 %v3326_v47, 16 }
 0x202   : > { %v5634_v49 = vld [vmem:[#allocation3 + $0xc8] sm:$0xf]  ;;  %v4040_v58 = vsel %vm6150_vm6, %v5521_v21, %v4039_v13  ;;  %v4041_v38 = vrot.slane %v4039_v13, 4  ;;  %v3751_v46 = vpop.permute.xlu1 %3750  ;;  %v6910_v37 = vrot.slane %v3496_v42, 5  ;;  %v3506_v1 = vshll.u32 %v3335_v27, 16 }
 0x203   : > { %v5894_v55 = vld [vmem:[#allocation3 + $0xd0] sm:$0xf0]  ;;  %4136 = vst.msk [vmem:[#allocation3 + $0xe0] sm:$0xf] %vm280_vm0, %v4040_v58  ;;  %v898_v59 = vor.u32 %v896_v32, %v895_v28  ;;  %v900_v19 = vrot.slane %v895_v28, 4  ;;  %v3502_v45 = vrot.slane %v3500_v62, 4 }
 0x204   : > { %4835 = vmatpush.bf16.msrb.mxu2 %v5970_v33  ;;  %v5635_v56 = vor.u32 %v5894_v55, %v5634_v49  ;;  %v4043_v26 = vsel %vm6150_vm6, %v4041_v38, %v4042_v34  ;;  %3846 = vst.msk [vmem:[#allocation3 + $0x4] sm:$0xf] %vm2260_vm3, %v3751_v46  ;;  %v2108_v0 = vld [vmem:[#allocation2 + $0x3c] sm:$0xf]  ;;  %v6915_v3 = vld [vmem:[#allocation2 + $0x40] sm:$0xf] }
 0x205   : > { %4137 = vst.msk [vmem:[#allocation3 + $0xec] sm:$0xf] %vm280_vm0, %v4043_v26  ;;  %v899_v57 = vsel %vm6209_vm14, %v891_v54, %v898_v59  ;;  %v1102_v5 = vsel %vm6145_vm5, %v900_v19, %v1101_v41  ;;  %2180 = vrot.lane.b32.xlu2 %v2108_v0, %s6018_s30  ;;  %v3133_v7 = vld [vmem:[#allocation2 + $0x40] sm:$0xf]  ;;  %v3503_v10 = vor.u32 %v3502_v45, %v6910_v37  ;;  %v2300_v18 = vld [vmem:[#allocation2 + $0x28] sm:$0xf] }
 0x206   : > { %5800 = vmatmul.msk.bf16.gmra.mxu3 %vm4602_vm1, %v5635_v56  ;;  %3214 = vrot.lane.b32.xlu0 %v3138_v53, %s6016_s23  ;;  %v2301_v48 = vld [vmem:[#allocation2 + $0x2c] sm:$0x1]  ;;  %1100 = vst.msk [vmem:[#allocation2 + $0x94] sm:$0xf] %vm280_vm0, %v899_v57  ;;  %v3432_v51 = vrot.slane %v3431_v52, 4  ;;  %v2399_v14 = vshll.u32 %v2300_v18, 16  ;;  %v3197_v15 = vpop.permute.xlu2 %3196 }
 0x207   : > { %v2403_v24 = vshrl.u32 %v2300_v18, 16  ;;  %v2409_v25 = vshll.u32 %v2301_v48, 16  ;;  %v5971_v54 = vld [vmem:[%s8387_s3 + $0x80] sm:$0xff]  ;;  %1103 = vst [vmem:[#allocation2 + $0x98] sm:$0x1] %v1102_v5  ;;  %v3436_v61 = vrot.slane %v3434_v30, 5 }
 0x208   : > { %4836 = vmatpush.bf16.msrb.mxu2 %v5971_v54  ;;  %v3504_v39 = vrot.slane %v3503_v10, 4  ;;  %v3508_v31 = vrot.slane %v3506_v1, 5  ;;  %v2915_v60 = vrot.slane %v6915_v3, 5  ;;  %3289 = vst.msk [vmem:[#allocation3 + $0x28] sm:$0xf] %vm2067_vm2, %v3197_v15  ;;  %v6931_v20 = vrot.slane %v2399_v14, 5 }
 0x209   : > { %3204 = vrot.lane.b32.xlu1 %v3133_v7, %s6016_s23  ;;  %v2803_v47 = vld [vmem:[#allocation2 + $0x44] sm:$0x1]  ;;  %v2405_v22 = vrot.slane %v2403_v24, 4  ;;  %v5532_v21 = vld [vmem:[#allocation3 + $0xc] sm:$0xf0]  ;;  %v2411_v35 = vrot.slane %v2409_v25, 5  ;;  %v3437_v52 = vsel %vm6170_vm11, %v3432_v51, %v3436_v61 }
 0x20a   : > { %v1211_v13 = vld [vmem:[#allocation2 + $0x3c] sm:$0xf]  ;;  %v6933_v4 = vpop.permute.xlu1 %1981  ;;  %v3509_v58 = vsel %vm6170_vm11, %v3504_v39, %v3508_v31  ;;  %v2917_v38 = vrot.slane %v2915_v60, 4  ;;  %v2918_v42 = vrot.slane %v2803_v47, 5  ;;  %v6940_v28 = vld [vmem:[#allocation2 + $0x40] sm:$0xf] }
 0x20b   : > { %v5868_v32 = vld [vmem:[#allocation3 + $0x4] sm:$0xf]  ;;  %v2406_v40 = vor.u32 %v2405_v22, %v6931_v20  ;;  %v1368_v34 = vshrl.u32 %v1211_v13, 16  ;;  %v1371_v27 = vshll.u32 %v1211_v13, 16  ;;  %v3908_v46 = vld [vmem:[#allocation2 + $0x90] sm:$0xe] }
 0x20c   : > { %v5535_v49 = vor.u32 %v5868_v32, %v5532_v21  ;;  %v1137_v55 = vld [vmem:[#allocation2 + $0x1c] sm:$0xf]  ;;  %v5897_v56 = vld [vmem:[#allocation3 + $0xe8] sm:$0xf0]  ;;  %v5522_v59 = vrot.slane %v3908_v46, 9  ;;  %v2919_v57 = vsel %vm6150_vm6, %v2917_v38, %v2918_v42  ;;  %v1377_v7 = vshll.u32 %v6940_v28, 16 }
 0x20d   : > { %v2407_v62 = vrot.slane %v2406_v40, 4  ;;  %v1370_v33 = vrot.slane %v1368_v34, 4  ;;  %v1373_v41 = vrot.slane %v1371_v27, 5  ;;  %1169 = vst.msk [vmem:[#allocation3 + $0x3c] sm:$0xf] %vm280_vm0, %v1137_v55  ;;  %3760 = vrot.lane.b32.xlu2 %v3437_v52, %s6018_s30 }
 0x20e   : > { %4748 = vmatmul.bf16.vlgmr.msra.gmra.mxu2 %v5535_v49  ;;  %v3909_v53 = vld [vmem:[#allocation2 + $0x94] sm:$0xf]  ;;  %3772 = vrot.lane.b32.xlu0 %v3509_v58, %s6018_s30  ;;  %v3910_v30 = vld [vmem:[#allocation2 + $0x98] sm:$0x1]  ;;  %v6949_v1 = vpop.permute.xlu2 %1983  ;;  %v6951_v0 = vpop.permute.xlu0 %2182  ;;  %v2124_v18 = vld [vmem:[#allocation2 + $0x9c] sm:$0xf] }
 0x20f   : > { %v2412_v26 = vsel %vm6170_vm11, %v2407_v62, %v2411_v35  ;;  %v4046_v19 = vrot.slane %v3909_v53, 5  ;;  %v5646_v45 = vld [vmem:[#allocation3 + $0xe0] sm:$0xf]  ;;  %v1374_v5 = vor.u32 %v1373_v41, %v1370_v33  ;;  %v4049_v14 = vrot.slane %v3910_v30, 5  ;;  %v2801_v24 = vld [vmem:[#allocation2 + $0x3c] sm:$0xe] }
 0x210   : > { %2762 = vst.msk [vmem:[#allocation3 + $0x40] sm:$0xf] %vm280_vm0, %v2412_v26  ;;  %v5647_v10 = vor.u32 %v5897_v56, %v5646_v45  ;;  %v1784_v25 = vld [vmem:[#allocation2 + $0x60] sm:$0xe]  ;;  %v1138_v54 = vld [vmem:[#allocation2 + $0x24] sm:$0xf] }
 0x211   : > { %3015 = vrot.lane.b32.xlu1 %v2919_v57, %s6017_s26  ;;  %v4047_v48 = vsel %vm6150_vm6, %v5522_v59, %v4046_v19  ;;  %v4048_v51 = vrot.slane %v4046_v19, 4  ;;  %v6963_v39 = vld [vmem:[#allocation2 + $0x64] sm:$0xf]  ;;  %1170 = vst.msk [vmem:[#allocation3 + $0x48] sm:$0xf] %vm280_vm0, %v1138_v54  ;;  %v1375_v22 = vrot.slane %v1374_v5, 4  ;;  %v623_v57 = vpop.f32.mrf.mxu1 }
 0x212   : > { %4138 = vst.msk [vmem:[#allocation3 + $0xf8] sm:$0xf] %vm280_vm0, %v4047_v48  ;;  %v3195_v15 = vpop.permute.xlu1 %3194  ;;  %v3327_v31 = vld [vmem:[#allocation2 + $0x3c] sm:$0xf]  ;;  %v2115_v47 = vld [vmem:[#allocation2 + $0x64] sm:$0xf] }
 0x213   : > { %v4050_v61 = vsel %vm6150_vm6, %v4048_v51, %v4049_v14  ;;  %3288 = vst.msk [vmem:[#allocation3 + $0x1c] sm:$0xf] %vm2067_vm2, %v3195_v15  ;;  %v3439_v21 = vshrl.u32 %v3327_v31, 16  ;;  %v3442_v13 = vshll.u32 %v3327_v31, 16  ;;  %v6970_v32 = vrot.slane %v1377_v7, 5 }
 0x214   : > { %4139 = vst.msk [vmem:[#allocation3 + $0x104] sm:$0xf] %vm280_vm0, %v4050_v61  ;;  %v5500_v40 = vrot.slane %v2801_v24, 9  ;;  %v5488_v35 = vrot.slane %v1784_v25, 9  ;;  %v8396_v34 = vrot.slane %v6963_v39, 5  ;;  %v1898_v30 = vrot.slane %v1896_v63, 4 }
 0x215   : > { %2212 = vrot.lane.b32.xlu2 %v2124_v18, %s6018_s30  ;;  %v1777_v27 = vld [vmem:[#allocation2 + $0x44] sm:$0x1]  ;;  %v3911_v58 = vld [vmem:[#allocation2 + $0x9c] sm:$0xe]  ;;  %v1380_v55 = vsel %vm6170_vm11, %v1375_v22, %v6970_v32  ;;  %v3912_v33 = vld [vmem:[#allocation2 + $0xa0] sm:$0xf] }
 0x216   : > { %5801 = vmatmul.msk.bf16.gmra.mxu3 %vm4602_vm1, %v5647_v10  ;;  %2194 = vrot.lane.b32.xlu0 %v2115_v47, %s6018_s30  ;;  %v2299_v49 = vld [vmem:[#allocation2 + $0x24] sm:$0xf]  ;;  %v3008_v38 = vpop.permute.xlu2 %3007  ;;  %v6974_v42 = vpop.permute.xlu0 %3234  ;;  %v3441_v56 = vrot.slane %v3439_v21, 4  ;;  %v3444_v46 = vrot.slane %v3442_v13, 5  ;;  %v5523_v53 = vrot.slane %v3911_v58, 9  ;;  %v4053_v26 = vrot.slane %v3912_v33, 5 }
 0x217   : > { %8414 = vst [vmem:[#allocation4_spill] sm:$0xff] %v6974_v42  ;;  %v2390_v52 = vshrl.u32 %v2299_v49, 16  ;;  %v2393_v62 = vshll.u32 %v2299_v49, 16  ;;  %v3913_v41 = vld [vmem:[#allocation2 + $0xa4] sm:$0x1]  ;;  %v1918_v7 = vsel %vm6150_vm6, %v5488_v35, %v8396_v34  ;;  %v1899_v14 = vrot.slane %v1777_v27, 5 }
 0x218   : > { %3098 = vst.msk [vmem:[#allocation3 + $0x40] sm:$0xf] %vm1727_vm15, %v3008_v38  ;;  %v4056_v45 = vrot.slane %v3913_v41, 5  ;;  %v3328_v10 = vld [vmem:[#allocation2 + $0x40] sm:$0xf]  ;;  %v4054_v18 = vsel %vm6150_vm6, %v5523_v53, %v4053_v26  ;;  %v4055_v48 = vrot.slane %v4053_v26, 4  ;;  %v2916_v15 = vsel %vm6150_vm6, %v5500_v40, %v2915_v60 }
 0x219   : > { %1651 = vrot.lane.b32.xlu1 %v1380_v55, %s6017_s26  ;;  %v2392_v59 = vrot.slane %v2390_v52, 4  ;;  %v2395_v19 = vrot.slane %v2393_v62, 5  ;;  %v3337_v51 = vld [vmem:[#allocation2 + $0x64] sm:$0xf]  ;;  %v6992_v8 = vld [vmem:[%s8386_s2] ss:$0 sm:$0xff]  ;;  %v3445_v61 = vor.u32 %v3444_v46, %v3441_v56  ;;  %v1900_v60 = vsel %vm6150_vm6, %v1898_v30, %v1899_v14 }
 0x21a   : > { %v1642_v5 = vpop.permute.xlu1 %1641  ;;  %v624_v63 = vadd.f32 %v6992_v8, %v623_v57  ;;  %v3520_v25 = vshll.u32 %v3337_v51, 16  ;;  %v3524_v54 = vshrl.u32 %v3337_v51, 16  ;;  %v4057_v31 = vsel %vm6150_vm6, %v4055_v48, %v4056_v45  ;;  %4140 = vst.msk [vmem:[#allocation3 + $0x110] sm:$0xf] %vm280_vm0, %v4054_v18  ;;  %v3338_v27 = vld [vmem:[#allocation2 + $0x68] sm:$0x1] }
 0x21b   : > { %1733 = vst.msk [vmem:[#allocation3 + $0x3c] sm:$0xf] %vm1727_vm15, %v1642_v5  ;;  %v2396_v24 = vor.u32 %v2395_v19, %v2392_v59  ;;  %v5900_v47 = vld [vmem:[#allocation3 + $0x100] sm:$0xf0]  ;;  %v3448_v22 = vshll.u32 %v3328_v10, 16  ;;  %v3452_v13 = vshrl.u32 %v3328_v10, 16 }
 0x21c   : > { %2073 = vst.msk [vmem:[#allocation3 + $0x3c] sm:$0xf] %vm2067_vm2, %v6933_v4  ;;  %v660_v3 = vmax.f32 %v624_v63, 0.0  ;;  %v5658_v4 = vld [vmem:[#allocation3 + $0xf8] sm:$0xf]  ;;  %v7013_v49 = vrot.slane %v3520_v25, 5 }
 0x21d   : > { %3013 = vrot.lane.b32.xlu2 %v2916_v15, %s6017_s26  ;;  %v2397_v21 = vrot.slane %v2396_v24, 4  ;;  %4141 = vst.msk [vmem:[#allocation3 + $0x11c] sm:$0xf] %vm280_vm0, %v4057_v31  ;;  %v3526_v58 = vrot.slane %v3524_v54, 4  ;;  %v5659_v38 = vor.u32 %v5900_v47, %v5658_v4  ;;  %v3446_v52 = vrot.slane %v3445_v61, 4 }
 0x21e   : > { %2003 = vrot.lane.b32.xlu0 %v1918_v7, %s6016_s23  ;;  %v1644_v35 = vpop.permute.xlu2 %1643  ;;  %v393_v62 = vld [vmem:[#allocation2 + $0xbc] sm:$0x1]  ;;  %v692_v33 = vpack.c.bf16 %v660_v3, %v660_v3  ;;  %v3450_v41 = vrot.slane %v3448_v22, 5  ;;  %v3530_v46 = vshll.u32 %v3338_v27, 16  ;;  %v3454_v53 = vrot.slane %v3452_v13, 4 }
 0x21f   : > { %v2402_v40 = vsel %vm6170_vm11, %v2397_v21, %v6931_v20  ;;  %1734 = vst.msk [vmem:[#allocation3 + $0x48] sm:$0xf] %vm1727_vm15, %v1644_v35  ;;  %v7016_v55 = vpop.permute.xlu0 %1991  ;;  %v394_v20 = vsel %vm6164_vm8, 0, %v393_v62  ;;  %v3527_v59 = vor.u32 %v3526_v58, %v7013_v49  ;;  %v942_v19 = vrot.slane %v6675_v50, 4  ;;  %v3329_v45 = vld [vmem:[#allocation2 + $0x44] sm:$0x1] }
 0x220   : > { %2074 = vst.msk [vmem:[#allocation3 + $0x48] sm:$0xf] %vm2067_vm2, %v6949_v1  ;;  %v944_v26 = vshrl.u32 %v692_v33, 16  ;;  %v947_v30 = vshll.u32 %v692_v33, 16  ;;  %v3451_v1 = vsel %vm6170_vm11, %v3446_v52, %v3450_v41  ;;  %v3140_v5 = vld [vmem:[#allocation2 + $0x6c] sm:$0xf]  ;;  %v3455_v18 = vor.u32 %v3454_v53, %v3450_v41 }
 0x221   : > { %1993 = vrot.lane.b32.xlu1 %v1900_v60, %s6016_s23  ;;  %2761 = vst.msk [vmem:[#allocation3 + $0x34] sm:$0xf] %vm280_vm0, %v2402_v40  ;;  %v3149_v7 = vld [vmem:[#allocation2 + $0xa0] sm:$0xf]  ;;  %v3532_v10 = vrot.slane %v3530_v46, 5  ;;  %v3528_v50 = vrot.slane %v3527_v59, 4 }
 0x222   : > { %v2175_v56 = vpop.permute.xlu1 %2174  ;;  %395 = vst [vmem:[#allocation2 + $0xbc] sm:$0x1] %v394_v20  ;;  %v946_v57 = vrot.slane %v944_v26, 7  ;;  %v2302_v51 = vld [vmem:[#allocation2 + $0x30] sm:$0xf]  ;;  %v3458_v14 = vshll.u32 %v3329_v45, 16 }
 0x223   : > { %2266 = vst.msk [vmem:[#allocation3 + $0x3c] sm:$0xf] %vm2260_vm3, %v2175_v56  ;;  %v7032_v24 = vld [vmem:[#allocation2 + $0x34] sm:$0xf]  ;;  %v2414_v25 = vshrl.u32 %v2302_v51, 16  ;;  %v2417_v54 = vshll.u32 %v2302_v51, 16  ;;  %v626_v56 = vpop.f32.mrf.mxu1 }
 0x224   : > { %v949_v48 = vor.u32 %v947_v30, %v946_v57  ;;  %v3134_v61 = vld [vmem:[#allocation2 + $0x48] sm:$0xf]  ;;  %v951_v47 = vrot.slane %v946_v57, 4  ;;  %v340_v22 = vld [vmem:[#allocation2 + $0xc0] sm:$0x1]  ;;  %v1381_v21 = vshrl.u32 %v6940_v28, 16  ;;  %v627_v59 = vadd.f32 %v6992_v8, %v626_v56 }
 0x225   : > { %3762 = vrot.lane.b32.xlu2 %v3451_v1, %s6018_s30  ;;  %v2416_v13 = vrot.slane %v2414_v25, 4  ;;  %v2419_v3 = vrot.slane %v2417_v54, 5  ;;  %v2423_v4 = vshll.u32 %v7032_v24, 16  ;;  %v5554_v60 = vld [vmem:[#allocation3 + $0x30] sm:$0xf]  ;;  %v3456_v27 = vrot.slane %v3455_v18, 4 }
 0x226   : > { %5802 = vmatmul.msk.bf16.gmra.mxu3 %vm4602_vm1, %v5659_v38  ;;  %3218 = vrot.lane.b32.xlu0 %v3140_v5, %s6016_s23  ;;  %v2177_v63 = vpop.permute.xlu2 %2176  ;;  %v950_v31 = vsel %vm6209_vm14, %v942_v19, %v949_v48  ;;  %v341_v58 = vsel %vm6145_vm5, 0, %v340_v22  ;;  %v3533_v38 = vsel %vm6170_vm11, %v3528_v50, %v3532_v10  ;;  %v3460_v28 = vrot.slane %v3458_v14, 5  ;;  %v5670_v41 = vld [vmem:[#allocation3 + $0x110] sm:$0xf]  ;;  %v5903_v53 = vld [vmem:[#allocation3 + $0x118] sm:$0xf0] }
 0x227   : > { %2267 = vst.msk [vmem:[#allocation3 + $0x48] sm:$0xf] %vm2260_vm3, %v2177_v63  ;;  %v7035_v15 = vpop.permute.xlu0 %2214  ;;  %v2420_v33 = vor.u32 %v2419_v3, %v2416_v13  ;;  %v396_v46 = vld [vmem:[#allocation2 + $0xc8] sm:$0x1]  ;;  %v7051_v30 = vrot.slane %v2423_v4, 5  ;;  %v1383_v1 = vrot.slane %v1381_v21, 4  ;;  %v5671_v48 = vor.u32 %v5903_v53, %v5670_v41 }
 0x228   : > { %8415 = vst [vmem:[#allocation5_spill] sm:$0xff] %v7035_v15  ;;  %v1213_v19 = vld [vmem:[#allocation2 + $0x44] sm:$0x1]  ;;  %v397_v45 = vsel %vm6164_vm8, 0, %v396_v46  ;;  %v3461_v5 = vsel %vm6170_vm11, %v3456_v27, %v3460_v28  ;;  %v661_v10 = vmax.f32 %v627_v59, 0.0 }
 0x229   : > { %3236 = vrot.lane.b32.xlu1 %v3149_v7, %s6016_s23  ;;  %1121 = vst.msk [vmem:[#allocation2 + $0xb8] sm:$0xf] %vm280_vm0, %v950_v31  ;;  %v1122_v62 = vld [vmem:[#allocation2 + $0xbc] sm:$0x1]  ;;  %v2421_v26 = vrot.slane %v2420_v33, 4  ;;  %v1384_v31 = vor.u32 %v1383_v1, %v6970_v32 }
 0x22a   : > { %v3006_v35 = vpop.permute.xlu1 %3005  ;;  %v5875_v40 = vld [vmem:[#allocation3 + $0x38] sm:$0xf0]  ;;  %v1123_v20 = vsel %vm6145_vm5, %v951_v47, %v1122_v62  ;;  %342 = vst [vmem:[#allocation2 + $0xc0] sm:$0x1] %v341_v58  ;;  %v1139_v18 = vld [vmem:[#allocation2 + $0x28] sm:$0xf]  ;;  %v693_v14 = vpack.c.bf16 %v661_v10, %v661_v10 }
 0x22b   : > { %3097 = vst.msk [vmem:[#allocation3 + $0x34] sm:$0xf] %vm1727_vm15, %v3006_v35  ;;  %v5555_v52 = vor.u32 %v5875_v40, %v5554_v60  ;;  %v2426_v7 = vsel %vm6170_vm11, %v2421_v26, %v7051_v30  ;;  %v2825_v63 = vld [vmem:[#allocation2 + $0x9c] sm:$0xe]  ;;  %v7066_v50 = vld [vmem:[#allocation2 + $0xa0] sm:$0xf]  ;;  %v628_v32 = vpop.f32.mrf.mxu1 }
 0x22c   : > { %1124 = vst [vmem:[#allocation2 + $0xbc] sm:$0x1] %v1123_v20  ;;  %v3351_v25 = vld [vmem:[#allocation2 + $0x9c] sm:$0xf]  ;;  %v1387_v47 = vshll.u32 %v1213_v19, 16  ;;  %v5508_v13 = vrot.slane %v2825_v63, 9  ;;  %v629_v28 = vadd.f32 %v6992_v8, %v628_v32 }
 0x22d   : > { %3206 = vrot.lane.b32.xlu2 %v3134_v61, %s6016_s23  ;;  %4669 = vmatmul.bf16.gmra.mxu1 %v5555_v52  ;;  %398 = vst [vmem:[#allocation2 + $0xc8] sm:$0x1] %v397_v45  ;;  %v2110_v61 = vld [vmem:[#allocation2 + $0x48] sm:$0xf]  ;;  %v7071_v22 = vld [vmem:[#allocation2 + $0x18] sm:$0xe] }
 0x22e   : > { %3776 = vrot.lane.b32.xlu0 %v3533_v38, %s6018_s30  ;;  %v3757_v57 = vpop.permute.xlu2 %3756  ;;  %2763 = vst.msk [vmem:[#allocation3 + $0x4c] sm:$0xf] %vm280_vm0, %v2426_v7  ;;  %v2117_v21 = vld [vmem:[#allocation2 + $0x70] sm:$0xf]  ;;  %v2971_v3 = vrot.slane %v7066_v50, 5  ;;  %v953_v4 = vshrl.u32 %v693_v14, 16 }
 0x22f   : > { %3849 = vst.msk [vmem:[#allocation3 + $0x28] sm:$0xf] %vm2260_vm3, %v3757_v57  ;;  %v7063_v51 = vpop.permute.xlu0 %2186  ;;  %v956_v35 = vshll.u32 %v693_v14, 16  ;;  %v7076_v60 = vld [vmem:[#allocation2 + $0x70] sm:$0xf]  ;;  %v3631_v40 = vshrl.u32 %v3351_v25, 16 }
 0x230   : > { %1171 = vst.msk [vmem:[#allocation3 + $0x54] sm:$0xf] %vm280_vm0, %v1139_v18  ;;  %v3634_v27 = vshll.u32 %v3351_v25, 16  ;;  %v1140_v58 = vld [vmem:[#allocation2 + $0x30] sm:$0xf]  ;;  %v7079_v52 = vrot.slane %v953_v4, 7  ;;  %v2972_v56 = vsel %vm6150_vm6, %v5508_v13, %v2971_v3 }
 0x231   : > { %3764 = vrot.lane.b32.xlu1 %v3461_v5, %s6018_s30  ;;  %v1787_v38 = vld [vmem:[#allocation2 + $0x6c] sm:$0xe]  ;;  %1172 = vst.msk [vmem:[#allocation3 + $0x60] sm:$0xf] %vm280_vm0, %v1140_v58  ;;  %v1385_v62 = vrot.slane %v1384_v31, 4  ;;  %v1389_v33 = vrot.slane %v1387_v47, 5 }
 0x232   : > { %v3755_v54 = vpop.permute.xlu1 %3754  ;;  %v1125_v41 = vld [vmem:[#allocation2 + $0xc0] sm:$0xf]  ;;  %v8395_v46 = vrot.slane %v7076_v60, 5  ;;  %v958_v53 = vor.u32 %v956_v35, %v7079_v52  ;;  %v662_v26 = vmax.f32 %v629_v28, 0.0  ;;  %v5512_v8 = vrot.slane %v7071_v22, 9 }
 0x233   : > { %3848 = vst.msk [vmem:[#allocation3 + $0x1c] sm:$0xf] %vm2260_vm3, %v3755_v54  ;;  %v5489_v19 = vrot.slane %v1787_v38, 9  ;;  %v3633_v1 = vrot.slane %v3631_v40, 4  ;;  %v3636_v45 = vrot.slane %v3634_v27, 5  ;;  %v1390_v25 = vsel %vm6170_vm11, %v1385_v62, %v1389_v33 }
 0x234   : > { %v1126_v57 = vsel %vm6199_vm12, %v958_v53, %v1125_v41  ;;  %v694_v5 = vpack.c.bf16 %v662_v26, %v662_v26  ;;  %v3340_v7 = vld [vmem:[#allocation2 + $0x70] sm:$0xf]  ;;  %v3914_v10 = vld [vmem:[#allocation2 + $0xa8] sm:$0xe]  ;;  %v3915_v18 = vld [vmem:[#allocation2 + $0xac] sm:$0xf] }
 0x235   : > { %2184 = vrot.lane.b32.xlu2 %v2110_v61, %s6018_s30  ;;  %1127 = vst [vmem:[#allocation2 + $0xc0] sm:$0xf] %v1126_v57  ;;  %v7101_v54 = vld [vmem:[#allocation2 + $0x1c] sm:$0xf]  ;;  %v1925_v2 = vsel %vm6150_vm6, %v5489_v19, %v8395_v46  ;;  %v3637_v13 = vor.u32 %v3636_v45, %v3633_v1  ;;  %v1214_v4 = vld [vmem:[#allocation2 + $0x48] sm:$0xf] }
 0x236   : > { %5803 = vmatmul.msk.bf16.gmra.mxu3 %vm4602_vm1, %v5671_v48  ;;  %2198 = vrot.lane.b32.xlu0 %v2117_v21, %s6018_s30  ;;  %v3201_v20 = vpop.permute.xlu2 %3200  ;;  %v5544_v14 = vld [vmem:[#allocation3 + $0x24] sm:$0xf0]  ;;  %v961_v31 = vshrl.u32 %v694_v5, 16  ;;  %v964_v47 = vshll.u32 %v694_v5, 16  ;;  %v3916_v21 = vld [vmem:[#allocation2 + $0xb0] sm:$0x1] }
 0x237   : > { %3291 = vst.msk [vmem:[#allocation3 + $0x40] sm:$0xf] %vm2067_vm2, %v3201_v20  ;;  %v7092_v59 = vpop.permute.xlu0 %3238  ;;  %v5524_v35 = vrot.slane %v3914_v10, 9  ;;  %v4060_v40 = vrot.slane %v3915_v18, 5  ;;  %v4063_v27 = vrot.slane %v3916_v21, 5  ;;  %v959_v32 = vrot.slane %v7079_v52, 4 }
 0x238   : > { %v3135_v58 = vld [vmem:[#allocation2 + $0x4c] sm:$0xf]  ;;  %v963_v38 = vrot.slane %v961_v31, 7  ;;  %v2804_v28 = vld [vmem:[#allocation2 + $0x48] sm:$0xe]  ;;  %v3544_v62 = vshll.u32 %v3340_v7, 16 }
 0x239   : > { %3045 = vrot.lane.b32.xlu1 %v2972_v56, %s6017_s26  ;;  %v3548_v33 = vshrl.u32 %v3340_v7, 16  ;;  %v8394_v41 = vrot.slane %v7101_v54, 5  ;;  %v1129_v20 = vld [vmem:[#allocation2 + $0xc8] sm:$0x1]  ;;  %v7111_v56 = vld [vmem:[#allocation2 + $0x4c] sm:$0xf]  ;;  %v4061_v53 = vsel %vm6150_vm6, %v5524_v35, %v4060_v40 }
 0x23a   : > { %v7097_v48 = vpop.permute.xlu1 %1985  ;;  %v5871_v63 = vld [vmem:[#allocation3 + $0x1c] sm:$0xf]  ;;  %v4062_v26 = vrot.slane %v4060_v40, 4  ;;  %v966_v1 = vor.u32 %v964_v47, %v963_v38  ;;  %v968_v45 = vrot.slane %v963_v38, 4  ;;  %v1392_v52 = vshrl.u32 %v1214_v4, 16 }
 0x23b   : > { %v5547_v61 = vor.u32 %v5871_v63, %v5544_v14  ;;  %v1395_v57 = vshll.u32 %v1214_v4, 16  ;;  %4142 = vst.msk [vmem:[#allocation3 + $0x128] sm:$0xf] %vm280_vm0, %v4061_v53  ;;  %v2427_v5 = vshrl.u32 %v7032_v24, 16  ;;  %v3638_v10 = vrot.slane %v3637_v13, 4 }
 0x23c   : > { %v4064_v18 = vsel %vm6150_vm6, %v4062_v26, %v4063_v27  ;;  %v3330_v63 = vld [vmem:[#allocation2 + $0x48] sm:$0xf]  ;;  %v967_v14 = vsel %vm6209_vm14, %v959_v32, %v966_v1  ;;  %v3550_v24 = vrot.slane %v3548_v33, 4  ;;  %v5501_v31 = vrot.slane %v2804_v28, 9  ;;  %v2827_v21 = vld [vmem:[#allocation2 + $0xa4] sm:$0x1] }
 0x23d   : > { %4753 = vmatmul.bf16.gmra.mxu2 %v5547_v61  ;;  %1653 = vrot.lane.b32.xlu2 %v1390_v25, %s6017_s26  ;;  %v1130_v25 = vsel %vm6145_vm5, %v968_v45, %v1129_v20  ;;  %v7127_v61 = vrot.slane %v3544_v62, 5  ;;  %4143 = vst.msk [vmem:[#allocation3 + $0x134] sm:$0xf] %vm280_vm0, %v4064_v18  ;;  %v2922_v47 = vrot.slane %v7111_v56, 5  ;;  %v1394_v13 = vrot.slane %v1392_v52, 4 }
 0x23e   : > { %2007 = vrot.lane.b32.xlu0 %v1925_v2, %s6016_s23  ;;  %v3010_v19 = vpop.permute.xlu2 %3009  ;;  %1128 = vst.msk [vmem:[#allocation2 + $0xc4] sm:$0xf] %vm280_vm0, %v967_v14  ;;  %v1397_v16 = vrot.slane %v1395_v57, 5  ;;  %v3463_v4 = vshrl.u32 %v3330_v63, 16  ;;  %v3643_v35 = vsel %vm6170_vm11, %v3638_v10, %v6590_v36  ;;  %v3341_v40 = vld [vmem:[#allocation2 + $0x74] sm:$0x1]  ;;  %v3977_v32 = vsel %vm6150_vm6, %v5512_v8, %v8394_v41 }
 0x23f   : > { %3099 = vst.msk [vmem:[#allocation3 + $0x4c] sm:$0xf] %vm1727_vm15, %v3010_v19  ;;  %v7118_v7 = vpop.permute.xlu0 %3796  ;;  %v3466_v27 = vshll.u32 %v3330_v63, 16  ;;  %v2973_v38 = vrot.slane %v2971_v3, 4  ;;  %v3551_v28 = vor.u32 %v3550_v24, %v7127_v61  ;;  %v2304_v62 = vld [vmem:[#allocation2 + $0x38] sm:$0x1]  ;;  %v2923_v22 = vsel %vm6150_vm6, %v5501_v31, %v2922_v47 }
 0x240   : > { %8416 = vst [vmem:[#allocation6_spill] sm:$0xff] %v7118_v7  ;;  %v2429_v36 = vrot.slane %v2427_v5, 4  ;;  %v2974_v33 = vrot.slane %v2827_v21, 5  ;;  %v7151_v20 = vld [vmem:[#allocation2 + $0x4c] sm:$0xf]  ;;  %v2433_v53 = vshll.u32 %v2304_v62, 16  ;;  %v1398_v50 = vor.u32 %v1397_v16, %v1394_v13 }
 0x241   : > { %3208 = vrot.lane.b32.xlu1 %v3135_v58, %s6016_s23  ;;  %1131 = vst [vmem:[#allocation2 + $0xc8] sm:$0x1] %v1130_v25  ;;  %v3142_v58 = vld [vmem:[#allocation2 + $0x78] sm:$0xf]  ;;  %v3554_v19 = vshll.u32 %v3341_v40, 16  ;;  %v3465_v3 = vrot.slane %v3463_v4, 4 }
 0x242   : > { %v3199_v2 = vpop.permute.xlu1 %3198  ;;  %v5682_v8 = vld [vmem:[#allocation3 + $0x128] sm:$0xf]  ;;  %v2430_v1 = vor.u32 %v2429_v36, %v7051_v30  ;;  %v1141_v45 = vld [vmem:[#allocation2 + $0x34] sm:$0xf]  ;;  %4118 = vst.msk [vmem:[#allocation3 + $0x8] sm:$0xf] %vm280_vm0, %v3977_v32  ;;  %v2975_v13 = vsel %vm6150_vm6, %v2973_v38, %v2974_v33 }
 0x243   : > { %3290 = vst.msk [vmem:[#allocation3 + $0x34] sm:$0xf] %vm2067_vm2, %v3199_v2  ;;  %v3468_v5 = vrot.slane %v3466_v27, 5  ;;  %v2435_v10 = vrot.slane %v2433_v53, 5  ;;  %v3552_v18 = vrot.slane %v3551_v28, 4  ;;  %v1401_v63 = vshll.u32 %v7151_v20, 16 }
 0x244   : > { %v5906_v57 = vld [vmem:[#allocation3 + $0x130] sm:$0xf0]  ;;  %1173 = vst.msk [vmem:[#allocation3 + $0x6c] sm:$0xf] %vm280_vm0, %v1141_v45  ;;  %v2431_v25 = vrot.slane %v2430_v1, 4  ;;  %v3556_v30 = vrot.slane %v3554_v19, 5 }
 0x245   : > { %3794 = vrot.lane.b32.xlu2 %v3643_v35, %s6018_s30  ;;  %v5683_v14 = vor.u32 %v5906_v57, %v5682_v8  ;;  %v1399_v2 = vrot.slane %v1398_v50, 4  ;;  %v3331_v31 = vld [vmem:[#allocation2 + $0x4c] sm:$0xf]  ;;  %v3469_v16 = vor.u32 %v3468_v5, %v3465_v3  ;;  %v7171_v35 = vrot.slane %v1401_v63, 5  ;;  %v1780_v38 = vld [vmem:[#allocation2 + $0x50] sm:$0x1] }
 0x246   : > { %3222 = vrot.lane.b32.xlu0 %v3142_v58, %s6016_s23  ;;  %v1988_v26 = vpop.permute.xlu2 %1987  ;;  %v2436_v21 = vsel %vm6170_vm11, %v2431_v25, %v2435_v10  ;;  %v3557_v4 = vsel %vm6170_vm11, %v3552_v18, %v3556_v30  ;;  %v3472_v40 = vshll.u32 %v3331_v31, 16  ;;  %v1905_v36 = vrot.slane %v1903_v23, 4  ;;  %v2119_v8 = vld [vmem:[#allocation2 + $0x7c] sm:$0xf]  ;;  %v2806_v53 = vld [vmem:[#allocation2 + $0x50] sm:$0x1] }
 0x247   : > { %v7155_v52 = vpop.permute.xlu0 %1995  ;;  %5804 = vmatmul.msk.bf16.gmra.mxu3 %vm4602_vm1, %v5683_v14  ;;  %2764 = vst.msk [vmem:[#allocation3 + $0x58] sm:$0xf] %vm280_vm0, %v2436_v21  ;;  %v3470_v58 = vrot.slane %v3469_v16, 4  ;;  %v1405_v19 = vshrl.u32 %v7151_v20, 16  ;;  %v3476_v50 = vshrl.u32 %v3331_v31, 16  ;;  %v2924_v45 = vrot.slane %v2922_v47, 4 }
 0x248   : > { %v7183_v62 = vrot.slane %v3472_v40, 5  ;;  %v1790_v23 = vld [vmem:[#allocation2 + $0x78] sm:$0xe]  ;;  %v2925_v57 = vrot.slane %v2806_v53, 5  ;;  %v2305_v5 = vld [vmem:[#allocation2 + $0x3c] sm:$0xf] }
 0x249   : > { %3017 = vrot.lane.b32.xlu1 %v2923_v22, %s6017_s26  ;;  %v1906_v22 = vrot.slane %v1780_v38, 5  ;;  %v5566_v20 = vld [vmem:[#allocation3 + $0x48] sm:$0xf]  ;;  %v2438_v63 = vshrl.u32 %v2305_v5, 16  ;;  %v5490_v25 = vrot.slane %v1790_v23, 9 }
 0x24a   : > { %v1646_v24 = vpop.permute.xlu1 %1645  ;;  %v3475_v33 = vsel %vm6170_vm11, %v3470_v58, %v7183_v62  ;;  %v7205_v18 = vld [vmem:[#allocation2 + $0x40] sm:$0xf]  ;;  %v3343_v30 = vld [vmem:[#allocation2 + $0x7c] sm:$0xf]  ;;  %v3332_v21 = vld [vmem:[#allocation2 + $0x50] sm:$0x1]  ;;  %v2926_v47 = vsel %vm6150_vm6, %v2924_v45, %v2925_v57 }
 0x24b   : > { %1735 = vst.msk [vmem:[#allocation3 + $0x54] sm:$0xf] %vm1727_vm15, %v1646_v24  ;;  %v1907_v11 = vsel %vm6150_vm6, %v1905_v36, %v1906_v22  ;;  %v2440_v56 = vrot.slane %v2438_v63, 4  ;;  %v3568_v58 = vshll.u32 %v3343_v30, 16  ;;  %v3572_v38 = vshrl.u32 %v3343_v30, 16 }
 0x24c   : > { %2075 = vst.msk [vmem:[#allocation3 + $0x54] sm:$0xf] %vm2067_vm2, %v7097_v48  ;;  %v1404_v48 = vsel %vm6170_vm11, %v1399_v2, %v7171_v35  ;;  %v2441_v2 = vshll.u32 %v2305_v5, 16  ;;  %v3917_v22 = vld [vmem:[#allocation2 + $0xb4] sm:$0xe] }
 0x24d   : > { %3047 = vrot.lane.b32.xlu2 %v2975_v13, %s6017_s26  ;;  %v3478_v13 = vrot.slane %v3476_v50, 4  ;;  %v1407_v50 = vrot.slane %v1405_v19, 4  ;;  %v7222_v63 = vrot.slane %v3568_v58, 5  ;;  %v2112_v30 = vld [vmem:[#allocation2 + $0x54] sm:$0xf]  ;;  %v2451_v58 = vshrl.u32 %v7205_v18, 16 }
 0x24e   : > { %3780 = vrot.lane.b32.xlu0 %v3557_v4, %s6018_s30  ;;  %v1648_v27 = vpop.permute.xlu2 %1647  ;;  %v2443_v16 = vrot.slane %v2441_v2, 5  ;;  %v2447_v4 = vshll.u32 %v7205_v18, 16 }
 0x24f   : > { %1736 = vst.msk [vmem:[#allocation3 + $0x60] sm:$0xf] %vm1727_vm15, %v1648_v27  ;;  %v7179_v32 = vpop.permute.xlu0 %3210  ;;  %v3151_v27 = vld [vmem:[#allocation2 + $0xac] sm:$0xf]  ;;  %v3479_v53 = vor.u32 %v3478_v13, %v7183_v62 }
 0x250   : > { %2076 = vst.msk [vmem:[#allocation3 + $0x60] sm:$0xf] %vm2067_vm2, %v1988_v26  ;;  %v7193_v26 = vld [vmem:[#allocation2 + $0x7c] sm:$0xf]  ;;  %v2444_v36 = vor.u32 %v2443_v16, %v2440_v56  ;;  %v2449_v5 = vrot.slane %v2447_v4, 5  ;;  %v1408_v56 = vor.u32 %v1407_v50, %v7171_v35 }
 0x251   : > { %1655 = vrot.lane.b32.xlu1 %v1404_v48, %s6017_s26  ;;  %v8393_v10 = vrot.slane %v7193_v26, 5  ;;  %v1216_v48 = vld [vmem:[#allocation2 + $0x50] sm:$0x1] }
 0x252   : > { %v2179_v28 = vpop.permute.xlu1 %2178  ;;  %v2445_v57 = vrot.slane %v2444_v36, 4  ;;  %v1411_v2 = vshll.u32 %v1216_v48, 16  ;;  %v1409_v36 = vrot.slane %v1408_v56, 4 }
 0x253   : > { %2268 = vst.msk [vmem:[#allocation3 + $0x54] sm:$0xf] %vm2260_vm3, %v2179_v28  ;;  %v1932_v40 = vsel %vm6150_vm6, %v5490_v25, %v8393_v10  ;;  %v3482_v28 = vshll.u32 %v3332_v21, 16  ;;  %v3354_v25 = vld [vmem:[#allocation2 + $0xa8] sm:$0xf]  ;;  %v3480_v21 = vrot.slane %v3479_v53, 4 }
 0x254   : > { %v3655_v4 = vshrl.u32 %v3354_v25, 16  ;;  %v7344_v10 = vld [vmem:[#allocation2 + $0x94] sm:$0xf] }
 0x255   : > { %3766 = vrot.lane.b32.xlu2 %v3475_v33, %s6018_s30  ;;  %v3918_v33 = vld [vmem:[#allocation2 + $0xb8] sm:$0xf]  ;;  %v3484_v13 = vrot.slane %v3482_v28, 5  ;;  %8420 = vst [vmem:[#allocation10_spill] sm:$0xff] %v7344_v10 }
 0x256   : > { %2202 = vrot.lane.b32.xlu0 %v2119_v8, %s6018_s30  ;;  %v3203_v3 = vpop.permute.xlu2 %3202  ;;  %v4067_v23 = vrot.slane %v3918_v33, 5  ;;  %v2828_v33 = vld [vmem:[#allocation2 + $0xa8] sm:$0xe]  ;;  %v3657_v18 = vrot.slane %v3655_v4, 4 }
 0x257   : > { %3292 = vst.msk [vmem:[#allocation3 + $0x4c] sm:$0xf] %vm2067_vm2, %v3203_v3  ;;  %v7199_v1 = vpop.permute.xlu0 %2190  ;;  %v3919_v3 = vld [vmem:[#allocation2 + $0xbc] sm:$0x1]  ;;  %v3485_v28 = vsel %vm6170_vm11, %v3480_v21, %v3484_v13 }
 0x258   : > { %v4069_v19 = vrot.slane %v4067_v23, 4 }
 0x259   : > { %1997 = vrot.lane.b32.xlu1 %v1907_v11, %s6016_s23  ;;  %v5525_v11 = vrot.slane %v3917_v22, 9  ;;  %v1413_v22 = vrot.slane %v1411_v2, 5 }
 0x25a   : > { %v3759_v14 = vpop.permute.xlu1 %3758  ;;  %v5878_v24 = vld [vmem:[#allocation3 + $0x50] sm:$0xf0] }
 0x25b   : > { %3850 = vst.msk [vmem:[#allocation3 + $0x34] sm:$0xf] %vm2260_vm3, %v3759_v14  ;;  %v5567_v31 = vor.u32 %v5878_v24, %v5566_v20  ;;  %v4070_v20 = vrot.slane %v3919_v3, 5  ;;  %v3574_v14 = vrot.slane %v3572_v38, 4  ;;  %v4068_v62 = vsel %vm6150_vm6, %v5525_v11, %v4067_v23  ;;  %v2307_v3 = vld [vmem:[#allocation2 + $0x44] sm:$0x1] }
 0x25c   : > { %4144 = vst.msk [vmem:[#allocation3 + $0x140] sm:$0xf] %vm280_vm0, %v4068_v62  ;;  %v2457_v23 = vshll.u32 %v2307_v3, 16  ;;  %v5509_v62 = vrot.slane %v2828_v33, 9  ;;  %v1414_v2 = vsel %vm6170_vm11, %v1409_v36, %v1413_v22  ;;  %v2121_v22 = vld [vmem:[#allocation2 + $0x88] sm:$0xf] }
 0x25d   : > { %3019 = vrot.lane.b32.xlu2 %v2926_v47, %s6017_s26  ;;  %4674 = vmatmul.bf16.gmra.mxu1 %v5567_v31  ;;  %v2450_v31 = vsel %vm6170_vm11, %v2445_v57, %v2449_v5  ;;  %v3344_v47 = vld [vmem:[#allocation2 + $0x80] sm:$0x1]  ;;  %v4071_v16 = vsel %vm6150_vm6, %v4069_v19, %v4070_v20  ;;  %v3575_v48 = vor.u32 %v3574_v14, %v7222_v63  ;;  %v2453_v57 = vrot.slane %v2451_v58, 4  ;;  %v2830_v33 = vld [vmem:[#allocation2 + $0xb0] sm:$0x1] }
 0x25e   : > { %2011 = vrot.lane.b32.xlu0 %v1932_v40, %s6016_s23  ;;  %v3658_v40 = vshll.u32 %v3354_v25, 16  ;;  %2765 = vst.msk [vmem:[#allocation3 + $0x64] sm:$0xf] %vm280_vm0, %v2450_v31  ;;  %v3578_v35 = vshll.u32 %v3344_v47, 16  ;;  %v1217_v3 = vld [vmem:[#allocation2 + $0x54] sm:$0xf] }
 0x25f   : > { %v2181_v8 = vpop.permute.xlu2 %2180  ;;  %v7219_v45 = vpop.permute.xlu0 %3242  ;;  %4145 = vst.msk [vmem:[#allocation3 + $0x14c] sm:$0xf] %vm280_vm0, %v4071_v16  ;;  %v3576_v11 = vrot.slane %v3575_v48, 4 }
 0x260   : > { %2269 = vst.msk [vmem:[#allocation3 + $0x60] sm:$0xf] %vm2260_vm3, %v2181_v8  ;;  %v2829_v8 = vld [vmem:[#allocation2 + $0xac] sm:$0xf]  ;;  %v3660_v50 = vrot.slane %v3658_v40, 5  ;;  %v3580_v14 = vrot.slane %v3578_v35, 5 }
 0x261   : > { %3240 = vrot.lane.b32.xlu1 %v3151_v27, %s6016_s23  ;;  %v3144_v27 = vld [vmem:[#allocation2 + $0x84] sm:$0xf]  ;;  %v2978_v19 = vrot.slane %v2829_v8, 5 }
 0x262   : > { %v3012_v24 = vpop.permute.xlu1 %3011  ;;  %v3661_v31 = vor.u32 %v3660_v50, %v3657_v18  ;;  %v3581_v13 = vsel %vm6170_vm11, %v3576_v11, %v3580_v14  ;;  %v3137_v11 = vld [vmem:[#allocation2 + $0x58] sm:$0xf]  ;;  %v2981_v14 = vrot.slane %v2830_v33, 5 }
 0x263   : > { %3100 = vst.msk [vmem:[#allocation3 + $0x58] sm:$0xf] %vm1727_vm15, %v3012_v24  ;;  %v5694_v25 = vld [vmem:[#allocation3 + $0x140] sm:$0xf]  ;;  %v2459_v24 = vrot.slane %v2457_v23, 5  ;;  %v2979_v4 = vsel %vm6150_vm6, %v5509_v62, %v2978_v19 }
 0x264   : > { %v3662_v35 = vrot.slane %v3661_v31, 4  ;;  %v1143_v23 = vld [vmem:[#allocation2 + $0x40] sm:$0xf]  ;;  %v2807_v62 = vld [vmem:[#allocation2 + $0x54] sm:$0xe] }
 0x265   : > { %2188 = vrot.lane.b32.xlu2 %v2112_v30, %s6018_s30  ;;  %v2454_v30 = vor.u32 %v2453_v57, %v2449_v5  ;;  %v5874_v5 = vld [vmem:[#allocation3 + $0x34] sm:$0xf]  ;;  %v2980_v57 = vrot.slane %v2978_v19, 4  ;;  %1175 = vst.msk [vmem:[#allocation3 + $0x84] sm:$0xf] %vm280_vm0, %v1143_v23 }
 0x266   : > { %3226 = vrot.lane.b32.xlu0 %v3144_v27, %s6016_s23  ;;  %v5909_v21 = vld [vmem:[#allocation3 + $0x148] sm:$0xf0]  ;;  %v3667_v8 = vsel %vm6170_vm11, %v3662_v35, %v6814_v44 }
 0x267   : > { %v3761_v38 = vpop.permute.xlu2 %3760  ;;  %v5695_v56 = vor.u32 %v5909_v21, %v5694_v25  ;;  %v2455_v47 = vrot.slane %v2454_v30, 4  ;;  %v7272_v25 = vld [vmem:[#allocation2 + $0x88] sm:$0xf]  ;;  %v1793_v44 = vld [vmem:[#allocation2 + $0x84] sm:$0xe]  ;;  %v1419_v30 = vshll.u32 %v1217_v3, 16 }
 0x268   : > { %3851 = vst.msk [vmem:[#allocation3 + $0x40] sm:$0xf] %vm2260_vm3, %v3761_v38  ;;  %v7242_v53 = vpop.permute.xlu0 %3800  ;;  %v3333_v38 = vld [vmem:[#allocation2 + $0x54] sm:$0xf]  ;;  %v8392_v19 = vrot.slane %v7272_v25, 5 }
 0x269   : > { %3768 = vrot.lane.b32.xlu1 %v3485_v28, %s6018_s30  ;;  %5805 = vmatmul.msk.bf16.gmra.mxu3 %vm4602_vm1, %v5695_v56  ;;  %v2460_v27 = vsel %vm6170_vm11, %v2455_v47, %v2459_v24  ;;  %v1142_v28 = vld [vmem:[#allocation2 + $0x3c] sm:$0xf]  ;;  %v3487_v18 = vshrl.u32 %v3333_v38, 16  ;;  %v3490_v50 = vshll.u32 %v3333_v38, 16  ;;  %v1416_v24 = vshrl.u32 %v1217_v3, 16 }
 0x26a   : > { %2766 = vst.msk [vmem:[#allocation3 + $0x70] sm:$0xf] %vm280_vm0, %v2460_v27  ;;  %v5491_v47 = vrot.slane %v1793_v44, 9  ;;  %v1421_v27 = vrot.slane %v1419_v30, 5  ;;  %v5578_v35 = vld [vmem:[#allocation3 + $0x60] sm:$0xf] }
 0x26b   : > { %v1990_v20 = vpop.permute.xlu1 %1989  ;;  %1174 = vst.msk [vmem:[#allocation3 + $0x78] sm:$0xf] %vm280_vm0, %v1142_v28  ;;  %v3489_v31 = vrot.slane %v3487_v18, 4  ;;  %v3492_v21 = vrot.slane %v3490_v50, 5  ;;  %v1218_v18 = vld [vmem:[#allocation2 + $0x58] sm:$0xf] }
 0x26c   : > { %v1939_v33 = vsel %vm6150_vm6, %v5491_v47, %v8392_v19  ;;  %v1425_v44 = vshll.u32 %v1218_v18, 16  ;;  %v3347_v30 = vld [vmem:[#allocation2 + $0x8c] sm:$0x1]  ;;  %v2123_v19 = vld [vmem:[#allocation2 + $0x94] sm:$0xf] }
 0x26d   : > { %1657 = vrot.lane.b32.xlu2 %v1414_v2, %s6017_s26  ;;  %v2808_v2 = vld [vmem:[#allocation2 + $0x58] sm:$0xf]  ;;  %v3493_v28 = vor.u32 %v3492_v21, %v3489_v31  ;;  %v3146_v21 = vld [vmem:[#allocation2 + $0x90] sm:$0xf]  ;;  %v3602_v47 = vshll.u32 %v3347_v30, 16 }
 0x26e   : > { %3784 = vrot.lane.b32.xlu0 %v3581_v13, %s6018_s30  ;;  %v3346_v13 = vld [vmem:[#allocation2 + $0x88] sm:$0xf] }
 0x26f   : > { %v7251_v16 = vpop.permute.xlu2 %2212  ;;  %v5556_v40 = vld [vmem:[#allocation3 + $0x3c] sm:$0xf0] }
 0x270   : > { %8417 = vst [vmem:[#allocation7_spill] sm:$0xff] %v7251_v16  ;;  %v7258_v48 = vpop.permute.xlu0 %1999  ;;  %v5559_v58 = vor.u32 %v5874_v5, %v5556_v40  ;;  %v2929_v5 = vrot.slane %v2808_v2, 5  ;;  %v1418_v40 = vrot.slane %v1416_v24, 4 }
 0x271   : > { %3049 = vrot.lane.b32.xlu1 %v2979_v4, %s6017_s26  ;;  %v5502_v4 = vrot.slane %v2807_v62, 9 }
 0x272   : > { %4758 = vmatmul.bf16.gmra.mxu2 %v5559_v58  ;;  %v2982_v58 = vsel %vm6150_vm6, %v2980_v57, %v2981_v14  ;;  %v3494_v57 = vrot.slane %v3493_v28, 4  ;;  %v3349_v28 = vld [vmem:[#allocation2 + $0x94] sm:$0xf] }
 0x273   : > { %v1650_v36 = vpop.permute.xlu1 %1649  ;;  %v2930_v3 = vsel %vm6150_vm6, %v5502_v4, %v2929_v5  ;;  %v3616_v30 = vshll.u32 %v3349_v28, 16 }
 0x274   : > { %1737 = vst.msk [vmem:[#allocation3 + $0x6c] sm:$0xf] %vm1727_vm15, %v1650_v36  ;;  %v3592_v36 = vshll.u32 %v3346_v13, 16  ;;  %v3499_v2 = vsel %vm6170_vm11, %v3494_v57, %v6910_v37 }
 0x275   : > { %2077 = vst.msk [vmem:[#allocation3 + $0x6c] sm:$0xf] %vm2067_vm2, %v1990_v20  ;;  %3798 = vrot.lane.b32.xlu2 %v3667_v8, %s6018_s30 }
 0x276   : > { %2270 = vst.msk [vmem:[#allocation3 + $0x6c] sm:$0xf] %vm2260_vm3, %v6951_v0  ;;  %2206 = vrot.lane.b32.xlu0 %v2121_v22, %s6018_s30  ;;  %v3596_v22 = vshrl.u32 %v3346_v13, 16  ;;  %v7295_v14 = vrot.slane %v3592_v36, 5  ;;  %v7303_v13 = vrot.slane %v1425_v44, 5 }
 0x277   : > { %v3014_v20 = vpop.permute.xlu2 %3013  ;;  %v2330_v36 = vld [vmem:[#allocation2 + $0xa0] sm:$0xf] }
 0x278   : > { %3101 = vst.msk [vmem:[#allocation3 + $0x64] sm:$0xf] %vm1727_vm15, %v3014_v20  ;;  %v7276_v0 = vpop.permute.xlu0 %3214  ;;  %v3598_v20 = vrot.slane %v3596_v22, 4  ;;  %v2331_v22 = vld [vmem:[#allocation2 + $0xa4] sm:$0x1]  ;;  %v2639_v57 = vshll.u32 %v2330_v36, 16 }
 0x279   : > { %3212 = vrot.lane.b32.xlu1 %v3137_v11, %s6016_s23  ;;  %v1422_v11 = vor.u32 %v1421_v27, %v1418_v40  ;;  %v2931_v27 = vrot.slane %v2929_v5, 4  ;;  %v3604_v5 = vrot.slane %v3602_v47, 5  ;;  %v2649_v44 = vshll.u32 %v2331_v22, 16 }
 0x27a   : > { %v3599_v31 = vor.u32 %v3598_v20, %v7295_v14  ;;  %v2643_v20 = vshrl.u32 %v2330_v36, 16 }
 0x27b   : > { %v3205_v56 = vpop.permute.xlu1 %3204  ;;  %v1423_v24 = vrot.slane %v1422_v11, 4 }
 0x27c   : > { %3293 = vst.msk [vmem:[#allocation3 + $0x58] sm:$0xf] %vm2067_vm2, %v3205_v56  ;;  %v2809_v56 = vld [vmem:[#allocation2 + $0x5c] sm:$0x1] }
 0x27d   : > { %v5881_v38 = vld [vmem:[#allocation3 + $0x68] sm:$0xf0]  ;;  %3051 = vrot.lane.b32.xlu2 %v2982_v58, %s6017_s26  ;;  %v1428_v40 = vsel %vm6170_vm11, %v1423_v24, %v7303_v13  ;;  %v2932_v58 = vrot.slane %v2809_v56, 5 }
 0x27e   : > { %v5579_v8 = vor.u32 %v5881_v38, %v5578_v35  ;;  %2015 = vrot.lane.b32.xlu0 %v1939_v33, %s6016_s23  ;;  %v3600_v35 = vrot.slane %v3599_v31, 4  ;;  %v1783_v38 = vld [vmem:[#allocation2 + $0x5c] sm:$0x1]  ;;  %v7316_v33 = vld [vmem:[%s8388_s4] ss:$0 sm:$0xff]  ;;  %v2645_v31 = vrot.slane %v2643_v20, 4 }
 0x27f   : > { %v3763_v50 = vpop.permute.xlu2 %3762  ;;  %v1913_v11 = vrot.slane %v1783_v38, 5  ;;  %v2933_v24 = vsel %vm6150_vm6, %v2931_v27, %v2932_v58  ;;  %v1219_v58 = vld [vmem:[#allocation2 + $0x5c] sm:$0x1]  ;;  %v3358_v38 = vld [vmem:[#allocation2 + $0xb8] sm:$0xf] }
 0x280   : > { %4679 = vmatmul.bf16.gmra.mxu1 %v5579_v8  ;;  %3852 = vst.msk [vmem:[#allocation3 + $0x4c] sm:$0xf] %vm2260_vm3, %v3763_v50  ;;  %v7292_v23 = vpop.permute.xlu0 %3772  ;;  %v1429_v8 = vshrl.u32 %v1218_v18, 16  ;;  %v3620_v18 = vshrl.u32 %v3349_v28, 16  ;;  %v3605_v43 = vsel %vm6170_vm11, %v3600_v35, %v3604_v5  ;;  %v2651_v28 = vrot.slane %v2649_v44, 5 }
 0x281   : > { %3021 = vrot.lane.b32.xlu1 %v2930_v3, %s6017_s26  ;;  %v1912_v3 = vrot.slane %v1910_v12, 4  ;;  %v3357_v12 = vld [vmem:[#allocation2 + $0xb4] sm:$0xf]  ;;  %v7339_v5 = vrot.slane %v3616_v30, 5  ;;  %v2114_v44 = vld [vmem:[#allocation2 + $0x60] sm:$0xf] }
 0x282   : > { %v1431_v56 = vrot.slane %v1429_v8, 4  ;;  %v3679_v8 = vshrl.u32 %v3357_v12, 16 }
 0x283   : > { %v3016_v62 = vpop.permute.xlu1 %3015  ;;  %v1914_v27 = vsel %vm6150_vm6, %v1912_v3, %v1913_v11  ;;  %8418 = vst [vmem:[#allocation8_spill] sm:$0xff] %v7339_v5  ;;  %v3350_v3 = vld [vmem:[#allocation2 + $0x98] sm:$0x1]  ;;  %v3622_v11 = vrot.slane %v3620_v18, 4 }
 0x284   : > { %3102 = vst.msk [vmem:[#allocation3 + $0x70] sm:$0xf] %vm1727_vm15, %v3016_v62  ;;  %v4660_v62 = vpop.f32.mrf.mxu1 }
 0x285   : > { %3770 = vrot.lane.b32.xlu2 %v3499_v2, %s6018_s30  ;;  %v7328_v2 = vrot.slane %v2639_v57, 5 }
 0x286   : > { %3230 = vrot.lane.b32.xlu0 %v3146_v21, %s6016_s23  ;;  %v2329_v21 = vld [vmem:[#allocation2 + $0x9c] sm:$0xf] }
 0x287   : > { %v3207_v4 = vpop.permute.xlu2 %3206  ;;  %v2630_v47 = vshrl.u32 %v2329_v21, 16  ;;  %v2646_v35 = vor.u32 %v2645_v31, %v7328_v2  ;;  %v1432_v31 = vor.u32 %v1431_v56, %v7303_v13  ;;  %v3623_v13 = vor.u32 %v3622_v11, %v7339_v5  ;;  %v1144_v5 = vld [vmem:[#allocation2 + $0x48] sm:$0xf] }
 0x288   : > { %3294 = vst.msk [vmem:[#allocation3 + $0x64] sm:$0xf] %vm2067_vm2, %v3207_v4  ;;  %v7310_v37 = vpop.permute.xlu0 %2194  ;;  %v4661_v4 = vadd.f32 %v7316_v33, %v4660_v62 }
 0x289   : > { %1659 = vrot.lane.b32.xlu1 %v1428_v40, %s6017_s26  ;;  %v2632_v57 = vrot.slane %v2630_v47, 4  ;;  %v2647_v62 = vrot.slane %v2646_v35, 4  ;;  %v3626_v35 = vshll.u32 %v3350_v3, 16  ;;  %1176 = vst.msk [vmem:[#allocation3 + $0x90] sm:$0xf] %vm280_vm0, %v1144_v5 }
 0x28b   : > { %v1652_v50 = vpop.permute.xlu1 %1651  ;;  %v2652_v30 = vsel %vm6170_vm11, %v2647_v62, %v2651_v28 }
 0x28c   : > { %1738 = vst.msk [vmem:[#allocation3 + $0x78] sm:$0xf] %vm1727_vm15, %v1652_v50  ;;  %v3682_v50 = vshll.u32 %v3357_v12, 16  ;;  %v3692_v12 = vshrl.u32 %v3358_v38, 16 }
 0x28d   : > { %2078 = vst.msk [vmem:[#allocation3 + $0x78] sm:$0xf] %vm2067_vm2, %v7016_v55  ;;  %3023 = vrot.lane.b32.xlu2 %v2933_v24, %s6017_s26  ;;  %v2633_v55 = vshll.u32 %v2329_v21, 16  ;;  %v1435_v21 = vshll.u32 %v1219_v58, 16 }
 0x28e   : > { %3788 = vrot.lane.b32.xlu0 %v3605_v43, %s6018_s30  ;;  %v3684_v18 = vrot.slane %v3682_v50, 5  ;;  %2782 = vst.msk [vmem:[#allocation3 + $0x130] sm:$0xf] %vm280_vm0, %v2652_v30  ;;  %v3694_v62 = vrot.slane %v3692_v12, 4  ;;  %v2318_v30 = vld [vmem:[#allocation2 + $0x70] sm:$0xf] }
 0x28f   : > { %v2185_v40 = vpop.permute.xlu2 %2184  ;;  %v2635_v24 = vrot.slane %v2633_v55, 5  ;;  %v3336_v55 = vld [vmem:[#allocation2 + $0x60] sm:$0xf]  ;;  %v1437_v50 = vrot.slane %v1435_v21, 5  ;;  %v2543_v46 = vshll.u32 %v2318_v30, 16  ;;  %v2547_v34 = vshrl.u32 %v2318_v30, 16 }
 0x290   : > { %2271 = vst.msk [vmem:[#allocation3 + $0x78] sm:$0xf] %vm2260_vm3, %v2185_v40  ;;  %v7336_v36 = vpop.permute.xlu0 %2003  ;;  %v1796_v40 = vld [vmem:[#allocation2 + $0x90] sm:$0xe]  ;;  %v7368_v21 = vld [vmem:[#allocation2 + $0x60] sm:$0xe] }
 0x291   : > { %v4749_v22 = vpop.f32.mrf.mxu2  ;;  %2001 = vrot.lane.b32.xlu1 %v1914_v27, %s6016_s23  ;;  %v3688_v27 = vshll.u32 %v3358_v38, 16  ;;  %v2636_v47 = vor.u32 %v2635_v24, %v2632_v57  ;;  %v5492_v58 = vrot.slane %v1796_v40, 9  ;;  %v8397_v38 = vrot.slane %v7344_v10, 5  ;;  %v3153_v57 = vld [vmem:[#allocation2 + $0xb8] sm:$0xf] }
 0x292   : > { %v7341_v20 = vadd.f32 %v4749_v22, %v4661_v4  ;;  %v1151_v4 = vld [vmem:[#allocation2 + $0x70] sm:$0xf]  ;;  %v3681_v22 = vrot.slane %v3679_v8, 4  ;;  %v1433_v8 = vrot.slane %v1432_v31, 4  ;;  %v3511_v40 = vshrl.u32 %v3336_v55, 16 }
 0x293   : > { %v1994_v43 = vpop.permute.xlu1 %1993  ;;  %v2637_v56 = vrot.slane %v2636_v47, 4  ;;  %1183 = vst.msk [vmem:[#allocation3 + $0xe4] sm:$0xf] %vm280_vm0, %v1151_v4  ;;  %v7354_v3 = vrot.slane %v3688_v27, 5  ;;  %v7366_v31 = vrot.slane %v3623_v13, 4  ;;  %v3514_v27 = vshll.u32 %v3336_v55, 16 }
 0x294   : > { %8419 = vst [vmem:[#allocation9_spill] sm:$0xff] %v7341_v20  ;;  %v3685_v11 = vor.u32 %v3684_v18, %v3681_v22  ;;  %v7374_v47 = vld [vmem:[#allocation2 + $0x64] sm:$0xf]  ;;  %v7376_v4 = vld [vmem:[#allocation2 + $0xbc] sm:$0x1]  ;;  %v7408_v16 = vrot.slane %v2543_v46, 5 }
 0x295   : > { %2192 = vrot.lane.b32.xlu2 %v2114_v44, %s6018_s30  ;;  %v7360_v44 = vrot.slane %v3626_v35, 5  ;;  %v1150_v22 = vld [vmem:[#allocation2 + $0x6c] sm:$0xf]  ;;  %v3695_v18 = vor.u32 %v3694_v62, %v7354_v3  ;;  %v2310_v55 = vld [vmem:[#allocation2 + $0x50] sm:$0x1]  ;;  %v8423_v5 = vrot.slane %v7374_v47, 5 }
 0x296   : > { %2210 = vrot.lane.b32.xlu0 %v2123_v19, %s6018_s30  ;;  %v2642_v19 = vsel %vm6170_vm11, %v2637_v56, %v7328_v2  ;;  %v1438_v2 = vsel %vm6170_vm11, %v1433_v8, %v1437_v50  ;;  %v2309_v35 = vld [vmem:[#allocation2 + $0x4c] sm:$0xf]  ;;  %v3686_v13 = vrot.slane %v3685_v11, 4  ;;  %v7386_v56 = vrot.slane %v3511_v40, 4  ;;  %v3139_v8 = vld [vmem:[#allocation2 + $0x64] sm:$0xf] }
 0x297   : > { %v1654_v28 = vpop.permute.xlu2 %1653  ;;  %2781 = vst.msk [vmem:[#allocation3 + $0x124] sm:$0xf] %vm280_vm0, %v2642_v19  ;;  %v3516_v50 = vrot.slane %v3514_v27, 5  ;;  %v2481_v41 = vshll.u32 %v2310_v55, 16  ;;  %v2319_v40 = vld [vmem:[#allocation2 + $0x74] sm:$0x1] }
 0x298   : > { %1739 = vst.msk [vmem:[#allocation3 + $0x84] sm:$0xf] %vm1727_vm15, %v1654_v28  ;;  %v7357_v24 = vpop.permute.xlu0 %3218  ;;  %v2471_v28 = vshll.u32 %v2309_v35, 16  ;;  %v3698_v27 = vshll.u32 %v7376_v4, 16  ;;  %v2308_v55 = vld [vmem:[#allocation2 + $0x48] sm:$0xf] }
 0x299   : > { %3244 = vrot.lane.b32.xlu1 %v3153_v57, %s6016_s23  ;;  %2079 = vst.msk [vmem:[#allocation3 + $0x84] sm:$0xf] %vm2067_vm2, %v1994_v43  ;;  %v1946_v43 = vsel %vm6150_vm6, %v5492_v58, %v8397_v38  ;;  %v2475_v57 = vshrl.u32 %v2309_v35, 16  ;;  %v5503_v58 = vrot.slane %v7368_v21, 9  ;;  %v7397_v35 = vrot.slane %v3695_v18, 4 }
 0x29a   : > { %2272 = vst.msk [vmem:[#allocation3 + $0x84] sm:$0xf] %vm2260_vm3, %v7063_v51  ;;  %v1220_v51 = vld [vmem:[#allocation2 + $0x60] sm:$0xf]  ;;  %v7392_v11 = vrot.slane %v2471_v28, 5  ;;  %v3517_v4 = vor.u32 %v3516_v50, %v7386_v56 }
 0x29b   : > { %v7372_v12 = vpop.permute.xlu1 %3236  ;;  %1182 = vst.msk [vmem:[#allocation3 + $0xd8] sm:$0xf] %vm280_vm0, %v1150_v22  ;;  %v1440_v62 = vshrl.u32 %v1220_v51, 16  ;;  %v2477_v19 = vrot.slane %v2475_v57, 4  ;;  %v1443_v30 = vshll.u32 %v1220_v51, 16  ;;  %v2483_v57 = vrot.slane %v2481_v41, 5 }
 0x29c   : > { %8421 = vst [vmem:[#allocation11_spill] sm:$0xff] %v7372_v12  ;;  %v2317_v22 = vld [vmem:[#allocation2 + $0x6c] sm:$0xf]  ;;  %v5590_v21 = vld [vmem:[#allocation3 + $0x78] sm:$0xf]  ;;  %v2465_v51 = vshll.u32 %v2308_v55, 16 }
 0x29d   : > { %1661 = vrot.lane.b32.xlu2 %v1438_v2, %s6017_s26  ;;  %v2478_v28 = vor.u32 %v2477_v19, %v7392_v11  ;;  %v2462_v2 = vshrl.u32 %v2308_v55, 16  ;;  %v2321_v18 = vld [vmem:[#allocation2 + $0x7c] sm:$0xf]  ;;  %v2553_v19 = vshll.u32 %v2319_v40, 16  ;;  %v2537_v46 = vshll.u32 %v2317_v22, 16 }
 0x29e   : > { %2019 = vrot.lane.b32.xlu0 %v1946_v43, %s6016_s23  ;;  %v3691_v43 = vsel %vm6170_vm11, %v3686_v13, %v7354_v3  ;;  %v1445_v3 = vrot.slane %v1443_v30, 5  ;;  %v2467_v13 = vrot.slane %v2465_v51, 5  ;;  %v2567_v50 = vshll.u32 %v2321_v18, 16  ;;  %v7428_v30 = vld [vmem:[#allocation2 + $0x64] sm:$0xf] }
 0x29f   : > { %v7394_v38 = vpop.permute.xlu2 %3794  ;;  %v2479_v12 = vrot.slane %v2478_v28, 4  ;;  %v2464_v10 = vrot.slane %v2462_v2, 4  ;;  %v2937_v40 = vsel %vm6150_vm6, %v5503_v58, %v8423_v5  ;;  %v3518_v2 = vrot.slane %v3517_v4, 4  ;;  %v1145_v55 = vld [vmem:[#allocation2 + $0x4c] sm:$0xf] }
 0x2a0   : > { %8422 = vst [vmem:[#allocation12_spill] sm:$0xff] %v7394_v38  ;;  %v7400_v20 = vpop.permute.xlu0 %3776  ;;  %v2549_v38 = vrot.slane %v2547_v34, 4  ;;  %v7415_v34 = vld [vmem:[#allocation2 + $0x6c] sm:$0xf]  ;;  %v2322_v28 = vld [vmem:[#allocation2 + $0x80] sm:$0x1] }
 0x2a1   : > { %3216 = vrot.lane.b32.xlu1 %v3139_v8, %s6016_s23  ;;  %v5884_v15 = vld [vmem:[#allocation3 + $0x80] sm:$0xf0]  ;;  %v1442_v8 = vrot.slane %v1440_v62, 4  ;;  %v2484_v56 = vsel %vm6170_vm11, %v2479_v12, %v2483_v57  ;;  %v2320_v12 = vld [vmem:[#allocation2 + $0x78] sm:$0xf]  ;;  %v7437_v57 = vrot.slane %v2567_v50, 5 }
 0x2a2   : > { %v5591_v7 = vor.u32 %v5884_v15, %v5590_v21  ;;  %v2550_v41 = vor.u32 %v2549_v38, %v7408_v16  ;;  %v2534_v15 = vshrl.u32 %v2317_v22, 16  ;;  %v3700_v38 = vrot.slane %v3698_v27, 5  ;;  %2768 = vst.msk [vmem:[#allocation3 + $0x88] sm:$0xf] %vm280_vm0, %v2484_v56  ;;  %v5877_v51 = vld [vmem:[#allocation3 + $0x4c] sm:$0xf] }
 0x2a3   : > { %v3765_v42 = vpop.permute.xlu1 %3764  ;;  %v2555_v22 = vrot.slane %v2553_v19, 5  ;;  %1177 = vst.msk [vmem:[#allocation3 + $0x9c] sm:$0xf] %vm280_vm0, %v1145_v55  ;;  %v2539_v27 = vrot.slane %v2537_v46, 5  ;;  %v2571_v4 = vshrl.u32 %v2321_v18, 16  ;;  %v2558_v46 = vshrl.u32 %v2320_v12, 16 }
 0x2a4   : > { %3853 = vst.msk [vmem:[#allocation3 + $0x58] sm:$0xf] %vm2260_vm3, %v3765_v42  ;;  %4684 = vmatmul.bf16.gmra.mxu1 %v5591_v7  ;;  %v3629_v42 = vsel %vm6170_vm11, %v7366_v31, %v7360_v44  ;;  %v2468_v7 = vor.u32 %v2467_v13, %v2464_v10  ;;  %v2551_v62 = vrot.slane %v2550_v41, 4  ;;  %v1446_v44 = vor.u32 %v1445_v3, %v1442_v8  ;;  %v1799_v5 = vld [vmem:[#allocation2 + $0x9c] sm:$0xe] }
 0x2a5   : > { %3802 = vrot.lane.b32.xlu2 %v3691_v43, %s6018_s30  ;;  %v2536_v10 = vrot.slane %v2534_v15, 4  ;;  %v1449_v8 = vshll.u32 %v7428_v30, 16  ;;  %v3535_v13 = vshrl.u32 %v7415_v34, 16  ;;  %v2573_v15 = vrot.slane %v2571_v4, 4 }
 0x2a6   : > { %3792 = vrot.lane.b32.xlu0 %v3629_v42, %s6018_s30  ;;  %v2469_v31 = vrot.slane %v2468_v7, 4  ;;  %v2556_v58 = vsel %vm6170_vm11, %v2551_v62, %v2555_v22  ;;  %v1447_v50 = vrot.slane %v1446_v44, 4  ;;  %v2577_v7 = vshll.u32 %v2322_v28, 16  ;;  %v1153_v22 = vld [vmem:[#allocation2 + $0x7c] sm:$0xf] }
 0x2a7   : > { %v3048_v21 = vpop.permute.xlu2 %3047  ;;  %2774 = vst.msk [vmem:[#allocation3 + $0xd0] sm:$0xf] %vm280_vm0, %v2556_v58  ;;  %v2540_v41 = vor.u32 %v2539_v27, %v2536_v10  ;;  %v3701_v62 = vsel %vm6170_vm11, %v7397_v35, %v3700_v38  ;;  %v2574_v55 = vor.u32 %v2573_v15, %v7437_v57  ;;  %v2561_v44 = vshll.u32 %v2320_v12, 16  ;;  %v1786_v35 = vld [vmem:[#allocation2 + $0x68] sm:$0x1] }
 0x2a8   : > { %3118 = vst.msk [vmem:[#allocation3 + $0x130] sm:$0xf] %vm1727_vm15, %v3048_v21  ;;  %v7432_v43 = vpop.permute.xlu0 %2198  ;;  %v2474_v3 = vsel %vm6170_vm11, %v2469_v31, %v7392_v11  ;;  %v3523_v11 = vsel %vm6170_vm11, %v3518_v2, %v7013_v49  ;;  %v7459_v21 = vrot.slane %v1449_v8, 5  ;;  %v2560_v2 = vrot.slane %v2558_v46, 4  ;;  %v7465_v38 = vld [vmem:[#allocation2 + $0x6c] sm:$0xe] }
 0x2a9   : > { %3025 = vrot.lane.b32.xlu1 %v2937_v40, %s6017_s26  ;;  %2767 = vst.msk [vmem:[#allocation3 + $0x7c] sm:$0xf] %vm280_vm0, %v2474_v3  ;;  %v2541_v42 = vrot.slane %v2540_v41, 4  ;;  %v7455_v40 = vld [vmem:[#allocation2 + $0xa0] sm:$0xf]  ;;  %v2575_v58 = vrot.slane %v2574_v55, 4 }
 0x2aa   : > { %v1152_v31 = vld [vmem:[#allocation2 + $0x78] sm:$0xf]  ;;  %v1452_v27 = vsel %vm6170_vm11, %v1447_v50, %v7459_v21  ;;  %v2579_v28 = vrot.slane %v2577_v7, 5  ;;  %v2563_v4 = vrot.slane %v2561_v44, 5  ;;  %1185 = vst.msk [vmem:[#allocation3 + $0xfc] sm:$0xf] %vm280_vm0, %v1153_v22 }
 0x2ab   : > { %v3046_v19 = vpop.permute.xlu1 %3045  ;;  %v5568_v56 = vld [vmem:[#allocation3 + $0x54] sm:$0xf0]  ;;  %v2546_v49 = vsel %vm6170_vm11, %v2541_v42, %v7408_v16  ;;  %v8424_v12 = vrot.slane %v7374_v47, 5  ;;  %v5493_v41 = vrot.slane %v1799_v5, 9  ;;  %1184 = vst.msk [vmem:[#allocation3 + $0xf0] sm:$0xf] %vm280_vm0, %v1152_v31 }
 0x2ac   : > { %3117 = vst.msk [vmem:[#allocation3 + $0x124] sm:$0xf] %vm1727_vm15, %v3046_v19  ;;  %v5571_v18 = vor.u32 %v5877_v51, %v5568_v56  ;;  %v7478_v3 = vld [vmem:[#allocation2 + $0x70] sm:$0xf]  ;;  %v8400_v19 = vrot.slane %v7455_v40, 5  ;;  %v2580_v56 = vsel %vm6170_vm11, %v2575_v58, %v2579_v28  ;;  %v2564_v15 = vor.u32 %v2563_v4, %v2560_v2 }
 0x2ad   : > { %3310 = vst.msk [vmem:[#allocation3 + $0x124] sm:$0xf] %vm2067_vm2, %v7092_v59  ;;  %3774 = vrot.lane.b32.xlu2 %v3523_v11, %s6018_s30  ;;  %v2812_v59 = vld [vmem:[#allocation2 + $0x68] sm:$0x1]  ;;  %v2938_v51 = vrot.slane %v8424_v12, 4  ;;  %v8425_v50 = vrot.slane %v6963_v39, 5 }
 0x2ae   : > { %4763 = vmatmul.bf16.gmra.mxu2 %v5571_v18  ;;  %3804 = vrot.lane.b32.xlu0 %v3701_v62, %s6018_s30  ;;  %2773 = vst.msk [vmem:[#allocation3 + $0xc4] sm:$0xf] %vm280_vm0, %v2546_v49  ;;  %v2939_v8 = vrot.slane %v2812_v59, 5  ;;  %v2324_v46 = vld [vmem:[#allocation2 + $0x88] sm:$0xf]  ;;  %v1920_v7 = vrot.slane %v1786_v35, 5  ;;  %v7487_v62 = vpop.f32.mrf.mxu1 }
 0x2af   : > { %v3767_v10 = vpop.permute.xlu2 %3766  ;;  %v1919_v42 = vrot.slane %v8425_v50, 4  ;;  %2776 = vst.msk [vmem:[#allocation3 + $0xe8] sm:$0xf] %vm280_vm0, %v2580_v56  ;;  %v2591_v47 = vshll.u32 %v2324_v46, 16  ;;  %v2595_v11 = vshrl.u32 %v2324_v46, 16  ;;  %v1453_v5 = vshrl.u32 %v7428_v30, 16  ;;  %v7517_v46 = vpop.f32.mrf.mxu2 }
 0x2b0   : > { %3854 = vst.msk [vmem:[#allocation3 + $0x64] sm:$0xf] %vm2260_vm3, %v3767_v10  ;;  %v7473_v16 = vpop.permute.xlu0 %2007  ;;  %v3538_v22 = vshll.u32 %v7415_v34, 16  ;;  %v2940_v59 = vsel %vm6150_vm6, %v2938_v51, %v2939_v8  ;;  %v7498_v49 = vrot.slane %v3535_v13, 4  ;;  %v7500_v2 = vld [vmem:[#allocation2 + $0x6c] sm:$0xf]  ;;  %v1953_v30 = vsel %vm6150_vm6, %v5493_v41, %v8400_v19 }
 0x2b1   : > { %1663 = vrot.lane.b32.xlu1 %v1452_v27, %s6017_s26  ;;  %8426 = vst [vmem:[#allocation13_spill] sm:$0xff] %v7487_v62  ;;  %v2565_v44 = vrot.slane %v2564_v15, 4  ;;  %v1222_v35 = vld [vmem:[#allocation2 + $0x68] sm:$0x1]  ;;  %v3361_v31 = vld [vmem:[#allocation2 + $0xc4] sm:$0xf]  ;;  %v1921_v34 = vsel %vm6150_vm6, %v1919_v42, %v1920_v7 }
 0x2b2   : > { %v2325_v10 = vld [vmem:[#allocation2 + $0x8c] sm:$0x1]  ;;  %v2334_v27 = vld [vmem:[#allocation2 + $0xb0] sm:$0x1]  ;;  %v7513_v28 = vrot.slane %v2591_v47, 5  ;;  %v2597_v4 = vrot.slane %v2595_v11, 4 }
 0x2b3   : > { %v3209_v18 = vpop.permute.xlu1 %3208  ;;  %v2333_v13 = vld [vmem:[#allocation2 + $0xac] sm:$0xf]  ;;  %v2570_v58 = vsel %vm6170_vm11, %v2565_v44, %v7437_v57  ;;  %v1455_v51 = vrot.slane %v1453_v5, 4  ;;  %v7515_v8 = vld [vmem:[#allocation2 + $0x70] sm:$0xf]  ;;  %v2673_v15 = vshll.u32 %v2334_v27, 16 }
 0x2b4   : > { %3295 = vst.msk [vmem:[#allocation3 + $0x70] sm:$0xf] %vm2067_vm2, %v3209_v18  ;;  %v2663_v41 = vshll.u32 %v2333_v13, 16  ;;  %v2667_v56 = vshrl.u32 %v2333_v13, 16  ;;  %v1459_v50 = vshll.u32 %v1222_v35, 16  ;;  %v7523_v57 = vrot.slane %v3538_v22, 5 }
 0x2b5   : > { %3027 = vrot.lane.b32.xlu2 %v2940_v59, %s6017_s26  ;;  %8427 = vst [vmem:[#allocation14_spill] sm:$0xff] %v7517_v46  ;;  %v3712_v42 = vshll.u32 %v3361_v31, 16  ;;  %v2601_v7 = vshll.u32 %v2325_v10, 16  ;;  %v3716_v47 = vshrl.u32 %v3361_v31, 16  ;;  %v1464_v11 = vshrl.u32 %v7500_v2, 16 }
 0x2b6   : > { %2023 = vrot.lane.b32.xlu0 %v1953_v30, %s6016_s23  ;;  %v7526_v5 = vrot.slane %v2663_v41, 5  ;;  %v2669_v59 = vrot.slane %v2667_v56, 4  ;;  %2775 = vst.msk [vmem:[#allocation3 + $0xdc] sm:$0xf] %vm280_vm0, %v2570_v58  ;;  %v2116_v30 = vld [vmem:[#allocation2 + $0x6c] sm:$0xf]  ;;  %v2598_v22 = vor.u32 %v2597_v4, %v7513_v28  ;;  %v1456_v10 = vor.u32 %v1455_v51, %v7459_v21 }
 0x2b7   : > { %v3020_v12 = vpop.permute.xlu2 %3019  ;;  %v1467_v13 = vshll.u32 %v7500_v2, 16  ;;  %v2323_v35 = vld [vmem:[#allocation2 + $0x84] sm:$0xf]  ;;  %v2127_v31 = vld [vmem:[#allocation2 + $0xac] sm:$0xf]  ;;  %v1461_v2 = vrot.slane %v1459_v50, 5 }
 0x2b8   : > { %3104 = vst.msk [vmem:[#allocation3 + $0x88] sm:$0xf] %vm1727_vm15, %v3020_v12  ;;  %v7520_v18 = vpop.permute.xlu0 %3222  ;;  %v4665_v12 = vpop.f32.mrf.mxu1  ;;  %v3362_v41 = vld [vmem:[#allocation2 + $0xc8] sm:$0x1]  ;;  %v2670_v56 = vor.u32 %v2669_v59, %v7526_v5  ;;  %v2582_v58 = vshrl.u32 %v2323_v35, 16  ;;  %v2585_v19 = vshll.u32 %v2323_v35, 16 }
 0x2b9   : > { %2005 = vrot.lane.b32.xlu1 %v1921_v34, %s6016_s23  ;;  %v2675_v34 = vrot.slane %v2673_v15, 5  ;;  %v1155_v55 = vld [vmem:[#allocation2 + $0x88] sm:$0xf]  ;;  %v7537_v15 = vrot.slane %v3712_v42, 5  ;;  %v2599_v4 = vrot.slane %v2598_v22, 4  ;;  %v2603_v27 = vrot.slane %v2601_v7, 5 }
 0x2ba   : > { %v3718_v39 = vrot.slane %v3716_v47, 4  ;;  %v2671_v46 = vrot.slane %v2670_v56, 4  ;;  %v2584_v21 = vrot.slane %v2582_v58, 4  ;;  %v2587_v51 = vrot.slane %v2585_v19, 5  ;;  %v1154_v62 = vld [vmem:[#allocation2 + $0x84] sm:$0xf] }
 0x2bb   : > { %v3018_v44 = vpop.permute.xlu1 %3017  ;;  %v4666_v59 = vadd.f32 %v7316_v33, %v4665_v12  ;;  %v2332_v35 = vld [vmem:[#allocation2 + $0xa8] sm:$0xf]  ;;  %1187 = vst.msk [vmem:[#allocation3 + $0x114] sm:$0xf] %vm280_vm0, %v1155_v55  ;;  %v2327_v50 = vld [vmem:[#allocation2 + $0x94] sm:$0xf] }
 0x2bc   : > { %3103 = vst.msk [vmem:[#allocation3 + $0x7c] sm:$0xf] %vm1727_vm15, %v3018_v44  ;;  %v3141_v44 = vld [vmem:[#allocation2 + $0x70] sm:$0xf]  ;;  %v1457_v7 = vrot.slane %v1456_v10, 4  ;;  %v2676_v47 = vsel %vm6170_vm11, %v2671_v46, %v2675_v34  ;;  %v2657_v22 = vshll.u32 %v2332_v35, 16  ;;  %v2588_v55 = vor.u32 %v2587_v51, %v2584_v21 }
 0x2bd   : > { %3296 = vst.msk [vmem:[#allocation3 + $0x7c] sm:$0xf] %vm2067_vm2, %v7179_v32  ;;  %2196 = vrot.lane.b32.xlu2 %v2116_v30, %s6018_s30  ;;  %v2604_v32 = vsel %vm6170_vm11, %v2599_v4, %v2603_v27  ;;  %v2654_v30 = vshrl.u32 %v2332_v35, 16  ;;  %v3722_v12 = vshll.u32 %v3362_v41, 16  ;;  %v2615_v27 = vshll.u32 %v2327_v50, 16 }
 0x2be   : > { %2218 = vrot.lane.b32.xlu0 %v2127_v31, %s6018_s30  ;;  %2778 = vst.msk [vmem:[#allocation3 + $0x100] sm:$0xf] %vm280_vm0, %v2604_v32  ;;  %v7551_v31 = vrot.slane %v1464_v11, 4  ;;  %v2659_v46 = vrot.slane %v2657_v22, 5  ;;  %v2326_v34 = vld [vmem:[#allocation2 + $0x90] sm:$0xf]  ;;  %v3719_v4 = vor.u32 %v3718_v39, %v7537_v15  ;;  %v1462_v11 = vsel %vm6170_vm11, %v1457_v7, %v1461_v2 }
 0x2bf   : > { %v2189_v42 = vpop.permute.xlu2 %2188  ;;  %2784 = vst.msk [vmem:[#allocation3 + $0x148] sm:$0xf] %vm280_vm0, %v2676_v47  ;;  %v2656_v56 = vrot.slane %v2654_v30, 4  ;;  %v1469_v35 = vrot.slane %v1467_v13, 5  ;;  %v7558_v32 = vrot.slane %v2615_v27, 5  ;;  %v2619_v41 = vshrl.u32 %v2327_v50, 16 }
 0x2c0   : > { %v7548_v19 = vpop.permute.xlu0 %3780  ;;  %v4754_v33 = vpop.f32.mrf.mxu2  ;;  %1186 = vst.msk [vmem:[#allocation3 + $0x108] sm:$0xf] %vm280_vm0, %v1154_v62  ;;  %v2328_v51 = vld [vmem:[#allocation2 + $0x98] sm:$0x1]  ;;  %v3724_v62 = vrot.slane %v3722_v12, 5  ;;  %v2606_v30 = vshrl.u32 %v2326_v34, 16  ;;  %v3541_v50 = vor.u32 %v7523_v57, %v7498_v49 }
 0x2c1   : > { %3220 = vrot.lane.b32.xlu1 %v3141_v44, %s6016_s23  ;;  %v7554_v10 = vadd.f32 %v4754_v33, %v4666_v59  ;;  %v3154_v44 = vld [vmem:[#allocation2 + $0xc0] sm:$0xf]  ;;  %v2660_v21 = vor.u32 %v2659_v46, %v2656_v56  ;;  %v2589_v59 = vrot.slane %v2588_v55, 4  ;;  %v2621_v47 = vrot.slane %v2619_v41, 4  ;;  %v2312_v12 = vld [vmem:[#allocation2 + $0x58] sm:$0xf] }
 0x2c2   : > { %v8428_v39 = vrot.slane %v7478_v3, 5  ;;  %v8429_v13 = vrot.slane %v7465_v38, 9  ;;  %v2609_v22 = vshll.u32 %v2326_v34, 16  ;;  %v3720_v33 = vrot.slane %v3719_v4, 4  ;;  %v2313_v55 = vld [vmem:[#allocation2 + $0x5c] sm:$0x1] }
 0x2c3   : > { %v1656_v58 = vpop.permute.xlu1 %1655  ;;  %v2661_v7 = vrot.slane %v2660_v21, 4  ;;  %v2594_v38 = vsel %vm6170_vm11, %v2589_v59, %v7513_v28  ;;  %v2622_v27 = vor.u32 %v2621_v47, %v7558_v32  ;;  %v2495_v57 = vshll.u32 %v2312_v12, 16 }
 0x2c4   : > { %1740 = vst.msk [vmem:[#allocation3 + $0x90] sm:$0xf] %vm1727_vm15, %v1656_v58  ;;  %v2944_v2 = vsel %vm6150_vm6, %v8429_v13, %v8428_v39  ;;  %v2499_v46 = vshrl.u32 %v2312_v12, 16  ;;  %v2505_v34 = vshll.u32 %v2313_v55, 16  ;;  %v1470_v58 = vor.u32 %v1469_v35, %v7551_v31 }
 0x2c5   : > { %2080 = vst.msk [vmem:[#allocation3 + $0x90] sm:$0xf] %vm2067_vm2, %v7155_v52  ;;  %1665 = vrot.lane.b32.xlu2 %v1462_v11, %s6017_s26  ;;  %v343_v52 = vld [vmem:[#allocation2 + $0xcc] sm:$0x1]  ;;  %v2666_v49 = vsel %vm6170_vm11, %v2661_v7, %v7526_v5  ;;  %v2625_v28 = vshll.u32 %v2328_v51, 16  ;;  %v7591_v4 = vrot.slane %v2495_v57, 5  ;;  %v3725_v31 = vsel %vm6170_vm11, %v3720_v33, %v3724_v62 }
 0x2c6   : > { %2273 = vst.msk [vmem:[#allocation3 + $0x90] sm:$0xf] %vm2260_vm3, %v2189_v42  ;;  %3246 = vrot.lane.b32.xlu0 %v3154_v44, %s6016_s23  ;;  %v344_v42 = vsel %vm6145_vm5, 0, %v343_v52  ;;  %v2501_v41 = vrot.slane %v2499_v46, 4  ;;  %v2608_v11 = vrot.slane %v2606_v30, 4  ;;  %v2611_v5 = vrot.slane %v2609_v22, 5 }
 0x2c7   : > { %v1658_v56 = vpop.permute.xlu2 %1657  ;;  %345 = vst [vmem:[#allocation2 + $0xcc] sm:$0x1] %v344_v42  ;;  %v3542_v21 = vrot.slane %v3541_v50, 4  ;;  %v8430_v59 = vshll.u32 %v7515_v8, 16  ;;  %v2507_v51 = vrot.slane %v2505_v34, 5  ;;  %v2623_v39 = vrot.slane %v2622_v27, 4 }
 0x2c8   : > { %1741 = vst.msk [vmem:[#allocation3 + $0x9c] sm:$0xf] %vm1727_vm15, %v1658_v56  ;;  %v7586_v6 = vpop.permute.xlu0 %2202  ;;  %v2502_v35 = vor.u32 %v2501_v41, %v7591_v4  ;;  %v1471_v13 = vrot.slane %v1470_v58, 4  ;;  %v1802_v50 = vld [vmem:[#allocation2 + $0xa8] sm:$0xe]  ;;  %v2627_v22 = vrot.slane %v2625_v28, 5  ;;  %v2612_v62 = vor.u32 %v2611_v5, %v2608_v11 }
 0x2c9   : > { %3029 = vrot.lane.b32.xlu1 %v2944_v2, %s6017_s26  ;;  %2783 = vst.msk [vmem:[#allocation3 + $0x13c] sm:$0xf] %vm280_vm0, %v2666_v49  ;;  %v7595_v47 = vrot.slane %v8430_v59, 5  ;;  %v3547_v30 = vsel %vm6170_vm11, %v3542_v21, %v7127_v61  ;;  %v2815_v2 = vld [vmem:[#allocation2 + $0x74] sm:$0x1]  ;;  %v1477_v12 = vshrl.u32 %v7515_v8, 16 }
 0x2ca   : > { %2777 = vst.msk [vmem:[#allocation3 + $0xf4] sm:$0xf] %vm280_vm0, %v2594_v38  ;;  %v2503_v7 = vrot.slane %v2502_v35, 4  ;;  %v399_v52 = vld [vmem:[#allocation2 + $0xd4] sm:$0x1]  ;;  %v2628_v38 = vsel %vm6170_vm11, %v2623_v39, %v2627_v22  ;;  %v8431_v17 = vrot.slane %v7478_v3, 5 }
 0x2cb   : > { %v1998_v44 = vpop.permute.xlu1 %1997  ;;  %v7609_v33 = vld [vmem:[#allocation2 + $0xac] sm:$0xf]  ;;  %v1476_v61 = vsel %vm6170_vm11, %v1471_v13, %v7595_v47  ;;  %v2946_v49 = vrot.slane %v2815_v2, 5  ;;  %v5494_v57 = vrot.slane %v1802_v50, 9  ;;  %v1789_v46 = vld [vmem:[#allocation2 + $0x74] sm:$0x1] }
 0x2cc   : > { %2081 = vst.msk [vmem:[#allocation3 + $0x9c] sm:$0xf] %vm2067_vm2, %v1998_v44  ;;  %v2508_v55 = vsel %vm6170_vm11, %v2503_v7, %v2507_v51  ;;  %v2945_v56 = vrot.slane %v8431_v17, 4  ;;  %v8432_v8 = vrot.slane %v7076_v60, 5  ;;  %v1959_v58 = vrot.slane %v7609_v33, 5 }
 0x2cd   : > { %2274 = vst.msk [vmem:[#allocation3 + $0x9c] sm:$0xf] %vm2260_vm3, %v7199_v1  ;;  %3778 = vrot.lane.b32.xlu2 %v3547_v30, %s6018_s30  ;;  %v400_v1 = vsel %vm6164_vm8, 0, %v399_v52  ;;  %v5602_v28 = vld [vmem:[#allocation3 + $0x90] sm:$0xf]  ;;  %v2613_v41 = vrot.slane %v2612_v62, 4 }
 0x2ce   : > { %3808 = vrot.lane.b32.xlu0 %v3725_v31, %s6018_s30  ;;  %401 = vst [vmem:[#allocation2 + $0xd4] sm:$0x1] %v400_v1  ;;  %v1926_v34 = vrot.slane %v8432_v8, 4  ;;  %v2311_v5 = vld [vmem:[#allocation2 + $0x54] sm:$0xf]  ;;  %v2947_v35 = vsel %vm6150_vm6, %v2945_v56, %v2946_v49  ;;  %v1960_v13 = vsel %vm6150_vm6, %v5494_v57, %v1959_v58  ;;  %v1927_v2 = vrot.slane %v1789_v46, 5 }
 0x2cf   : > { %v3799_v42 = vpop.permute.xlu2 %3798  ;;  %2770 = vst.msk [vmem:[#allocation3 + $0xa0] sm:$0xf] %vm280_vm0, %v2508_v55  ;;  %v1159_v44 = vld [vmem:[#allocation2 + $0xa0] sm:$0xf]  ;;  %v2486_v21 = vshrl.u32 %v2311_v5, 16  ;;  %v2489_v59 = vshll.u32 %v2311_v5, 16  ;;  %v2618_v60 = vsel %vm6170_vm11, %v2613_v41, %v7558_v32 }
 0x2d0   : > { %3870 = vst.msk [vmem:[#allocation3 + $0x124] sm:$0xf] %vm2260_vm3, %v3799_v42  ;;  %v7622_v27 = vpop.permute.xlu0 %2011  ;;  %v3880_v31 = vld [vmem:[#allocation2 + $0x20] sm:$0x1]  ;;  %v1156_v39 = vld [vmem:[#allocation2 + $0x90] sm:$0xf]  ;;  %v1928_v22 = vsel %vm6150_vm6, %v1926_v34, %v1927_v2 }
 0x2d1   : > { %1667 = vrot.lane.b32.xlu1 %v1476_v61, %s6017_s26  ;;  %2780 = vst.msk [vmem:[#allocation3 + $0x118] sm:$0xf] %vm280_vm0, %v2628_v38  ;;  %v7640_v30 = vld [vmem:[#allocation2 + $0x28] sm:$0xf]  ;;  %v2488_v32 = vrot.slane %v2486_v21, 4  ;;  %v2491_v50 = vrot.slane %v2489_v59, 5 }
 0x2d2   : > { %1191 = vst.msk [vmem:[#allocation3 + $0x144] sm:$0xf] %vm280_vm0, %v1159_v44  ;;  %v1157_v7 = vld [vmem:[#allocation2 + $0x94] sm:$0xf]  ;;  %v1479_v62 = vrot.slane %v1477_v12, 4  ;;  %v3979_v61 = vrot.slane %v3880_v31, 5 }
 0x2d3   : > { %v3241_v11 = vpop.permute.xlu1 %3240  ;;  %2779 = vst.msk [vmem:[#allocation3 + $0x10c] sm:$0xf] %vm280_vm0, %v2618_v60  ;;  %v3364_v1 = vld [vmem:[#allocation2 + $0xd0] sm:$0xf]  ;;  %v2492_v42 = vor.u32 %v2491_v50, %v2488_v32  ;;  %v8433_v38 = vrot.slane %v7101_v54, 5  ;;  %v3983_v12 = vrot.slane %v7640_v30, 5 }
 0x2d4   : > { %3311 = vst.msk [vmem:[#allocation3 + $0x130] sm:$0xf] %vm2067_vm2, %v3241_v11  ;;  %v5887_v3 = vld [vmem:[#allocation3 + $0x98] sm:$0xf0]  ;;  %v3342_v56 = vld [vmem:[#allocation2 + $0x78] sm:$0xf]  ;;  %v1480_v11 = vor.u32 %v1479_v62, %v7595_v47 }
 0x2d5   : > { %3871 = vst.msk [vmem:[#allocation3 + $0x130] sm:$0xf] %vm2260_vm3, %v7242_v53  ;;  %v5603_v51 = vor.u32 %v5887_v3, %v5602_v28  ;;  %3031 = vrot.lane.b32.xlu2 %v2947_v35, %s6017_s26  ;;  %v1225_v53 = vld [vmem:[#allocation2 + $0x74] sm:$0x1]  ;;  %v3978_v17 = vrot.slane %v8433_v38, 4  ;;  %v2493_v49 = vrot.slane %v2492_v42, 4 }
 0x2d6   : > { %2027 = vrot.lane.b32.xlu0 %v1960_v13, %s6016_s23  ;;  %1188 = vst.msk [vmem:[#allocation3 + $0x120] sm:$0xf] %vm280_vm0, %v1156_v39  ;;  %v2118_v46 = vld [vmem:[#allocation2 + $0x78] sm:$0xf]  ;;  %v1483_v8 = vshll.u32 %v1225_v53, 16  ;;  %v3736_v34 = vshll.u32 %v3364_v1, 16 }
 0x2d7   : > { %4689 = vmatmul.bf16.gmra.mxu1 %v5603_v51  ;;  %v3052_v52 = vpop.permute.xlu2 %3051  ;;  %1189 = vst.msk [vmem:[#allocation3 + $0x12c] sm:$0xf] %vm280_vm0, %v1157_v7  ;;  %v3740_v28 = vshrl.u32 %v3364_v1, 16  ;;  %v1147_v41 = vld [vmem:[#allocation2 + $0x58] sm:$0xf]  ;;  %v2498_v54 = vsel %vm6170_vm11, %v2493_v49, %v7591_v4  ;;  %v3980_v47 = vsel %vm6150_vm6, %v3978_v17, %v3979_v61  ;;  %v3559_v35 = vshrl.u32 %v3342_v56, 16 }
 0x2d8   : > { %3120 = vst.msk [vmem:[#allocation3 + $0x148] sm:$0xf] %vm1727_vm15, %v3052_v52  ;;  %v7654_v55 = vpop.permute.xlu0 %3226  ;;  %v1226_v5 = vld [vmem:[#allocation2 + $0x78] sm:$0xf]  ;;  %v1146_v44 = vld [vmem:[#allocation2 + $0x54] sm:$0xf] }
 0x2d9   : > { %2009 = vrot.lane.b32.xlu1 %v1928_v22, %s6016_s23  ;;  %v3881_v3 = vld [vmem:[#allocation2 + $0x24] sm:$0xe]  ;;  %v7666_v21 = vld [vmem:[#allocation2 + $0x7c] sm:$0xf]  ;;  %2769 = vst.msk [vmem:[#allocation3 + $0x94] sm:$0xf] %vm280_vm0, %v2498_v54 }
 0x2da   : > { %v1158_v59 = vld [vmem:[#allocation2 + $0x9c] sm:$0xf]  ;;  %v2129_v60 = vld [vmem:[#allocation2 + $0xb8] sm:$0xf]  ;;  %1179 = vst.msk [vmem:[#allocation3 + $0xb4] sm:$0xf] %vm280_vm0, %v1147_v41 }
 0x2db   : > { %v3769_v57 = vpop.permute.xlu1 %3768  ;;  %v3143_v31 = vld [vmem:[#allocation2 + $0x7c] sm:$0xf]  ;;  %v3562_v4 = vshll.u32 %v3342_v56, 16  ;;  %v7674_v51 = vrot.slane %v3736_v34, 5  ;;  %v3742_v39 = vrot.slane %v3740_v28, 4  ;;  %v1481_v13 = vrot.slane %v1480_v11, 4 }
 0x2dc   : > { %3855 = vst.msk [vmem:[#allocation3 + $0x70] sm:$0xf] %vm2260_vm3, %v3769_v57  ;;  %v1485_v2 = vrot.slane %v1483_v8, 5  ;;  %v2950_v32 = vrot.slane %v7666_v21, 5  ;;  %v1488_v50 = vshrl.u32 %v1226_v5, 16  ;;  %v1491_v62 = vshll.u32 %v1226_v5, 16 }
 0x2dd   : > { %2200 = vrot.lane.b32.xlu2 %v2118_v46, %s6018_s30  ;;  %1178 = vst.msk [vmem:[#allocation3 + $0xa8] sm:$0xf] %vm280_vm0, %v1146_v44  ;;  %v2816_v7 = vld [vmem:[#allocation2 + $0x78] sm:$0xe]  ;;  %v3365_v52 = vld [vmem:[#allocation2 + $0xd4] sm:$0x1]  ;;  %v3743_v46 = vor.u32 %v3742_v39, %v7674_v51  ;;  %v7709_v39 = vpop.f32.mrf.mxu1 }
 0x2de   : > { %2222 = vrot.lane.b32.xlu0 %v2129_v60, %s6018_s30  ;;  %1190 = vst.msk [vmem:[#allocation3 + $0x138] sm:$0xf] %vm280_vm0, %v1158_v59  ;;  %v3883_v22 = vld [vmem:[#allocation2 + $0x2c] sm:$0x1]  ;;  %v5513_v1 = vrot.slane %v3881_v3, 9  ;;  %v3985_v42 = vrot.slane %v3983_v12, 4  ;;  %v1486_v5 = vsel %vm6170_vm11, %v1481_v13, %v1485_v2 }
 0x2df   : > { %v3771_v30 = vpop.permute.xlu2 %3770  ;;  %4119 = vst.msk [vmem:[#allocation3 + $0x14] sm:$0xf] %vm280_vm0, %v3980_v47  ;;  %v3986_v61 = vrot.slane %v3883_v22, 5  ;;  %v5880_v17 = vld [vmem:[#allocation3 + $0x64] sm:$0xf]  ;;  %v3561_v49 = vrot.slane %v3559_v35, 4  ;;  %v7721_v22 = vpop.f32.mrf.mxu2 }
 0x2e0   : > { %3856 = vst.msk [vmem:[#allocation3 + $0x7c] sm:$0xf] %vm2260_vm3, %v3771_v30  ;;  %v7680_v53 = vpop.permute.xlu0 %3784  ;;  %v3564_v57 = vrot.slane %v3562_v4, 5  ;;  %v3156_v34 = vld [vmem:[#allocation2 + $0xcc] sm:$0xf]  ;;  %v3746_v28 = vshll.u32 %v3365_v52, 16  ;;  %v3984_v41 = vsel %vm6150_vm6, %v5513_v1, %v3983_v12 }
 0x2e1   : > { %3224 = vrot.lane.b32.xlu1 %v3143_v31, %s6016_s23  ;;  %v3987_v11 = vsel %vm6150_vm6, %v3985_v42, %v3986_v61  ;;  %v7694_v54 = vld [vmem:[#allocation2 + $0x7c] sm:$0xf]  ;;  %v5505_v44 = vrot.slane %v2816_v7, 9  ;;  %v1490_v3 = vrot.slane %v1488_v50, 4  ;;  %v1493_v59 = vrot.slane %v1491_v62, 5 }
 0x2e2   : > { %4120 = vst.msk [vmem:[#allocation3 + $0x20] sm:$0xf] %vm280_vm0, %v3984_v41  ;;  %v3565_v12 = vor.u32 %v3564_v57, %v3561_v49  ;;  %v3744_v31 = vrot.slane %v3743_v46, 4  ;;  %v3748_v47 = vrot.slane %v3746_v28, 5  ;;  %v1497_v35 = vshll.u32 %v7694_v54, 16 }
 0x2e3   : > { %v3050_v38 = vpop.permute.xlu1 %3049  ;;  %v5580_v56 = vld [vmem:[#allocation3 + $0x6c] sm:$0xf0]  ;;  %4121 = vst.msk [vmem:[#allocation3 + $0x2c] sm:$0xf] %vm280_vm0, %v3987_v11  ;;  %v1494_v30 = vor.u32 %v1493_v59, %v1490_v3  ;;  %v1805_v1 = vld [vmem:[#allocation2 + $0xb4] sm:$0xe] }
 0x2e4   : > { %3119 = vst.msk [vmem:[#allocation3 + $0x13c] sm:$0xf] %vm1727_vm15, %v3050_v38  ;;  %v5583_v8 = vor.u32 %v5880_v17, %v5580_v56  ;;  %v3566_v2 = vrot.slane %v3565_v12, 4  ;;  %v3749_v50 = vsel %vm6170_vm11, %v3744_v31, %v3748_v47  ;;  %v7714_v7 = vrot.slane %v1497_v35, 5  ;;  %v7725_v42 = vld [vmem:[#allocation2 + $0xb8] sm:$0xf] }
 0x2e5   : > { %3312 = vst.msk [vmem:[#allocation3 + $0x13c] sm:$0xf] %vm2067_vm2, %v7219_v45  ;;  %1669 = vrot.lane.b32.xlu2 %v1486_v5, %s6017_s26  ;;  %v2951_v45 = vsel %vm6150_vm6, %v5505_v44, %v2950_v32  ;;  %v1495_v62 = vrot.slane %v1494_v30, 4  ;;  %v2315_v61 = vld [vmem:[#allocation2 + $0x64] sm:$0xf]  ;;  %v5495_v28 = vrot.slane %v1805_v1, 9 }
 0x2e6   : > { %4768 = vmatmul.bf16.gmra.mxu2 %v5583_v8  ;;  %3250 = vrot.lane.b32.xlu0 %v3156_v34, %s6016_s23  ;;  %v3571_v52 = vsel %vm6170_vm11, %v3566_v2, %v7222_v63  ;;  %v2316_v38 = vld [vmem:[#allocation2 + $0x68] sm:$0x1]  ;;  %v2818_v56 = vld [vmem:[#allocation2 + $0x80] sm:$0x1]  ;;  %v2519_v49 = vshll.u32 %v2315_v61, 16  ;;  %v2523_v63 = vshrl.u32 %v2315_v61, 16  ;;  %v4670_v34 = vpop.f32.mrf.mxu1 }
 0x2e7   : > { %v3024_v60 = vpop.permute.xlu2 %3023  ;;  %v2529_v57 = vshll.u32 %v2316_v38, 16  ;;  %v2952_v8 = vrot.slane %v2950_v32, 4  ;;  %v8401_v41 = vrot.slane %v7725_v42, 5  ;;  %v2953_v3 = vrot.slane %v2818_v56, 5  ;;  %v5883_v59 = vld [vmem:[#allocation3 + $0x7c] sm:$0xf] }
 0x2e8   : > { %3106 = vst.msk [vmem:[#allocation3 + $0xa0] sm:$0xf] %vm1727_vm15, %v3024_v60  ;;  %v7706_v4 = vpop.permute.xlu0 %2206  ;;  %v7736_v11 = vrot.slane %v2519_v49, 5  ;;  %v2525_v5 = vrot.slane %v2523_v63, 4  ;;  %v1792_v12 = vld [vmem:[#allocation2 + $0x80] sm:$0x1] }
 0x2e9   : > { %3033 = vrot.lane.b32.xlu1 %v2951_v45, %s6017_s26  ;;  %v8434_v45 = vrot.slane %v7193_v26, 5  ;;  %v2531_v32 = vrot.slane %v2529_v57, 5  ;;  %v7745_v47 = vld [vmem:[%s8388_s4] ss:$0 sm:$0xff]  ;;  %v1501_v30 = vshrl.u32 %v7694_v54, 16 }
 0x2ea   : > { %v2526_v21 = vor.u32 %v2525_v5, %v7736_v11  ;;  %v4671_v35 = vadd.f32 %v7745_v47, %v4670_v34  ;;  %v2120_v49 = vld [vmem:[#allocation2 + $0x84] sm:$0xf]  ;;  %v1228_v63 = vld [vmem:[#allocation2 + $0x80] sm:$0x1]  ;;  %v3363_v33 = vld [vmem:[#allocation2 + $0xcc] sm:$0xf] }
 0x2eb   : > { %v3213_v13 = vpop.permute.xlu1 %3212  ;;  %v1933_v31 = vrot.slane %v8434_v45, 4  ;;  %v2314_v57 = vld [vmem:[#allocation2 + $0x60] sm:$0xf]  ;;  %v3921_v5 = vld [vmem:[#allocation2 + $0xc4] sm:$0xf] }
 0x2ec   : > { %3297 = vst.msk [vmem:[#allocation3 + $0x88] sm:$0xf] %vm2067_vm2, %v3213_v13  ;;  %v2954_v13 = vsel %vm6150_vm6, %v2952_v8, %v2953_v3  ;;  %v3345_v8 = vld [vmem:[#allocation2 + $0x84] sm:$0xf]  ;;  %v2510_v34 = vshrl.u32 %v2314_v57, 16 }
 0x2ed   : > { %3857 = vst.msk [vmem:[#allocation3 + $0x88] sm:$0xf] %vm2260_vm3, %v7292_v23  ;;  %3782 = vrot.lane.b32.xlu2 %v3571_v52, %s6018_s30  ;;  %v1500_v23 = vsel %vm6170_vm11, %v1495_v62, %v7714_v7  ;;  %v1934_v52 = vrot.slane %v1792_v12, 5  ;;  %v2527_v62 = vrot.slane %v2526_v21, 4  ;;  %v2819_v3 = vld [vmem:[#allocation2 + $0x84] sm:$0xe] }
 0x2ee   : > { %3812 = vrot.lane.b32.xlu0 %v3749_v50, %s6018_s30  ;;  %v1967_v50 = vsel %vm6150_vm6, %v5495_v28, %v8401_v41  ;;  %v2513_v28 = vshll.u32 %v2314_v57, 16  ;;  %v2512_v12 = vrot.slane %v2510_v34, 4  ;;  %v2131_v45 = vld [vmem:[#allocation2 + $0xc4] sm:$0xf]  ;;  %v3583_v21 = vshrl.u32 %v3345_v8, 16 }
 0x2ef   : > { %v2193_v17 = vpop.permute.xlu2 %2192  ;;  %v1935_v54 = vsel %vm6150_vm6, %v1933_v31, %v1934_v52  ;;  %v2532_v61 = vsel %vm6170_vm11, %v2527_v62, %v2531_v32  ;;  %v1507_v31 = vshll.u32 %v1228_v63, 16  ;;  %v3586_v32 = vshll.u32 %v3345_v8, 16  ;;  %v7786_v57 = vld [vmem:[#allocation2 + $0x88] sm:$0xf]  ;;  %v1148_v34 = vld [vmem:[#allocation2 + $0x60] sm:$0xf] }
 0x2f0   : > { %v7730_v46 = vpop.permute.xlu0 %2015  ;;  %2772 = vst.msk [vmem:[#allocation3 + $0xb8] sm:$0xf] %vm280_vm0, %v2532_v61  ;;  %v4074_v52 = vrot.slane %v3921_v5, 5  ;;  %v5506_v62 = vrot.slane %v2819_v3, 9  ;;  %v1161_v3 = vld [vmem:[#allocation2 + $0xac] sm:$0xf] }
 0x2f1   : > { %1671 = vrot.lane.b32.xlu1 %v1500_v23, %s6017_s26  ;;  %v1503_v23 = vrot.slane %v1501_v30, 4  ;;  %v3588_v63 = vrot.slane %v3586_v32, 5  ;;  %1180 = vst.msk [vmem:[#allocation3 + $0xc0] sm:$0xf] %vm280_vm0, %v1148_v34 }
 0x2f2   : > { %1193 = vst.msk [vmem:[#allocation3 + $0x15c] sm:$0xf] %vm280_vm0, %v1161_v3  ;;  %v1795_v3 = vld [vmem:[#allocation2 + $0x8c] sm:$0x1] }
 0x2f3   : > { %v3022_v44 = vpop.permute.xlu1 %3021 }
 0x2f4   : > { %3105 = vst.msk [vmem:[#allocation3 + $0x94] sm:$0xf] %vm1727_vm15, %v3022_v44  ;;  %v5592_v60 = vld [vmem:[#allocation3 + $0x84] sm:$0xf0]  ;;  %v1504_v44 = vor.u32 %v1503_v23, %v7714_v7  ;;  %v1509_v23 = vrot.slane %v1507_v31, 5 }
 0x2f5   : > { %3298 = vst.msk [vmem:[#allocation3 + $0x94] sm:$0xf] %vm2067_vm2, %v7276_v0  ;;  %v5595_v26 = vor.u32 %v5883_v59, %v5592_v60  ;;  %v4759_v2 = vpop.f32.mrf.mxu2  ;;  %3035 = vrot.lane.b32.xlu2 %v2954_v13, %s6017_s26  ;;  %v1229_v59 = vld [vmem:[#allocation2 + $0x84] sm:$0xf]  ;;  %v2515_v60 = vrot.slane %v2513_v28, 5 }
 0x2f6   : > { %v7758_v1 = vadd.f32 %v4759_v2, %v4671_v35  ;;  %2031 = vrot.lane.b32.xlu0 %v1967_v50, %s6016_s23  ;;  %v1149_v35 = vld [vmem:[#allocation2 + $0x64] sm:$0xf]  ;;  %v3145_v13 = vld [vmem:[#allocation2 + $0x88] sm:$0xf]  ;;  %v1512_v2 = vshrl.u32 %v1229_v59, 16  ;;  %v1515_v50 = vshll.u32 %v1229_v59, 16 }
 0x2f7   : > { %4773 = vmatmul.bf16.gmra.mxu2 %v5595_v26  ;;  %v1662_v0 = vpop.permute.xlu2 %1661  ;;  %v2516_v7 = vor.u32 %v2515_v60, %v2512_v12  ;;  %1181 = vst.msk [vmem:[#allocation3 + $0xcc] sm:$0xf] %vm280_vm0, %v1149_v35  ;;  %v1505_v26 = vrot.slane %v1504_v44, 4  ;;  %v3922_v59 = vld [vmem:[#allocation2 + $0xc8] sm:$0x1]  ;;  %v4076_v60 = vrot.slane %v4074_v52, 4 }
 0x2f8   : > { %1743 = vst.msk [vmem:[#allocation3 + $0xb4] sm:$0xf] %vm1727_vm15, %v1662_v0  ;;  %v7766_v38 = vpop.permute.xlu0 %3230  ;;  %v1514_v5 = vrot.slane %v1512_v2, 4  ;;  %v1517_v44 = vrot.slane %v1515_v50, 5  ;;  %v4077_v31 = vrot.slane %v3922_v59, 5 }
 0x2f9   : > { %2013 = vrot.lane.b32.xlu1 %v1935_v54, %s6016_s23  ;;  %v2517_v0 = vrot.slane %v2516_v7, 4  ;;  %v3920_v54 = vld [vmem:[#allocation2 + $0xc0] sm:$0xe]  ;;  %v1510_v28 = vsel %vm6170_vm11, %v1505_v26, %v1509_v23  ;;  %v7811_v7 = vpop.f32.mrf.mxu3 }
 0x2fa   : > { %v5526_v12 = vrot.slane %v3920_v54, 9 }
 0x2fb   : > { %v1660_v56 = vpop.permute.xlu1 %1659  ;;  %v2522_v8 = vsel %vm6170_vm11, %v2517_v0, %v7736_v11  ;;  %v1521_v11 = vshll.u32 %v7786_v57, 16 }
 0x2fc   : > { %1742 = vst.msk [vmem:[#allocation3 + $0xa8] sm:$0xf] %vm1727_vm15, %v1660_v56  ;;  %v4075_v32 = vsel %vm6150_vm6, %v5526_v12, %v4074_v52  ;;  %v8435_v12 = vrot.slane %v7272_v25, 5 }
 0x2fd   : > { %2082 = vst.msk [vmem:[#allocation3 + $0xa8] sm:$0xf] %vm2067_vm2, %v7258_v48  ;;  %2204 = vrot.lane.b32.xlu2 %v2120_v49, %s6018_s30  ;;  %v7777_v48 = vld [vmem:[#allocation2 + $0x88] sm:$0xf]  ;;  %v3585_v49 = vrot.slane %v3583_v21, 4  ;;  %v1523_v50 = vrot.slane %v1521_v11, 5 }
 0x2fe   : > { %2275 = vst.msk [vmem:[#allocation3 + $0xa8] sm:$0xf] %vm2260_vm3, %v2193_v17  ;;  %2226 = vrot.lane.b32.xlu0 %v2131_v45, %s6018_s30  ;;  %v2957_v56 = vrot.slane %v7777_v48, 5  ;;  %v1160_v48 = vld [vmem:[#allocation2 + $0xa8] sm:$0xf]  ;;  %v1525_v11 = vshrl.u32 %v7786_v57, 16 }
 0x2ff   : > { %v3803_v30 = vpop.permute.xlu2 %3802  ;;  %2771 = vst.msk [vmem:[#allocation3 + $0xac] sm:$0xf] %vm280_vm0, %v2522_v8  ;;  %v3589_v45 = vor.u32 %v3588_v63, %v3585_v49  ;;  %v2821_v63 = vld [vmem:[#allocation2 + $0x8c] sm:$0x1] }
 0x300   : > { %3872 = vst.msk [vmem:[#allocation3 + $0x13c] sm:$0xf] %vm2260_vm3, %v3803_v30  ;;  %v7781_v17 = vpop.permute.xlu0 %3788  ;;  %v2958_v21 = vsel %vm6150_vm6, %v5506_v62, %v2957_v56  ;;  %v4078_v30 = vsel %vm6150_vm6, %v4076_v60, %v4077_v31  ;;  %v2959_v34 = vrot.slane %v2957_v56, 4  ;;  %v1940_v60 = vrot.slane %v8435_v12, 4 }
 0x301   : > { %3228 = vrot.lane.b32.xlu1 %v3145_v13, %s6016_s23  ;;  %v1518_v13 = vor.u32 %v1517_v44, %v1514_v5  ;;  %4146 = vst.msk [vmem:[#allocation3 + $0x158] sm:$0xf] %vm280_vm0, %v4075_v32  ;;  %v3590_v2 = vrot.slane %v3589_v45, 4  ;;  %v2960_v44 = vrot.slane %v2821_v63, 5  ;;  %v7829_v45 = vpop.f32.mrf.mxu3  ;;  %v1941_v31 = vrot.slane %v1795_v3, 5 }
 0x302   : > { %4147 = vst.msk [vmem:[#allocation3 + $0x164] sm:$0xf] %vm280_vm0, %v4078_v30  ;;  %v1527_v57 = vrot.slane %v1525_v11, 4  ;;  %v1231_v30 = vld [vmem:[#allocation2 + $0x8c] sm:$0x1] }
 0x303   : > { %v2002_v61 = vpop.permute.xlu1 %2001  ;;  %v3595_v0 = vsel %vm6170_vm11, %v3590_v2, %v7295_v14  ;;  %1192 = vst.msk [vmem:[#allocation3 + $0x150] sm:$0xf] %vm280_vm0, %v1160_v48  ;;  %v2961_v56 = vsel %vm6150_vm6, %v2959_v34, %v2960_v44  ;;  %v1942_v25 = vsel %vm6150_vm6, %v1940_v60, %v1941_v31  ;;  %v2122_v2 = vld [vmem:[#allocation2 + $0x90] sm:$0xf]  ;;  %v3147_v34 = vld [vmem:[#allocation2 + $0x94] sm:$0xf]  ;;  %v7853_v31 = vpop.f32.mrf.mxu1 }
 0x304   : > { %2083 = vst.msk [vmem:[#allocation3 + $0xb4] sm:$0xf] %vm2067_vm2, %v2002_v61  ;;  %v1519_v61 = vrot.slane %v1518_v13, 4  ;;  %v1232_v13 = vld [vmem:[#allocation2 + $0x90] sm:$0xf] }
 0x305   : > { %2276 = vst.msk [vmem:[#allocation3 + $0xb4] sm:$0xf] %vm2260_vm3, %v7310_v37  ;;  %1673 = vrot.lane.b32.xlu2 %v1510_v28, %s6017_s26  ;;  %v5614_v52 = vld [vmem:[#allocation3 + $0xa8] sm:$0xf]  ;;  %v2822_v60 = vld [vmem:[#allocation2 + $0x90] sm:$0xe] }
 0x306   : > { %v1524_v49 = vsel %vm6170_vm11, %v1519_v61, %v1523_v50  ;;  %v1536_v61 = vshrl.u32 %v1232_v13, 16  ;;  %v7850_v11 = vld [vmem:[#allocation2 + $0x94] sm:$0xf] }
 0x307   : > { %v3775_v37 = vpop.permute.xlu2 %3774 }
 0x308   : > { %3858 = vst.msk [vmem:[#allocation3 + $0x94] sm:$0xf] %vm2260_vm3, %v3775_v37  ;;  %v7805_v35 = vpop.permute.xlu0 %2210  ;;  %v5706_v14 = vld [vmem:[#allocation3 + $0x158] sm:$0xf]  ;;  %v1538_v44 = vrot.slane %v1536_v61, 4 }
 0x309   : > { %3037 = vrot.lane.b32.xlu1 %v2958_v21, %s6017_s26  ;;  %v5912_v28 = vld [vmem:[#allocation3 + $0x160] sm:$0xf0] }
 0x30a   : > { %v5707_v59 = vor.u32 %v5912_v28, %v5706_v14  ;;  %v2337_v61 = vld [vmem:[#allocation2 + $0xbc] sm:$0x1] }
 0x30b   : > { %v3245_v26 = vpop.permute.xlu1 %3244 }
 0x30c   : > { %3313 = vst.msk [vmem:[#allocation3 + $0x148] sm:$0xf] %vm2067_vm2, %v3245_v26  ;;  %v5890_v62 = vld [vmem:[#allocation3 + $0xb0] sm:$0xf0]  ;;  %5806 = vmatmul.msk.bf16.gmra.mxu3 %vm4602_vm1, %v5707_v59 }
 0x30d   : > { %v5615_v54 = vor.u32 %v5890_v62, %v5614_v52  ;;  %3786 = vrot.lane.b32.xlu2 %v3595_v0, %s6018_s30  ;;  %v1528_v62 = vor.u32 %v1527_v57, %v1523_v50  ;;  %v5507_v57 = vrot.slane %v2822_v60, 9 }
 0x30f   : > { %4694 = vmatmul.bf16.gmra.mxu1 %v5615_v54  ;;  %v3028_v23 = vpop.permute.xlu2 %3027  ;;  %v5886_v48 = vld [vmem:[#allocation3 + $0x94] sm:$0xf]  ;;  %v1529_v28 = vrot.slane %v1528_v62, 4 }
 0x310   : > { %3108 = vst.msk [vmem:[#allocation3 + $0xb8] sm:$0xf] %vm1727_vm15, %v3028_v23  ;;  %v7823_v8 = vpop.permute.xlu0 %2019  ;;  %v1539_v23 = vshll.u32 %v1232_v13, 16 }
 0x311   : > { %1675 = vrot.lane.b32.xlu1 %v1524_v49, %s6017_s26  ;;  %v1531_v49 = vshll.u32 %v1231_v30, 16 }
 0x312   : > { %v1541_v3 = vrot.slane %v1539_v23, 5  ;;  %v2335_v23 = vld [vmem:[#allocation2 + $0xb4] sm:$0xf] }
 0x313   : > { %v3217_v5 = vpop.permute.xlu1 %3216  ;;  %v1533_v12 = vrot.slane %v1531_v49, 5  ;;  %v2678_v60 = vshrl.u32 %v2335_v23, 16 }
 0x314   : > { %3299 = vst.msk [vmem:[#allocation3 + $0xa0] sm:$0xf] %vm2067_vm2, %v3217_v5  ;;  %v1542_v30 = vor.u32 %v1541_v3, %v1538_v44 }
 0x315   : > { %3859 = vst.msk [vmem:[#allocation3 + $0xa0] sm:$0xf] %vm2260_vm3, %v7400_v20  ;;  %3039 = vrot.lane.b32.xlu2 %v2961_v56, %s6017_s26  ;;  %v3348_v20 = vld [vmem:[#allocation2 + $0x90] sm:$0xf] }
 0x316   : > { %v3607_v0 = vshrl.u32 %v3348_v20, 16  ;;  %v3610_v54 = vshll.u32 %v3348_v20, 16  ;;  %v1545_v20 = vshll.u32 %v7850_v11, 16 }
 0x317   : > { %v2197_v37 = vpop.permute.xlu2 %2196 }
 0x318   : > { %v7840_v21 = vpop.permute.xlu0 %3792  ;;  %v3609_v50 = vrot.slane %v3607_v0, 4  ;;  %v3612_v5 = vrot.slane %v3610_v54, 5  ;;  %v7868_v62 = vrot.slane %v1545_v20, 5  ;;  %v1235_v54 = vld [vmem:[#allocation2 + $0x9c] sm:$0xf] }
 0x319   : > { %2017 = vrot.lane.b32.xlu1 %v1942_v25, %s6016_s23  ;;  %v1534_v25 = vsel %vm6170_vm11, %v1529_v28, %v1533_v12  ;;  %v8436_v28 = vld [vmem:[#allocation8_spill] sm:$0xff]  ;;  %v1560_v3 = vshrl.u32 %v1235_v54, 16  ;;  %v2697_v12 = vshll.u32 %v2337_v61, 16 }
 0x31b   : > { %v3026_v32 = vpop.permute.xlu1 %3025  ;;  %v2699_v61 = vrot.slane %v2697_v12, 5 }
 0x31c   : > { %3107 = vst.msk [vmem:[#allocation3 + $0xac] sm:$0xf] %vm1727_vm15, %v3026_v32  ;;  %v5604_v26 = vld [vmem:[#allocation3 + $0x9c] sm:$0xf0]  ;;  %v3613_v32 = vor.u32 %v3612_v5, %v3609_v50 }
 0x31d   : > { %3300 = vst.msk [vmem:[#allocation3 + $0xac] sm:$0xf] %vm2067_vm2, %v7357_v24  ;;  %v5607_v52 = vor.u32 %v5886_v48, %v5604_v26  ;;  %2208 = vrot.lane.b32.xlu2 %v2122_v2, %s6018_s30  ;;  %v2823_v24 = vld [vmem:[#allocation2 + $0x94] sm:$0xf]  ;;  %v7864_v26 = vpop.f32.mrf.mxu2  ;;  %v2336_v2 = vld [vmem:[#allocation2 + $0xb8] sm:$0xf] }
 0x31e   : > { %v2964_v56 = vrot.slane %v2823_v24, 5  ;;  %v2824_v50 = vld [vmem:[#allocation2 + $0x98] sm:$0x1]  ;;  %v2691_v44 = vshrl.u32 %v2336_v2, 16 }
 0x31f   : > { %4778 = vmatmul.bf16.gmra.mxu2 %v5607_v52  ;;  %v1666_v63 = vpop.permute.xlu2 %1665  ;;  %v1543_v52 = vrot.slane %v1542_v30, 4  ;;  %v2681_v30 = vshll.u32 %v2335_v23, 16 }
 0x320   : > { %1745 = vst.msk [vmem:[#allocation3 + $0xcc] sm:$0xf] %vm1727_vm15, %v1666_v63  ;;  %v3805_v14 = vpop.permute.xlu0 %3804  ;;  %v2965_v48 = vsel %vm6150_vm6, %v5507_v57, %v2964_v56  ;;  %v2687_v63 = vshll.u32 %v2336_v2, 16  ;;  %v1563_v57 = vshll.u32 %v1235_v54, 16 }
 0x321   : > { %3232 = vrot.lane.b32.xlu1 %v3147_v34, %s6016_s23  ;;  %3873 = vst.msk [vmem:[#allocation3 + $0x148] sm:$0xf] %vm2260_vm3, %v3805_v14  ;;  %v1163_v34 = vld [vmem:[#allocation2 + $0xb8] sm:$0xf]  ;;  %v4675_v14 = vpop.f32.mrf.mxu1  ;;  %v2683_v23 = vrot.slane %v2681_v30, 5 }
 0x322   : > { %1195 = vst.msk [vmem:[#allocation3 + $0x174] sm:$0xf] %vm280_vm0, %v1163_v34  ;;  %v4676_v20 = vadd.f32 %v7745_v47, %v4675_v14  ;;  %v2967_v34 = vrot.slane %v2824_v50, 5  ;;  %v8437_v14 = vld [vmem:[#allocation10_spill] sm:$0xff] }
 0x323   : > { %v1664_v59 = vpop.permute.xlu1 %1663 }
 0x324   : > { %1744 = vst.msk [vmem:[#allocation3 + $0xc0] sm:$0xf] %vm1727_vm15, %v1664_v59  ;;  %v2689_v59 = vrot.slane %v2687_v63, 5 }
 0x325   : > { %2084 = vst.msk [vmem:[#allocation3 + $0xc0] sm:$0xf] %vm2067_vm2, %v7336_v36  ;;  %1677 = vrot.lane.b32.xlu2 %v1534_v25, %s6017_s26  ;;  %v1236_v36 = vld [vmem:[#allocation2 + $0xa0] sm:$0xf]  ;;  %v2966_v25 = vrot.slane %v2964_v56, 4 }
 0x326   : > { %2277 = vst.msk [vmem:[#allocation3 + $0xc0] sm:$0xf] %vm2260_vm3, %v2197_v37  ;;  %v3614_v37 = vrot.slane %v3613_v32, 4  ;;  %v1569_v49 = vshll.u32 %v1236_v36, 16  ;;  %v1573_v5 = vshrl.u32 %v1236_v36, 16  ;;  %v2693_v32 = vrot.slane %v2691_v44, 4 }
 0x327   : > { %v3779_v13 = vpop.permute.xlu2 %3778  ;;  %v1237_v36 = vld [vmem:[#allocation2 + $0xa4] sm:$0x1]  ;;  %v1798_v44 = vld [vmem:[#allocation2 + $0x98] sm:$0x1] }
 0x328   : > { %3860 = vst.msk [vmem:[#allocation3 + $0xac] sm:$0xf] %vm2260_vm3, %v3779_v13  ;;  %v3619_v24 = vsel %vm6170_vm11, %v3614_v37, %v8436_v28  ;;  %v1571_v2 = vrot.slane %v1569_v49, 5  ;;  %v2680_v37 = vrot.slane %v2678_v60, 4  ;;  %v1575_v56 = vrot.slane %v1573_v5, 4 }
 0x329   : > { %3041 = vrot.lane.b32.xlu1 %v2965_v48, %s6017_s26  ;;  %v1548_v48 = vsel %vm6170_vm11, %v1543_v52, %v7868_v62  ;;  %v2694_v54 = vor.u32 %v2693_v32, %v2689_v59  ;;  %v8438_v28 = vrot.slane %v8437_v14, 5  ;;  %v1579_v60 = vshll.u32 %v1237_v36, 16 }
 0x32a   : > { %v2968_v5 = vsel %vm6150_vm6, %v2966_v25, %v2967_v34  ;;  %v1576_v30 = vor.u32 %v1575_v56, %v1571_v2 }
 0x32b   : > { %v2006_v0 = vpop.permute.xlu1 %2005  ;;  %v1947_v52 = vrot.slane %v8438_v28, 4  ;;  %v2695_v41 = vrot.slane %v2694_v54, 4  ;;  %v1801_v28 = vld [vmem:[#allocation2 + $0xa4] sm:$0x1] }
 0x32c   : > { %2085 = vst.msk [vmem:[#allocation3 + $0xcc] sm:$0xf] %vm2067_vm2, %v2006_v0 }
 0x32d   : > { %2278 = vst.msk [vmem:[#allocation3 + $0xcc] sm:$0xf] %vm2260_vm3, %v7432_v43  ;;  %3790 = vrot.lane.b32.xlu2 %v3619_v24, %s6018_s30  ;;  %v1162_v43 = vld [vmem:[#allocation2 + $0xb4] sm:$0xf]  ;;  %v1562_v24 = vrot.slane %v1560_v3, 4  ;;  %v2700_v3 = vsel %vm6170_vm11, %v2695_v41, %v2699_v61  ;;  %v1577_v41 = vrot.slane %v1576_v30, 4 }
 0x32e   : > { %1194 = vst.msk [vmem:[#allocation3 + $0x168] sm:$0xf] %vm280_vm0, %v1162_v43  ;;  %v1565_v43 = vrot.slane %v1563_v57, 5  ;;  %v5626_v12 = vld [vmem:[#allocation3 + $0xc0] sm:$0xf]  ;;  %v1948_v57 = vrot.slane %v1798_v44, 5 }
 0x32f   : > { %v3032_v13 = vpop.permute.xlu2 %3031  ;;  %2786 = vst.msk [vmem:[#allocation3 + $0x160] sm:$0xf] %vm280_vm0, %v2700_v3  ;;  %v5889_v54 = vld [vmem:[#allocation3 + $0xac] sm:$0xf]  ;;  %v1234_v3 = vld [vmem:[#allocation2 + $0x98] sm:$0x1] }
 0x330   : > { %3110 = vst.msk [vmem:[#allocation3 + $0xd0] sm:$0xf] %vm1727_vm15, %v3032_v13  ;;  %v2684_v13 = vor.u32 %v2683_v23, %v2680_v37  ;;  %v1581_v37 = vrot.slane %v1579_v60, 5  ;;  %v1955_v60 = vrot.slane %v1801_v28, 5 }
 0x331   : > { %v4764_v0 = vpop.f32.mrf.mxu2  ;;  %1679 = vrot.lane.b32.xlu1 %v1548_v48, %s6017_s26  ;;  %v1566_v48 = vor.u32 %v1565_v43, %v1562_v24  ;;  %v2126_v43 = vld [vmem:[#allocation2 + $0xa8] sm:$0xf] }
 0x332   : > { %v7885_v63 = vadd.f32 %v4764_v0, %v4676_v20  ;;  %v2685_v20 = vrot.slane %v2684_v13, 4  ;;  %v2833_v13 = vld [vmem:[#allocation2 + $0xbc] sm:$0x1] }
 0x333   : > { %v3221_v49 = vpop.permute.xlu1 %3220  ;;  %v1567_v56 = vrot.slane %v1566_v48, 4  ;;  %v1238_v48 = vld [vmem:[#allocation2 + $0xa8] sm:$0xf] }
 0x334   : > { %3301 = vst.msk [vmem:[#allocation3 + $0xb8] sm:$0xf] %vm2067_vm2, %v3221_v49  ;;  %v5893_v32 = vld [vmem:[#allocation3 + $0xc8] sm:$0xf0]  ;;  %v2690_v25 = vsel %vm6170_vm11, %v2685_v20, %v2689_v59  ;;  %v1582_v59 = vsel %vm6170_vm11, %v1577_v41, %v1581_v37  ;;  %v8439_v49 = vrot.slane %v7455_v40, 5  ;;  %v1555_v41 = vshll.u32 %v1234_v3, 16  ;;  %v7945_v3 = vpop.f32.mrf.mxu1 }
 0x335   : > { %3861 = vst.msk [vmem:[#allocation3 + $0xb8] sm:$0xf] %vm2260_vm3, %v7548_v19  ;;  %v5627_v50 = vor.u32 %v5893_v32, %v5626_v12  ;;  %3043 = vrot.lane.b32.xlu2 %v2968_v5, %s6017_s26  ;;  %v1949_v19 = vsel %vm6150_vm6, %v1947_v52, %v1948_v57  ;;  %v1572_v14 = vsel %vm6170_vm11, %v1567_v56, %v1571_v2  ;;  %v2832_v52 = vld [vmem:[#allocation2 + $0xb8] sm:$0xf]  ;;  %v2988_v32 = vrot.slane %v2833_v13, 5 }
 0x336   : > { %2785 = vst.msk [vmem:[#allocation3 + $0x154] sm:$0xf] %vm280_vm0, %v2690_v25  ;;  %v1954_v44 = vrot.slane %v8439_v49, 4  ;;  %v2985_v2 = vrot.slane %v2832_v52, 5  ;;  %v1584_v37 = vshrl.u32 %v1238_v48, 16 }
 0x337   : > { %4699 = vmatmul.bf16.gmra.mxu1 %v5627_v50  ;;  %v2201_v36 = vpop.permute.xlu2 %2200  ;;  %v2831_v50 = vld [vmem:[#allocation2 + $0xb4] sm:$0xe] }
 0x338   : > { %v2987_v40 = vrot.slane %v2985_v2, 4  ;;  %v5510_v20 = vrot.slane %v2831_v50, 9 }
 0x339   : > { %2021 = vrot.lane.b32.xlu1 %v1949_v19, %s6016_s23 }
 0x33a   : > { %v2989_v25 = vsel %vm6150_vm6, %v2987_v40, %v2988_v32  ;;  %v1240_v32 = vld [vmem:[#allocation2 + $0xb0] sm:$0x1] }
 0x33b   : > { %v3030_v0 = vpop.permute.xlu1 %3029 }
 0x33c   : > { %3109 = vst.msk [vmem:[#allocation3 + $0xc4] sm:$0xf] %vm1727_vm15, %v3030_v0  ;;  %v5616_v61 = vld [vmem:[#allocation3 + $0xb4] sm:$0xf0]  ;;  %v1587_v0 = vshll.u32 %v1238_v48, 16 }
 0x33d   : > { %3302 = vst.msk [vmem:[#allocation3 + $0xc4] sm:$0xf] %vm2067_vm2, %v7520_v18  ;;  %v5619_v23 = vor.u32 %v5889_v54, %v5616_v61  ;;  %1685 = vrot.lane.b32.xlu2 %v1582_v59, %s6017_s26  ;;  %v1549_v18 = vshrl.u32 %v7850_v11, 16  ;;  %v1956_v11 = vsel %vm6150_vm6, %v1954_v44, %v1955_v60  ;;  %v2986_v54 = vsel %vm6150_vm6, %v5510_v20, %v2985_v2 }
 0x33e   : > { %v1557_v59 = vrot.slane %v1555_v41, 5  ;;  %v1589_v28 = vrot.slane %v1587_v0, 5  ;;  %v7955_v41 = vpop.f32.mrf.mxu2  ;;  %v1804_v0 = vld [vmem:[#allocation2 + $0xb0] sm:$0x1] }
 0x33f   : > { %4783 = vmatmul.bf16.gmra.mxu2 %v5619_v23  ;;  %v1670_v34 = vpop.permute.xlu2 %1669  ;;  %v1551_v12 = vrot.slane %v1549_v18, 4  ;;  %v1239_v23 = vld [vmem:[#allocation2 + $0xac] sm:$0xf] }
 0x340   : > { %1747 = vst.msk [vmem:[#allocation3 + $0xe4] sm:$0xf] %vm1727_vm15, %v1670_v34  ;;  %v1593_v60 = vshll.u32 %v1239_v23, 16 }
 0x341   : > { %1683 = vrot.lane.b32.xlu1 %v1572_v14, %s6017_s26  ;;  %v1552_v57 = vor.u32 %v1551_v12, %v7868_v62  ;;  %v1586_v14 = vrot.slane %v1584_v37, 4 }
 0x342   : > { %v1595_v12 = vrot.slane %v1593_v60, 5  ;;  %v2836_v60 = vld [vmem:[#allocation2 + $0xc8] sm:$0x1] }
 0x343   : > { %v1668_v24 = vpop.permute.xlu1 %1667  ;;  %v1553_v61 = vrot.slane %v1552_v57, 4  ;;  %v1590_v2 = vor.u32 %v1589_v28, %v1586_v14 }
 0x344   : > { %1746 = vst.msk [vmem:[#allocation3 + $0xd8] sm:$0xf] %vm1727_vm15, %v1668_v24 }
 0x345   : > { %2086 = vst.msk [vmem:[#allocation3 + $0xd8] sm:$0xf] %vm2067_vm2, %v7473_v16  ;;  %2216 = vrot.lane.b32.xlu2 %v2126_v43, %s6018_s30  ;;  %v3360_v16 = vld [vmem:[#allocation2 + $0xc0] sm:$0xf]  ;;  %v1558_v52 = vsel %vm6170_vm11, %v1553_v61, %v1557_v59  ;;  %v1597_v43 = vshrl.u32 %v1239_v23, 16  ;;  %v4680_v61 = vpop.f32.mrf.mxu1 }
 0x346   : > { %2279 = vst.msk [vmem:[#allocation3 + $0xd8] sm:$0xf] %vm2260_vm3, %v2201_v36  ;;  %v3703_v36 = vshrl.u32 %v3360_v16, 16  ;;  %v3706_v19 = vshll.u32 %v3360_v16, 16  ;;  %v1591_v16 = vrot.slane %v1590_v2, 4 }
 0x347   : > { %v3783_v5 = vpop.permute.xlu2 %3782  ;;  %v1599_v40 = vrot.slane %v1597_v43, 4 }
 0x348   : > { %3862 = vst.msk [vmem:[#allocation3 + $0xc4] sm:$0xf] %vm2260_vm3, %v3783_v5  ;;  %v3708_v62 = vrot.slane %v3706_v19, 5  ;;  %v3155_v5 = vld [vmem:[#allocation2 + $0xc4] sm:$0xf]  ;;  %v1596_v19 = vsel %vm6170_vm11, %v1591_v16, %v1595_v12 }
 0x349   : > { %2025 = vrot.lane.b32.xlu1 %v1956_v11, %s6016_s23  ;;  %v1600_v48 = vor.u32 %v1599_v40, %v1595_v12  ;;  %v7981_v40 = vpop.f32.mrf.mxu3 }
 0x34b   : > { %v2010_v30 = vpop.permute.xlu1 %2009 }
 0x34c   : > { %2087 = vst.msk [vmem:[#allocation3 + $0xe4] sm:$0xf] %vm2067_vm2, %v2010_v30 }
 0x34d   : > { %2280 = vst.msk [vmem:[#allocation3 + $0xe4] sm:$0xf] %vm2260_vm3, %v7586_v6  ;;  %3055 = vrot.lane.b32.xlu2 %v2989_v25, %s6017_s26  ;;  %v3705_v6 = vrot.slane %v3703_v36, 4  ;;  %v5638_v24 = vld [vmem:[#allocation3 + $0xd8] sm:$0xf]  ;;  %v1603_v25 = vshll.u32 %v1240_v32, 16 }
 0x34f   : > { %v3036_v56 = vpop.permute.xlu2 %3035  ;;  %v3709_v44 = vor.u32 %v3708_v62, %v3705_v6  ;;  %v1605_v37 = vrot.slane %v1603_v25, 5  ;;  %v4681_v62 = vadd.f32 %v7745_v47, %v4680_v61 }
 0x350   : > { %3112 = vst.msk [vmem:[#allocation3 + $0xe8] sm:$0xf] %vm1727_vm15, %v3036_v56  ;;  %v1961_v56 = vrot.slane %v1959_v58, 4 }
 0x351   : > { %3053 = vrot.lane.b32.xlu1 %v2986_v54, %s6017_s26  ;;  %v3710_v11 = vrot.slane %v3709_v44, 4  ;;  %v1962_v54 = vrot.slane %v1804_v0, 5  ;;  %v2128_v44 = vld [vmem:[#allocation2 + $0xb4] sm:$0xf] }
 0x353   : > { %v3225_v34 = vpop.permute.xlu1 %3224  ;;  %v3715_v20 = vsel %vm6170_vm11, %v3710_v11, %v7537_v15  ;;  %v1963_v23 = vsel %vm6150_vm6, %v1961_v56, %v1962_v54 }
 0x354   : > { %3303 = vst.msk [vmem:[#allocation3 + $0xd0] sm:$0xf] %vm2067_vm2, %v3225_v34  ;;  %v5896_v18 = vld [vmem:[#allocation3 + $0xe0] sm:$0xf0]  ;;  %v2835_v34 = vld [vmem:[#allocation2 + $0xc4] sm:$0xf] }
 0x355   : > { %3863 = vst.msk [vmem:[#allocation3 + $0xd0] sm:$0xf] %vm2260_vm3, %v7680_v53  ;;  %v5639_v49 = vor.u32 %v5896_v18, %v5638_v24  ;;  %1681 = vrot.lane.b32.xlu2 %v1558_v52, %s6017_s26  ;;  %v5892_v53 = vld [vmem:[#allocation3 + $0xc4] sm:$0xf]  ;;  %v3727_v52 = vshrl.u32 %v3363_v33, 16  ;;  %v3730_v24 = vshll.u32 %v3363_v33, 16 }
 0x356   : > { %v2992_v18 = vrot.slane %v2835_v34, 5 }
 0x357   : > { %4704 = vmatmul.bf16.gmra.mxu1 %v5639_v49  ;;  %v2205_v13 = vpop.permute.xlu2 %2204  ;;  %v1241_v49 = vld [vmem:[#allocation2 + $0xb4] sm:$0xf]  ;;  %v3729_v43 = vrot.slane %v3727_v52, 4  ;;  %v3732_v2 = vrot.slane %v3730_v24, 5 }
 0x358   : > { %v2994_v32 = vrot.slane %v2992_v18, 4 }
 0x359   : > { %3248 = vrot.lane.b32.xlu1 %v3155_v5, %s6016_s23  ;;  %v1611_v5 = vshll.u32 %v1241_v49, 16 }
 0x35b   : > { %v3034_v50 = vpop.permute.xlu1 %3033 }
 0x35c   : > { %3111 = vst.msk [vmem:[#allocation3 + $0xdc] sm:$0xf] %vm1727_vm15, %v3034_v50  ;;  %v5628_v30 = vld [vmem:[#allocation3 + $0xcc] sm:$0xf0]  ;;  %v1242_v50 = vld [vmem:[#allocation2 + $0xb8] sm:$0xf] }
 0x35d   : > { %3304 = vst.msk [vmem:[#allocation3 + $0xdc] sm:$0xf] %vm2067_vm2, %v7654_v55  ;;  %v5631_v57 = vor.u32 %v5892_v53, %v5628_v30  ;;  %3806 = vrot.lane.b32.xlu2 %v3715_v20, %s6018_s30  ;;  %v1601_v55 = vrot.slane %v1600_v48, 4  ;;  %v3733_v53 = vor.u32 %v3732_v2, %v3729_v43  ;;  %v1613_v20 = vrot.slane %v1611_v5, 5 }
 0x35f   : > { %4788 = vmatmul.bf16.gmra.mxu2 %v5631_v57  ;;  %v1674_v36 = vpop.permute.xlu2 %1673  ;;  %v1606_v6 = vsel %vm6170_vm11, %v1601_v55, %v1605_v37  ;;  %v1621_v55 = vshrl.u32 %v1242_v50, 16  ;;  %v3157_v37 = vld [vmem:[#allocation2 + $0xd0] sm:$0xf]  ;;  %v3734_v0 = vrot.slane %v3733_v53, 4 }
 0x360   : > { %1749 = vst.msk [vmem:[#allocation3 + $0xfc] sm:$0xf] %vm1727_vm15, %v1674_v36 }
 0x361   : > { %1687 = vrot.lane.b32.xlu1 %v1596_v19, %s6017_s26  ;;  %v1617_v19 = vshll.u32 %v1242_v50, 16  ;;  %v1623_v61 = vrot.slane %v1621_v55, 4  ;;  %v8442_v50 = vld [vmem:[#allocation6_spill] sm:$0xff] }
 0x363   : > { %v1672_v15 = vpop.permute.xlu1 %1671  ;;  %v1619_v54 = vrot.slane %v1617_v19, 5 }
 0x364   : > { %1748 = vst.msk [vmem:[#allocation3 + $0xf0] sm:$0xf] %vm1727_vm15, %v1672_v15 }
 0x365   : > { %2088 = vst.msk [vmem:[#allocation3 + $0xf0] sm:$0xf] %vm2067_vm2, %v7622_v27  ;;  %1689 = vrot.lane.b32.xlu2 %v1606_v6, %s6017_s26  ;;  %v2834_v27 = vld [vmem:[#allocation2 + $0xc0] sm:$0xe]  ;;  %v1243_v6 = vld [vmem:[#allocation2 + $0xbc] sm:$0x1]  ;;  %v1624_v34 = vor.u32 %v1623_v61, %v1619_v54 }
 0x366   : > { %2281 = vst.msk [vmem:[#allocation3 + $0xf0] sm:$0xf] %vm2260_vm3, %v2205_v13  ;;  %v5511_v47 = vrot.slane %v2834_v27, 9  ;;  %v1608_v13 = vshrl.u32 %v1241_v49, 16 }
 0x367   : > { %v3787_v59 = vpop.permute.xlu2 %3786 }
 0x368   : > { %3864 = vst.msk [vmem:[#allocation3 + $0xdc] sm:$0xf] %vm2260_vm3, %v3787_v59  ;;  %v2993_v12 = vsel %vm6150_vm6, %v5511_v47, %v2992_v18  ;;  %v1610_v30 = vrot.slane %v1608_v13, 4  ;;  %v3739_v59 = vsel %vm6170_vm11, %v3734_v0, %v7674_v51  ;;  %v1625_v51 = vrot.slane %v1624_v34, 4  ;;  %v1807_v18 = vld [vmem:[#allocation2 + $0xbc] sm:$0x1] }
 0x369   : > { %v4769_v58 = vpop.f32.mrf.mxu2  ;;  %2029 = vrot.lane.b32.xlu1 %v1963_v23, %s6016_s23 }
 0x36a   : > { %v7973_v14 = vadd.f32 %v4769_v58, %v4681_v62  ;;  %v1614_v15 = vor.u32 %v1613_v20, %v1610_v30  ;;  %v7992_v62 = vpop.f32.mrf.mxu3 }
 0x36b   : > { %v2014_v28 = vpop.permute.xlu1 %2013 }
 0x36c   : > { %2089 = vst.msk [vmem:[#allocation3 + $0xfc] sm:$0xf] %vm2067_vm2, %v2014_v28  ;;  %v1615_v23 = vrot.slane %v1614_v15, 4  ;;  %v1627_v28 = vshll.u32 %v1243_v6, 16 }
 0x36d   : > { %2282 = vst.msk [vmem:[#allocation3 + $0xfc] sm:$0xf] %vm2260_vm3, %v7706_v4  ;;  %2220 = vrot.lane.b32.xlu2 %v2128_v44, %s6018_s30  ;;  %v2995_v4 = vrot.slane %v2836_v60, 5  ;;  %v5650_v57 = vld [vmem:[#allocation3 + $0xf0] sm:$0xf]  ;;  %v1969_v60 = vrot.slane %v1807_v18, 5 }
 0x36e   : > { %v1620_v24 = vsel %vm6170_vm11, %v1615_v23, %v1619_v54  ;;  %v1629_v47 = vrot.slane %v1627_v28, 5  ;;  %v2339_v18 = vld [vmem:[#allocation2 + $0xc4] sm:$0xf] }
 0x36f   : > { %v3040_v11 = vpop.permute.xlu2 %3039  ;;  %v2996_v25 = vsel %vm6150_vm6, %v2994_v32, %v2995_v4  ;;  %v5895_v33 = vld [vmem:[#allocation3 + $0xdc] sm:$0xf] }
 0x370   : > { %3114 = vst.msk [vmem:[#allocation3 + $0x100] sm:$0xf] %vm1727_vm15, %v3040_v11  ;;  %v1630_v2 = vsel %vm6170_vm11, %v1625_v51, %v1629_v47  ;;  %v8441_v4 = vld [vmem:[#allocation11_spill] sm:$0xff] }
 0x371   : > { %3057 = vrot.lane.b32.xlu1 %v2993_v12, %s6017_s26  ;;  %v8026_v12 = vpop.f32.mrf.mxu1  ;;  %v8033_v53 = vpop.f32.mrf.mxu2 }
 0x372   : > { %v8008_v43 = vpop.f32.mrf.mxu3 }
 0x373   : > { %v3229_v16 = vpop.permute.xlu1 %3228 }
 0x374   : > { %3305 = vst.msk [vmem:[#allocation3 + $0xe8] sm:$0xf] %vm2067_vm2, %v3229_v16  ;;  %v5899_v48 = vld [vmem:[#allocation3 + $0xf8] sm:$0xf0] }
 0x375   : > { %3865 = vst.msk [vmem:[#allocation3 + $0xe8] sm:$0xf] %vm2260_vm3, %v7781_v17  ;;  %v5651_v36 = vor.u32 %v5899_v48, %v5650_v57  ;;  %3059 = vrot.lane.b32.xlu2 %v2996_v25, %s6017_s26 }
 0x377   : > { %4709 = vmatmul.bf16.gmra.mxu1 %v5651_v36  ;;  %v2209_v56 = vpop.permute.xlu2 %2208 }
 0x379   : > { %3252 = vrot.lane.b32.xlu1 %v3157_v37, %s6016_s23  ;;  %v8038_v57 = vpop.f32.mrf.mxu1  ;;  %v8443_v37 = vld [vmem:[#allocation4_spill] sm:$0xff] }
 0x37a   : > { %v8024_v11 = vpop.f32.mrf.mxu3  ;;  %v8046_v15 = vpop.f32.mrf.mxu2 }
 0x37b   : > { %v3038_v17 = vpop.permute.xlu1 %3037 }
 0x37c   : > { %3113 = vst.msk [vmem:[#allocation3 + $0xf4] sm:$0xf] %vm1727_vm15, %v3038_v17  ;;  %v5640_v58 = vld [vmem:[#allocation3 + $0xe4] sm:$0xf0]  ;;  %v2024_v17 = vpop.permute.xlu0 %2023 }
 0x37d   : > { %3306 = vst.msk [vmem:[#allocation3 + $0xf4] sm:$0xf] %vm2067_vm2, %v7766_v38  ;;  %v5643_v27 = vor.u32 %v5895_v33, %v5640_v58  ;;  %3810 = vrot.lane.b32.xlu2 %v3739_v59, %s6018_s30  ;;  %v8440_v38 = vrot.slane %v7725_v42, 5  ;;  %v8445_v59 = vld [vmem:[#allocation7_spill] sm:$0xff] }
 0x37f   : > { %4793 = vmatmul.bf16.gmra.mxu2 %v5643_v27  ;;  %v1678_v52 = vpop.permute.xlu2 %1677  ;;  %v1968_v44 = vrot.slane %v8440_v38, 4  ;;  %v2711_v38 = vshll.u32 %v2339_v18, 16 }
 0x380   : > { %1751 = vst.msk [vmem:[#allocation3 + $0x114] sm:$0xf] %vm1727_vm15, %v1678_v52 }
 0x381   : > { %1691 = vrot.lane.b32.xlu1 %v1620_v24, %s6017_s26  ;;  %v1970_v5 = vsel %vm6150_vm6, %v1968_v44, %v1969_v60  ;;  %v8050_v54 = vpop.f32.mrf.mxu1  ;;  %v2715_v44 = vshrl.u32 %v2339_v18, 16 }
 0x382   : > { %v8040_v25 = vpop.f32.mrf.mxu3  ;;  %v8059_v23 = vpop.f32.mrf.mxu2 }
 0x383   : > { %v1676_v49 = vpop.permute.xlu1 %1675 }
 0x384   : > { %1750 = vst.msk [vmem:[#allocation3 + $0x108] sm:$0xf] %vm1727_vm15, %v1676_v49  ;;  %v2219_v51 = vpop.permute.xlu0 %2218  ;;  %v2340_v49 = vld [vmem:[#allocation2 + $0xc8] sm:$0x1] }
 0x385   : > { %2090 = vst.msk [vmem:[#allocation3 + $0x108] sm:$0xf] %vm2067_vm2, %v7730_v46  ;;  %1693 = vrot.lane.b32.xlu2 %v1630_v2, %s6017_s26  ;;  %v2130_v46 = vld [vmem:[#allocation2 + $0xc0] sm:$0xf]  ;;  %v2721_v60 = vshll.u32 %v2340_v49, 16 }
 0x386   : > { %2283 = vst.msk [vmem:[#allocation3 + $0x108] sm:$0xf] %vm2260_vm3, %v2209_v56  ;;  %v8446_v2 = vld [vmem:[#allocation5_spill] sm:$0xff] }
 0x387   : > { %v3791_v13 = vpop.permute.xlu2 %3790 }
 0x388   : > { %3866 = vst.msk [vmem:[#allocation3 + $0xf4] sm:$0xf] %vm2260_vm3, %v3791_v13 }
 0x389   : > { %2033 = vrot.lane.b32.xlu1 %v1970_v5, %s6016_s23  ;;  %v8062_v58 = vpop.f32.mrf.mxu1  ;;  %v8072_v5 = vrot.slane %v2711_v38, 5  ;;  %v2338_v38 = vld [vmem:[#allocation2 + $0xc0] sm:$0xf] }
 0x38a   : > { %v8052_v61 = vpop.f32.mrf.mxu3 }
 0x38b   : > { %v2018_v42 = vpop.permute.xlu1 %2017 }
 0x38c   : > { %2091 = vst.msk [vmem:[#allocation3 + $0x114] sm:$0xf] %vm2067_vm2, %v2018_v42  ;;  %v2717_v42 = vrot.slane %v2715_v44, 4 }
 0x38d   : > { %2284 = vst.msk [vmem:[#allocation3 + $0x114] sm:$0xf] %vm2260_vm3, %v7805_v35  ;;  %2224 = vrot.lane.b32.xlu2 %v2130_v46, %s6018_s30  ;;  %v5662_v35 = vld [vmem:[#allocation3 + $0x108] sm:$0xf] }
 0x38f   : > { %v3044_v32 = vpop.permute.xlu2 %3043  ;;  %v5898_v19 = vld [vmem:[#allocation3 + $0xf4] sm:$0xf] }
 0x390   : > { %3116 = vst.msk [vmem:[#allocation3 + $0x118] sm:$0xf] %vm1727_vm15, %v3044_v32  ;;  %v2718_v32 = vor.u32 %v2717_v42, %v8072_v5  ;;  %v4859_v42 = vadd.f32 %v8008_v43, %v7973_v14  ;;  %v5907_v14 = vld [vmem:[#allocation3 + $0x13c] sm:$0xf] }
 0x391   : > { %3309 = vst.msk [vmem:[#allocation3 + $0x118] sm:$0xf] %vm2067_vm2, %v8441_v4  ;;  %v4692_v46 = vpop.f32.mrf.mxu1  ;;  %v2723_v4 = vrot.slane %v2721_v60, 5  ;;  %v2702_v60 = vshrl.u32 %v2338_v38, 16 }
 0x392   : > { %3869 = vst.msk [vmem:[#allocation3 + $0x118] sm:$0xf] %vm2260_vm3, %v8442_v50  ;;  %v8064_v52 = vpop.f32.mrf.mxu3 }
 0x393   : > { %v3233_v16 = vpop.permute.xlu1 %3232 }
 0x394   : > { %3307 = vst.msk [vmem:[#allocation3 + $0x100] sm:$0xf] %vm2067_vm2, %v3233_v16  ;;  %v5902_v30 = vld [vmem:[#allocation3 + $0x110] sm:$0xf0]  ;;  %v2719_v16 = vrot.slane %v2718_v32, 4 }
 0x395   : > { %3867 = vst.msk [vmem:[#allocation3 + $0x100] sm:$0xf] %vm2260_vm3, %v7840_v21  ;;  %v5663_v20 = vor.u32 %v5902_v30, %v5662_v35  ;;  %v8444_v21 = vld [vmem:[#allocation12_spill] sm:$0xff]  ;;  %v3247_v35 = vpop.permute.xlu0 %3246 }
 0x397   : > { %4714 = vmatmul.bf16.gmra.mxu1 %v5663_v20  ;;  %v1686_v48 = vpop.permute.xlu2 %1685  ;;  %v5676_v20 = vld [vmem:[#allocation3 + $0x12c] sm:$0xf0] }
 0x398   : > { %1755 = vst.msk [vmem:[#allocation3 + $0x144] sm:$0xf] %vm1727_vm15, %v1686_v48  ;;  %v2724_v48 = vsel %vm6170_vm11, %v2719_v16, %v2723_v4 }
 0x399   : > { %v5664_v28 = vld [vmem:[#allocation3 + $0x114] sm:$0xf0]  ;;  %2788 = vst.msk [vmem:[#allocation3 + $0x178] sm:$0xf] %vm280_vm0, %v2724_v48 }
 0x39a   : > { %v8078_v50 = vpop.f32.mrf.mxu3 }
 0x39b   : > { %v3042_v36 = vpop.permute.xlu1 %3041 }
 0x39c   : > { %3115 = vst.msk [vmem:[#allocation3 + $0x10c] sm:$0xf] %vm1727_vm15, %v3042_v36  ;;  %v5652_v55 = vld [vmem:[#allocation3 + $0xfc] sm:$0xf0] }
 0x39d   : > { %3308 = vst.msk [vmem:[#allocation3 + $0x10c] sm:$0xf] %vm2067_vm2, %v8443_v37  ;;  %v5655_v0 = vor.u32 %v5898_v19, %v5652_v55 }
 0x39e   : > { %3868 = vst.msk [vmem:[#allocation3 + $0x10c] sm:$0xf] %vm2260_vm3, %v8444_v21  ;;  %v4695_v21 = vpop.f32.mrf.mxu1 }
 0x39f   : > { %4798 = vmatmul.bf16.gmra.mxu2 %v5655_v0  ;;  %v2217_v56 = vpop.permute.xlu2 %2216 }
 0x3a2   : > { %v8066_v47 = vpop.f32.mrf.mxu2 }
 0x3a3   : > { %v1680_v6 = vpop.permute.xlu1 %1679 }
 0x3a4   : > { %1752 = vst.msk [vmem:[#allocation3 + $0x120] sm:$0xf] %vm1727_vm15, %v1680_v6 }
 0x3a5   : > { %2092 = vst.msk [vmem:[#allocation3 + $0x120] sm:$0xf] %vm2067_vm2, %v7823_v8  ;;  %v5901_v27 = vld [vmem:[#allocation3 + $0x10c] sm:$0xf] }
 0x3a6   : > { %2285 = vst.msk [vmem:[#allocation3 + $0x120] sm:$0xf] %vm2260_vm3, %v8445_v59  ;;  %v5667_v24 = vor.u32 %v5901_v27, %v5664_v28  ;;  %v4873_v27 = vpop.f32.mrf.mxu3  ;;  %v3809_v28 = vpop.permute.xlu0 %3808 }
 0x3a7   : > { %v3056_v33 = vpop.permute.xlu2 %3055  ;;  %v4697_v49 = vpop.f32.mrf.mxu1 }
 0x3a8   : > { %3122 = vst.msk [vmem:[#allocation3 + $0x160] sm:$0xf] %vm1727_vm15, %v3056_v33 }
 0x3aa   : > { %v4781_v36 = vpop.f32.mrf.mxu2 }
 0x3ab   : > { %v2022_v34 = vpop.permute.xlu1 %2021 }
 0x3ad   : > { %v5674_v19 = vld [vmem:[#allocation3 + $0x120] sm:$0xf] }
 0x3af   : > { %4803 = vmatmul.bf16.gmra.mxu2 %v5667_v24  ;;  %v1682_v8 = vpop.permute.xlu2 %1681 }
 0x3b0   : > { %1753 = vst.msk [vmem:[#allocation3 + $0x12c] sm:$0xf] %vm1727_vm15, %v1682_v8 }
 0x3b1   : > { %2093 = vst.msk [vmem:[#allocation3 + $0x12c] sm:$0xf] %vm2067_vm2, %v2022_v34 }
 0x3b2   : > { %2286 = vst.msk [vmem:[#allocation3 + $0x12c] sm:$0xf] %vm2260_vm3, %v8446_v2  ;;  %v2705_v2 = vshll.u32 %v2338_v38, 16 }
 0x3b3   : > { %v1684_v13 = vpop.permute.xlu1 %1683 }
 0x3b4   : > { %1754 = vst.msk [vmem:[#allocation3 + $0x138] sm:$0xf] %vm1727_vm15, %v1684_v13  ;;  %v2707_v48 = vrot.slane %v2705_v2, 5 }
 0x3b5   : > { %2094 = vst.msk [vmem:[#allocation3 + $0x138] sm:$0xf] %vm2067_vm2, %v2024_v17  ;;  %v8088_v17 = vld [vmem:[%s8388_s4] ss:$0 sm:$0xff] }
 0x3b6   : > { %2287 = vst.msk [vmem:[#allocation3 + $0x138] sm:$0xf] %vm2260_vm3, %v2217_v56  ;;  %v5904_v56 = vld [vmem:[#allocation3 + $0x124] sm:$0xf]  ;;  %v4683_v59 = vadd.f32 %v8088_v17, %v8026_v12  ;;  %v4696_v18 = vadd.f32 %v8088_v17, %v4695_v21  ;;  %v4693_v13 = vadd.f32 %v8088_v17, %v4692_v46  ;;  %v4691_v4 = vadd.f32 %v8088_v17, %v8062_v58  ;;  %v4875_v46 = vpop.f32.mrf.mxu3 }
 0x3b7   : > { %v3807_v30 = vpop.permute.xlu2 %3806  ;;  %v5679_v6 = vor.u32 %v5904_v56, %v5676_v20  ;;  %v2704_v20 = vrot.slane %v2702_v60, 4  ;;  %v2028_v56 = vpop.permute.xlu0 %2027 }
 0x3b8   : > { %v4772_v34 = vadd.f32 %v8033_v53, %v4683_v59  ;;  %v4780_v59 = vadd.f32 %v8066_v47, %v4691_v4  ;;  %v4688_v47 = vadd.f32 %v8088_v17, %v8050_v54  ;;  %v4700_v4 = vpop.f32.mrf.mxu1 }
 0x3b9   : > { %v5905_v55 = vld [vmem:[#allocation3 + $0x128] sm:$0xf0]  ;;  %v2708_v43 = vor.u32 %v2707_v48, %v2704_v20 }
 0x3ba   : > { %v5675_v0 = vor.u32 %v5905_v55, %v5674_v19  ;;  %v4861_v8 = vadd.f32 %v8024_v11, %v4772_v34  ;;  %v4698_v11 = vadd.f32 %v8088_v17, %v4697_v49  ;;  %v4782_v19 = vadd.f32 %v4781_v36, %v4693_v13 }
 0x3bb   : > { %v2026_v37 = vpop.permute.xlu1 %2025  ;;  %v2709_v34 = vrot.slane %v2708_v43, 4 }
 0x3bc   : > { %2095 = vst.msk [vmem:[#allocation3 + $0x144] sm:$0xf] %vm2067_vm2, %v2026_v37  ;;  %4719 = vmatmul.bf16.gmra.mxu1 %v5675_v0  ;;  %v4927_v32 = vmax.f32 %v4861_v8, 0.0  ;;  %v4871_v36 = vadd.f32 %v8078_v50, %v4782_v19  ;;  %v4686_v50 = vadd.f32 %v8088_v17, %v8038_v57 }
 0x3bd   : > { %2288 = vst.msk [vmem:[#allocation3 + $0x144] sm:$0xf] %vm2260_vm3, %v2219_v51 }
 0x3be   : > { %v4931_v38 = vmax.f32 %v4871_v36, 0.0  ;;  %v4775_v54 = vadd.f32 %v8046_v15, %v4686_v50 }
 0x3bf   : > { %4808 = vmatmul.bf16.gmra.mxu2 %v5679_v6  ;;  %v1690_v33 = vpop.permute.xlu2 %1689  ;;  %v4926_v6 = vmax.f32 %v4859_v42, 0.0 }
 0x3c0   : > { %1757 = vst.msk [vmem:[#allocation3 + $0x15c] sm:$0xf] %vm1727_vm15, %v1690_v33 }
 0x3c2   : > { %v4784_v24 = vpop.f32.mrf.mxu2 }
 0x3c3   : > { %v3054_v51 = vpop.permute.xlu1 %3053  ;;  %v4785_v12 = vadd.f32 %v4784_v24, %v4696_v18  ;;  %v2714_v18 = vsel %vm6170_vm11, %v2709_v34, %v8072_v5  ;;  %v2223_v5 = vpop.permute.xlu0 %2222 }
 0x3c4   : > { %3121 = vst.msk [vmem:[#allocation3 + $0x154] sm:$0xf] %vm1727_vm15, %v3054_v51  ;;  %v5908_v53 = vld [vmem:[#allocation3 + $0x140] sm:$0xf0]  ;;  %v8109_v51 = vpack.c.bf16 %v4927_v32, %v4926_v6 }
 0x3c5   : > { %3314 = vst.msk [vmem:[#allocation3 + $0x154] sm:$0xf] %vm2067_vm2, %v3247_v35  ;;  %v5686_v35 = vld [vmem:[#allocation3 + $0x138] sm:$0xf]  ;;  %v4874_v55 = vadd.f32 %v4873_v27, %v4785_v12  ;;  %v4777_v12 = vadd.f32 %v8059_v23, %v4688_v47  ;;  %v4864_v23 = vadd.f32 %v8040_v25, %v4775_v54 }
 0x3c6   : > { %3874 = vst.msk [vmem:[#allocation3 + $0x154] sm:$0xf] %vm2260_vm3, %v3807_v30  ;;  %v5688_v30 = vld [vmem:[#allocation3 + $0x144] sm:$0xf0]  ;;  %v5687_v21 = vor.u32 %v5908_v53, %v5686_v35  ;;  %v3923_v35 = vld [vmem:[#allocation2 + $0xcc] sm:$0xe] }
 0x3c7   : > { %v2221_v44 = vpop.permute.xlu2 %2220  ;;  %v5691_v33 = vor.u32 %v5907_v14, %v5688_v30  ;;  %v4932_v27 = vmax.f32 %v4874_v55, 0.0  ;;  %2787 = vst.msk [vmem:[#allocation3 + $0x16c] sm:$0xf] %vm280_vm0, %v2714_v18  ;;  %v4866_v60 = vadd.f32 %v8052_v61, %v4777_v12  ;;  %v3924_v61 = vld [vmem:[#allocation2 + $0xd0] sm:$0xf]  ;;  %v5527_v20 = vrot.slane %v3923_v35, 9 }
 0x3c8   : > { %v3925_v30 = vld [vmem:[#allocation2 + $0xd4] sm:$0x1]  ;;  %v4081_v48 = vrot.slane %v3924_v61, 5 }
 0x3c9   : > { %v4929_v42 = vmax.f32 %v4866_v60, 0.0 }
 0x3ca   : > { %v4786_v16 = vpop.f32.mrf.mxu2 }
 0x3cb   : > { %v4787_v37 = vadd.f32 %v4786_v16, %v4698_v11  ;;  %v3249_v0 = vpop.permute.xlu1 %3248  ;;  %v4928_v16 = vmax.f32 %v4864_v23, 0.0  ;;  %v3251_v19 = vpop.permute.xlu0 %3250 }
 0x3cc   : > { %3315 = vst.msk [vmem:[#allocation3 + $0x160] sm:$0xf] %vm2067_vm2, %v3249_v0  ;;  %4724 = vmatmul.bf16.gmra.mxu1 %v5687_v21  ;;  %v4678_v0 = vadd.f32 %v8088_v17, %v7945_v3  ;;  %v4701_v21 = vadd.f32 %v8088_v17, %v4700_v4 }
 0x3cd   : > { %v4876_v58 = vadd.f32 %v4875_v46, %v4787_v37  ;;  %3875 = vst.msk [vmem:[#allocation3 + $0x160] sm:$0xf] %vm2260_vm3, %v3809_v28  ;;  %v4869_v28 = vadd.f32 %v8064_v52, %v4780_v59  ;;  %v5910_v15 = vld [vmem:[#allocation3 + $0x154] sm:$0xf]  ;;  %v4955_v25 = vpack.c.bf16 %v4929_v42, %v4928_v16  ;;  %v4084_v37 = vrot.slane %v3925_v30, 5 }
 0x3ce   : > { %v4082_v46 = vsel %vm6150_vm6, %v5527_v20, %v4081_v48  ;;  %v4767_v43 = vadd.f32 %v7955_v41, %v4678_v0  ;;  %v5538_v16 = vld [vmem:[#allocation3 + $0x8] sm:$0xf] }
 0x3cf   : > { %v4933_v24 = vmax.f32 %v4876_v58, 0.0  ;;  %4813 = vmatmul.bf16.gmra.mxu2 %v5691_v33  ;;  %v3060_v8 = vpop.permute.xlu2 %3059  ;;  %v4930_v52 = vmax.f32 %v4869_v28, 0.0  ;;  %4148 = vst.msk [vmem:[#allocation3 + $0x170] sm:$0xf] %vm280_vm0, %v4082_v46  ;;  %v5158_v58 = vsel %vm4602_vm1, %v4955_v25, 0 }
 0x3d0   : > { %3124 = vst.msk [vmem:[#allocation3 + $0x178] sm:$0xf] %vm1727_vm15, %v3060_v8  ;;  %v4856_v41 = vadd.f32 %v7992_v62, %v4767_v43  ;;  %v4854_v8 = vadd.f32 %v7981_v40, %v7885_v63  ;;  %v5155_v62 = vsel %vm4602_vm1, %v8109_v51, 0  ;;  %v5873_v46 = vld [vmem:[#allocation3 + $0x28] sm:$0xf0] }
 0x3d1   : > { %v4957_v49 = vpack.c.bf16 %v4933_v24, %v4932_v27  ;;  %v4956_v57 = vpack.c.bf16 %v4931_v38, %v4930_v52  ;;  %v4702_v27 = vpop.f32.mrf.mxu1  ;;  %v4673_v24 = vadd.f32 %v8088_v17, %v7853_v31 }
 0x3d2   : > { %v4703_v9 = vadd.f32 %v8088_v17, %v4702_v27  ;;  %v4924_v38 = vmax.f32 %v4854_v8, 0.0 }
 0x3d3   : > { %v1688_v53 = vpop.permute.xlu1 %1687  ;;  %v5164_v29 = vsel %vm4602_vm1, %v4957_v49, 0  ;;  %v5161_v11 = vsel %vm4602_vm1, %v4956_v57, 0  ;;  %v3813_v18 = vpop.permute.xlu0 %3812  ;;  %v4762_v28 = vadd.f32 %v7864_v26, %v4673_v24  ;;  %v4925_v49 = vmax.f32 %v4856_v41, 0.0 }
 0x3d4   : > { %1756 = vst.msk [vmem:[#allocation3 + $0x150] sm:$0xf] %vm1727_vm15, %v1688_v53  ;;  %5190 = vmatpush.bf16.xpose.msrb.mxu3 %v5164_v29  ;;  %v5700_v13 = vld [vmem:[#allocation3 + $0x15c] sm:$0xf0]  ;;  %v4849_v26 = vadd.f32 %v7811_v7, %v7758_v1 }
 0x3d5   : > { %2096 = vst.msk [vmem:[#allocation3 + $0x150] sm:$0xf] %vm2067_vm2, %v2028_v56  ;;  %v4083_v56 = vrot.slane %v4081_v48, 4  ;;  %v4851_v40 = vadd.f32 %v7829_v45, %v4762_v28  ;;  %v4953_v53 = vpack.c.bf16 %v4925_v49, %v4924_v38 }
 0x3d6   : > { %2289 = vst.msk [vmem:[#allocation3 + $0x150] sm:$0xf] %vm2260_vm3, %v2221_v44  ;;  %v5703_v44 = vor.u32 %v5910_v15, %v5700_v13  ;;  %v5718_v31 = vld [vmem:[#allocation3 + $0x170] sm:$0xf] }
 0x3d7   : > { %v3811_v2 = vpop.permute.xlu2 %3810  ;;  %v4085_v34 = vsel %vm6150_vm6, %v4083_v56, %v4084_v37  ;;  %v4923_v52 = vmax.f32 %v4851_v40, 0.0 }
 0x3d8   : > { %4149 = vst.msk [vmem:[#allocation3 + $0x17c] sm:$0xf] %vm280_vm0, %v4085_v34 }
 0x3db   : > { %v2030_v32 = vpop.permute.xlu1 %2029  ;;  %v2032_v60 = vpop.permute.xlu0 %2031 }
 0x3dc   : > { %2097 = vst.msk [vmem:[#allocation3 + $0x15c] sm:$0xf] %vm2067_vm2, %v2030_v32  ;;  %5191 = vmatpush.bf16.xpose.msrb.mxu3 %v5161_v11  ;;  %v4705_v32 = vpop.f32.mrf.mxu1  ;;  %v8173_v11 = vpop.f32.mrf.mxu3 }
 0x3dd   : > { %2290 = vst.msk [vmem:[#allocation3 + $0x15c] sm:$0xf] %vm2260_vm3, %v2223_v5  ;;  %v5698_v3 = vld [vmem:[#allocation3 + $0x150] sm:$0xf]  ;;  %v5152_v5 = vsel %vm4602_vm1, %v4953_v53, 0  ;;  %v4706_v4 = vadd.f32 %v8088_v17, %v4705_v32 }
 0x3df   : > { %4818 = vmatmul.bf16.gmra.mxu2 %v5703_v44  ;;  %v1694_v55 = vpop.permute.xlu2 %1693  ;;  %v5915_v63 = vld [vmem:[#allocation3 + $0x178] sm:$0xf0]  ;;  %v5870_v44 = vld [vmem:[#allocation3 + $0x10] sm:$0xf0] }
 0x3e0   : > { %1759 = vst.msk [vmem:[#allocation3 + $0x174] sm:$0xf] %vm1727_vm15, %v1694_v55  ;;  %v5719_v29 = vor.u32 %v5915_v63, %v5718_v31  ;;  %v5539_v25 = vor.u32 %v5870_v44, %v5538_v16 }
 0x3e2   : > { %v4789_v14 = vpop.f32.mrf.mxu2  ;;  %5807 = vmatmul.msk.bf16.gmra.mxu3 %vm4602_vm1, %v5719_v29 }
 0x3e3   : > { %v8140_v6 = vadd.f32 %v4789_v14, %v4701_v21  ;;  %v3058_v59 = vpop.permute.xlu1 %3057  ;;  %v2227_v42 = vpop.permute.xlu0 %2226  ;;  %v5550_v21 = vld [vmem:[#allocation3 + $0x20] sm:$0xf] }
 0x3e4   : > { %3123 = vst.msk [vmem:[#allocation3 + $0x16c] sm:$0xf] %vm1727_vm15, %v3058_v59  ;;  %5192 = vmatpush.bf16.xpose.msrb.mxu3 %v5158_v58  ;;  %v5911_v33 = vld [vmem:[#allocation3 + $0x158] sm:$0xf0]  ;;  %v4707_v48 = vpop.f32.mrf.mxu1  ;;  %v8180_v37 = vpop.f32.mrf.mxu3  ;;  %v5551_v14 = vor.u32 %v5873_v46, %v5550_v21 }
 0x3e5   : > { %3316 = vst.msk [vmem:[#allocation3 + $0x16c] sm:$0xf] %vm2067_vm2, %v3251_v19  ;;  %v5699_v36 = vor.u32 %v5911_v33, %v5698_v3  ;;  %v4708_v19 = vadd.f32 %v8088_v17, %v4707_v48 }
 0x3e6   : > { %3876 = vst.msk [vmem:[#allocation3 + $0x16c] sm:$0xf] %vm2260_vm3, %v3811_v2  ;;  %v4922_v2 = vmax.f32 %v4849_v26, 0.0 }
 0x3e7   : > { %4729 = vmatmul.bf16.gmra.mxu1 %v5699_v36  ;;  %v2225_v23 = vpop.permute.xlu2 %2224 }
 0x3e8   : > { %v4952_v1 = vpack.c.bf16 %v4923_v52, %v4922_v2 }
 0x3ea   : > { %v4791_v47 = vpop.f32.mrf.mxu2  ;;  %v5149_v13 = vsel %vm4602_vm1, %v4952_v1, 0 }
 0x3eb   : > { %v8156_v50 = vadd.f32 %v4791_v47, %v4703_v9  ;;  %v3253_v12 = vpop.permute.xlu1 %3252 }
 0x3ec   : > { %3317 = vst.msk [vmem:[#allocation3 + $0x178] sm:$0xf] %vm2067_vm2, %v3253_v12  ;;  %5193 = vmatpush.bf16.xpose.msrb.mxu3 %v5155_v62  ;;  %v8184_v56 = vpop.f32.mrf.mxu3 }
 0x3ed   : > { %3877 = vst.msk [vmem:[#allocation3 + $0x178] sm:$0xf] %vm2260_vm3, %v3813_v18  ;;  %v5913_v54 = vld [vmem:[#allocation3 + $0x16c] sm:$0xf] }
 0x3f3   : > { %v1692_v51 = vpop.permute.xlu1 %1691 }
 0x3f4   : > { %1758 = vst.msk [vmem:[#allocation3 + $0x168] sm:$0xf] %vm1727_vm15, %v1692_v51  ;;  %5194 = vmatpush.bf16.xpose.msrb.mxu3 %v5152_v5  ;;  %v5712_v57 = vld [vmem:[#allocation3 + $0x174] sm:$0xf0]  ;;  %v4710_v43 = vpop.f32.mrf.mxu1  ;;  %v8187_v59 = vpop.f32.mrf.mxu3 }
 0x3f5   : > { %2098 = vst.msk [vmem:[#allocation3 + $0x168] sm:$0xf] %vm2067_vm2, %v2032_v60  ;;  %v5715_v45 = vor.u32 %v5913_v54, %v5712_v57  ;;  %v4711_v58 = vadd.f32 %v8088_v17, %v4710_v43 }
 0x3f6   : > { %2291 = vst.msk [vmem:[#allocation3 + $0x168] sm:$0xf] %vm2260_vm3, %v2225_v23 }
 0x3f7   : > { %4823 = vmatmul.bf16.gmra.mxu2 %v5715_v45 }
 0x3fb   : > { %v2034_v7 = vpop.permute.xlu1 %2033 }
 0x3fc   : > { %2099 = vst.msk [vmem:[#allocation3 + $0x174] sm:$0xf] %vm2067_vm2, %v2034_v7  ;;  %5195 = vmatpush.bf16.xpose.msrb.mxu3 %v5149_v13  ;;  %v4712_v3 = vpop.f32.mrf.mxu1  ;;  %v8192_v36 = vpop.f32.mrf.mxu3 }
 0x3fd   : > { %2292 = vst.msk [vmem:[#allocation3 + $0x174] sm:$0xf] %vm2260_vm3, %v2227_v42  ;;  %v5710_v61 = vld [vmem:[#allocation3 + $0x168] sm:$0xf]  ;;  %v4713_v27 = vadd.f32 %v8088_v17, %v4712_v3 }
 0x402   : > { %v4794_v15 = vpop.f32.mrf.mxu2 }
 0x403   : > { %v8176_v35 = vadd.f32 %v4794_v15, %v4706_v4 }
 0x404   : > { %v5914_v30 = vld [vmem:[#allocation3 + $0x170] sm:$0xf0]  ;;  %v4890_v28 = vpop.f32.mrf.mxu3 }
 0x405   : > { %v5711_v20 = vor.u32 %v5914_v30, %v5710_v61 }
 0x407   : > { %4734 = vmatmul.bf16.gmra.mxu1 %v5711_v20  ;;  %5792 = vmatmul.msk.bf16.vlgmr.msrb.gmra.mxu2 %vm4602_vm1, %v5539_v25 }
 0x40a   : > { %v4796_v55 = vpop.f32.mrf.mxu2 }
 0x40b   : > { %v8182_v0 = vadd.f32 %v4796_v55, %v4708_v19 }
 0x40c   : > { %v4893_v63 = vpop.f32.mrf.mxu3 }
 0x414   : > { %v4715_v41 = vpop.f32.mrf.mxu1  ;;  %v4895_v54 = vpop.f32.mrf.mxu3 }
 0x415   : > { %v4716_v9 = vadd.f32 %v8088_v17, %v4715_v41 }
 0x417   : > { %5793 = vmatmul.msk.bf16.gmra.mxu2 %vm4602_vm1, %v5551_v14 }
 0x41c   : > { %v4717_v49 = vpop.f32.mrf.mxu1  ;;  %v4898_v60 = vpop.f32.mrf.mxu3 }
 0x41d   : > { %v4718_v12 = vadd.f32 %v8088_v17, %v4717_v49 }
 0x422   : > { %v4799_v33 = vpop.f32.mrf.mxu2 }
 0x423   : > { %v8190_v34 = vadd.f32 %v4799_v33, %v4711_v58 }
 0x424   : > { %v4900_v2 = vpop.f32.mrf.mxu3 }
 0x42a   : > { %v4801_v24 = vpop.f32.mrf.mxu2 }
 0x42b   : > { %v4802_v8 = vadd.f32 %v4801_v24, %v4713_v27 }
 0x42c   : > { %v4903_v1 = vpop.f32.mrf.mxu3 }
 0x432   : > { %v4804_v18 = vpop.f32.mrf.mxu2 }
 0x433   : > { %v4805_v47 = vadd.f32 %v4804_v18, %v4716_v9 }
 0x434   : > { %v4905_v42 = vpop.f32.mrf.mxu3 }
 0x435   : > { %v4894_v27 = vadd.f32 %v4893_v63, %v4805_v47 }
 0x439   : > { %v4720_v38 = vpop.f32.mrf.mxu1 }
 0x43a   : > { %v4806_v62 = vpop.f32.mrf.mxu2  ;;  %v4721_v40 = vadd.f32 %v8088_v17, %v4720_v38  ;;  %v4891_v38 = vadd.f32 %v4890_v28, %v4802_v8 }
 0x43b   : > { %v4807_v31 = vadd.f32 %v4806_v62, %v4718_v12 }
 0x43c   : > { %v4908_v15 = vpop.f32.mrf.mxu3 }
 0x43d   : > { %v4896_v14 = vadd.f32 %v4895_v54, %v4807_v31 }
 0x43f   : > { %v4941_v18 = vmax.f32 %v4896_v14, 0.0 }
 0x441   : > { %v4722_v26 = vpop.f32.mrf.mxu1 }
 0x442   : > { %v4809_v53 = vpop.f32.mrf.mxu2  ;;  %v4723_v52 = vadd.f32 %v8088_v17, %v4722_v26  ;;  %v4889_v26 = vadd.f32 %v8192_v36, %v8190_v34  ;;  %v4886_v34 = vadd.f32 %v8187_v59, %v8182_v0  ;;  %v4881_v0 = vadd.f32 %v8180_v37, %v8156_v50 }
 0x443   : > { %v4810_v29 = vadd.f32 %v4809_v53, %v4721_v40  ;;  %v4940_v40 = vmax.f32 %v4894_v27, 0.0 }
 0x444   : > { %v4910_v61 = vpop.f32.mrf.mxu3  ;;  %v4935_v27 = vmax.f32 %v4881_v0, 0.0 }
 0x445   : > { %v4899_v25 = vadd.f32 %v4898_v60, %v4810_v29 }
 0x447   : > { %v4942_v46 = vmax.f32 %v4899_v25, 0.0  ;;  %v4937_v25 = vmax.f32 %v4886_v34, 0.0  ;;  %v4993_v34 = vld [vmem:[%s8390_s6 + $0x58] sm:$0xff] }
 0x449   : > { %v4725_v45 = vpop.f32.mrf.mxu1 }
 0x44a   : > { %v4811_v51 = vpop.f32.mrf.mxu2  ;;  %v4726_v8 = vadd.f32 %v8088_v17, %v4725_v45 }
 0x44b   : > { %v4812_v5 = vadd.f32 %v4811_v51, %v4723_v52  ;;  %v4961_v52 = vpack.c.bf16 %v4941_v18, %v4940_v40 }
 0x44d   : > { %v4901_v30 = vadd.f32 %v4900_v2, %v4812_v5  ;;  %v4939_v5 = vmax.f32 %v4891_v38, 0.0  ;;  %v5176_v40 = vsel %vm4602_vm1, %v4961_v52, 0  ;;  %v4982_v52 = vld [vmem:[%s8390_s6] sm:$0xff] }
 0x44e   : > { %5000 = vperm.xlu1 %5964, %v4982_v52  }
 0x44f   : > { %v4943_v19 = vmax.f32 %v4901_v30, 0.0  ;;  %v4884_v30 = vadd.f32 %v8184_v56, %v8176_v35 }
 0x451   : > { %v4727_v13 = vpop.f32.mrf.mxu1  ;;  %v8202_v58 = vpack.c.bf16 %v4943_v19, %v4942_v46  ;;  %v4936_v45 = vmax.f32 %v4884_v30, 0.0  ;;  %v8448_v46 = vld [vmem:[#allocation14_spill] sm:$0xff] }
 0x452   : > { %v4814_v57 = vpop.f32.mrf.mxu2  ;;  %v4728_v60 = vadd.f32 %v8088_v17, %v4727_v13  ;;  %v4991_v30 = vld [vmem:[%s8390_s6 + $0x48] sm:$0xff] }
 0x453   : > { %v4959_v59 = vpack.c.bf16 %v4937_v25, %v4936_v45 }
 0x45a   : > { %v4816_v23 = vpop.f32.mrf.mxu2 }
 0x45b   : > { %v4817_v28 = vadd.f32 %v4816_v23, %v4728_v60  ;;  %v4668_v23 = vadd.f32 %v8088_v17, %v7709_v39  ;;  %v5939_v60 = vld [vmem:[%s8389_s5 + $0x28] sm:$0xff] }
 0x45d   : > { %v4757_v56 = vadd.f32 %v7721_v22, %v4668_v23 }
 0x462   : > { %v4819_v7 = vpop.f32.mrf.mxu2 }
 0x464   : > { %v4730_v32 = vpop.f32.mrf.mxu1 }
 0x465   : > { %v4913_v55 = vpop.f32.mrf.mxu3  ;;  %v4731_v24 = vadd.f32 %v8088_v17, %v4730_v32 }
 0x467   : > { %v4820_v53 = vadd.f32 %v4819_v7, %v4731_v24 }
 0x469   : > { %v4909_v2 = vadd.f32 %v4908_v15, %v4820_v53  ;;  %v4906_v15 = vadd.f32 %v4905_v42, %v4817_v28  ;;  %v5170_v53 = vsel %vm4602_vm1, %v4959_v59, 0  ;;  %v5941_v28 = vld [vmem:[%s8389_s5 + $0x38] sm:$0xff] }
 0x46a   : > { %v4821_v4 = vpop.f32.mrf.mxu2 }
 0x46b   : > { %v4945_v19 = vmax.f32 %v4906_v15, 0.0  ;;  %v4994_v15 = vld [vmem:[%s8390_s6 + $0x60] sm:$0xff] }
 0x46c   : > { %v4732_v44 = vpop.f32.mrf.mxu1 }
 0x46d   : > { %v4733_v3 = vadd.f32 %v8088_v17, %v4732_v44  ;;  %v4915_v31 = vpop.f32.mrf.mxu3  ;;  %v4815_v44 = vadd.f32 %v4814_v57, %v4726_v8  ;;  %v8447_v57 = vld [vmem:[#allocation13_spill] sm:$0xff] }
 0x46e   : > { %v4663_v35 = vadd.f32 %v8088_v17, %v8447_v57  ;;  %v4986_v8 = vld [vmem:[%s8390_s6 + $0x20] sm:$0xff] }
 0x46f   : > { %v4822_v49 = vadd.f32 %v4821_v4, %v4733_v3  ;;  %v4938_v4 = vmax.f32 %v4889_v26, 0.0  ;;  %v5936_v26 = vld [vmem:[%s8389_s5 + $0x10] sm:$0xff] }
 0x470   : > { %v4752_v14 = vadd.f32 %v8448_v46, %v4663_v35 }
 0x471   : > { %v4911_v47 = vadd.f32 %v4910_v61, %v4822_v49  ;;  %v4960_v36 = vpack.c.bf16 %v4939_v5, %v4938_v4  ;;  %v4946_v61 = vmax.f32 %v4909_v2, 0.0  ;;  %v4983_v5 = vld [vmem:[%s8390_s6 + $0x8] sm:$0xff]  ;;  %v4989_v4 = vld [vmem:[%s8390_s6 + $0x38] sm:$0xff] }
 0x472   : > { %5005 = vperm.xlu2 %5965, %v4983_v5   ;;  %v4987_v2 = vld [vmem:[%s8390_s6 + $0x28] sm:$0xff] }
 0x47a   : > { %v4824_v16 = vpop.f32.mrf.mxu2  ;;  %5020 = vperm.xlu2 %5965, %v4986_v8  }
 0x482   : > { %v4826_v20 = vpop.f32.mrf.mxu2 }
 0x484   : > { %v4735_v48 = vpop.f32.mrf.mxu1 }
 0x485   : > { %v4736_v21 = vadd.f32 %v8088_v17, %v4735_v48  ;;  %v4904_v48 = vadd.f32 %v4903_v1, %v4815_v44  ;;  %v4996_v44 = vld [vmem:[%s8390_s6 + $0x70] sm:$0xff] }
 0x487   : > { %v4825_v33 = vadd.f32 %v4824_v16, %v4736_v21  ;;  %v4947_v16 = vmax.f32 %v4911_v47, 0.0  ;;  %v4944_v42 = vmax.f32 %v4904_v48, 0.0  ;;  %v4879_v21 = vadd.f32 %v8173_v11, %v8140_v6  ;;  %v5938_v47 = vld [vmem:[%s8389_s5 + $0x20] sm:$0xff]  ;;  %v4997_v48 = vld [vmem:[%s8390_s6 + $0x78] sm:$0xff] }
 0x489   : > { %v4914_v12 = vadd.f32 %v4913_v55, %v4825_v33  ;;  %v4963_v33 = vpack.c.bf16 %v4945_v19, %v4944_v42  ;;  %v4934_v24 = vmax.f32 %v4879_v21, 0.0  ;;  %v5975_v42 = vld [vmem:[%s6073_s29] sm:$0xff]  ;;  %v5976_v21 = vld [vmem:[%s6073_s29 + $0x8] sm:$0xff] }
 0x48a   : > { %v8200_v43 = vpop.f32.mrf.mxu2 }
 0x48b   : > { %v4948_v63 = vmax.f32 %v4914_v12, 0.0  ;;  %v5182_v22 = vsel %vm4602_vm1, %v4963_v33, 0 }
 0x48c   : > { %v4737_v41 = vpop.f32.mrf.mxu1 }
 0x48d   : > { %v4738_v9 = vadd.f32 %v8088_v17, %v4737_v41 }
 0x48f   : > { %v4827_v62 = vadd.f32 %v4826_v20, %v4738_v9  ;;  %v4964_v20 = vpack.c.bf16 %v4947_v16, %v4946_v61  ;;  %v8449_v9 = vld [vmem:[#allocation9_spill] sm:$0xff]  ;;  %v4988_v16 = vld [vmem:[%s8390_s6 + $0x30] sm:$0xff] }
 0x490   : > { %v4839_v17 = vadd.f32 %v8200_v43, %v8449_v9  ;;  %v5934_v43 = vld [vmem:[%s8389_s5] sm:$0xff]  ;;  %5030 = vperm.xlu2 %5965, %v4988_v16  }
 0x491   : > { %v4916_v29 = vadd.f32 %v4915_v31, %v4827_v62  ;;  %v5185_v55 = vsel %vm4602_vm1, %v4964_v20, 0  ;;  %v5179_v62 = vsel %vm4602_vm1, %v8202_v58, 0  ;;  %v5173_v31 = vsel %vm4602_vm1, %v4960_v36, 0  ;;  %v5935_v58 = vld [vmem:[%s8389_s5 + $0x8] sm:$0xff]  ;;  %v4992_v36 = vld [vmem:[%s8390_s6 + $0x50] sm:$0xff]  ;;  %v5983_v16 = vld [vmem:[%s6073_s29 + $0x40] sm:$0xff] }
 0x492   : > { %v4840_v54 = vpop.f32.mrf.mxu2  ;;  %v4918_v11 = vmax.f32 %v4839_v17, 0.0  ;;  %v4995_v20 = vld [vmem:[%s8390_s6 + $0x68] sm:$0xff] }
 0x493   : > { %v4949_v51 = vmax.f32 %v4916_v29, 0.0  ;;  %v4841_v50 = vadd.f32 %v4840_v54, %v4752_v14  ;;  %v5937_v54 = vld [vmem:[%s8389_s5 + $0x18] sm:$0xff]  ;;  %v5977_v14 = vld [vmem:[%s6073_s29 + $0x10] sm:$0xff] }
 0x495   : > { %v4965_v32 = vpack.c.bf16 %v4949_v51, %v4948_v63  ;;  %v4919_v49 = vmax.f32 %v4841_v50, 0.0  ;;  %v4984_v63 = vld [vmem:[%s8390_s6 + $0x10] sm:$0xff]  ;;  %v4985_v51 = vld [vmem:[%s8390_s6 + $0x18] sm:$0xff] }
 0x496   : > { %5010 = vperm.xlu0 %5966, %v4984_v63   ;;  %5015 = vperm.xlu1 %5964, %v4985_v51   ;;  %v5978_v50 = vld [vmem:[%s6073_s29 + $0x18] sm:$0xff] }
 0x497   : > { %v5188_v7 = vsel %vm4602_vm1, %v4965_v32, 0  ;;  %v4950_v12 = vpack.c.bf16 %v4919_v49, %v4918_v11  ;;  %v5940_v32 = vld [vmem:[%s8389_s5 + $0x30] sm:$0xff] }
 0x498   : > { %5239 = vmatpush.bf16.xpose.msrb.mxu0 %v5188_v7  ;;  %v4990_v7 = vld [vmem:[%s8390_s6 + $0x40] sm:$0xff]  ;;  %5045 = vperm.xlu2 %5965, %v4991_v30  }
 0x499   : > { %v5143_v38 = vsel %vm4602_vm1, %v4950_v12, 0 }
 0x49a   : > { %v4843_v13 = vpop.f32.mrf.mxu2 }
 0x49b   : > { %v4844_v1 = vadd.f32 %v4843_v13, %v7554_v10  ;;  %v4958_v10 = vpack.c.bf16 %v4935_v27, %v4934_v24 }
 0x49d   : > { %v4920_v37 = vmax.f32 %v4844_v1, 0.0  ;;  %v5167_v29 = vsel %vm4602_vm1, %v4958_v10, 0 }
 0x49e   : > { %5025 = vperm.xlu1 %5964, %v4987_v2   ;;  %5035 = vperm.xlu0 %5966, %v4989_v4  }
 0x4a0   : > { %5240 = vmatpush.bf16.xpose.msrb.mxu0 %v5185_v55  ;;  %5060 = vperm.xlu2 %5965, %v4994_v15  }
 0x4a2   : > { %v4845_v39 = vpop.f32.mrf.mxu2 }
 0x4a3   : > { %v4846_v3 = vadd.f32 %v4845_v39, %v4757_v56 }
 0x4a5   : > { %v4921_v41 = vmax.f32 %v4846_v3, 0.0 }
 0x4a6   : > { %5040 = vperm.xlu1 %5964, %v4990_v7   ;;  %5050 = vperm.xlu0 %5966, %v4992_v36   ;;  %v5984_v36 = vld [vmem:[%s6073_s29 + $0x48] sm:$0xff] }
 0x4a7   : > { %v4951_v18 = vpack.c.bf16 %v4921_v41, %v4920_v37 }
 0x4a8   : > { %5241 = vmatpush.bf16.xpose.msrb.mxu0 %v5182_v22  ;;  %5075 = vperm.xlu2 %5965, %v4997_v48  }
 0x4a9   : > { %v5146_v6 = vsel %vm4602_vm1, %v4951_v18, 0 }
 0x4aa   : > { %5196 = vmatpush.bf16.xpose.msrb.mxu3 %v5146_v6 }
 0x4ae   : > { %5055 = vperm.xlu1 %5964, %v4993_v34   ;;  %5065 = vperm.xlu0 %5966, %v4995_v20  }
 0x4b0   : > { %5242 = vmatpush.bf16.xpose.msrb.mxu0 %v5179_v62  ;;  %v5979_v62 = vld [vmem:[%s6073_s29 + $0x30] sm:$0xff] }
 0x4b2   : > { %5197 = vmatpush.bf16.xpose.msrb.mxu3 %v5143_v38 }
 0x4b6   : > { %5070 = vperm.xlu1 %5964, %v4996_v44  }
 0x4b8   : > { %5243 = vmatpush.bf16.xpose.msrb.mxu0 %v5176_v40 }
 0x4b9   : > { %5840 = vmatmul.msk.bf16.vlgmr.msrb.gmra.mxu3 %vm4602_vm1, %v5934_v43 }
 0x4c0   : > { %5244 = vmatpush.bf16.xpose.msrb.mxu0 %v5173_v31  ;;  %v5001_v0 = vpop.permute.xlu1 %5000 }
 0x4c8   : > { %5245 = vmatpush.bf16.xpose.msrb.mxu0 %v5170_v53 }
 0x4c9   : > { %5841 = vmatmul.msk.bf16.gmra.mxu3 %vm4602_vm1, %v5935_v58 }
 0x4cc   : > { %v5006_v19 = vpop.permute.xlu2 %5005 }
 0x4d0   : > { %5246 = vmatpush.bf16.xpose.msrb.mxu0 %v5167_v29  ;;  %v5981_v29 = vld [vmem:[%s6073_s29 + $0x20] sm:$0xff] }
 0x4d4   : > { %v5021_v4 = vpop.permute.xlu2 %5020 }
 0x4d7   : > { %5848 = vmatmul.msk.bf16.vlgmr.msrb.gmra.mxu0 %vm4602_vm1, %v5934_v43 }
 0x4d9   : > { %5842 = vmatmul.msk.bf16.gmra.mxu3 %vm4602_vm1, %v5936_v26 }
 0x4e7   : > { %5849 = vmatmul.msk.bf16.gmra.mxu0 %vm4602_vm1, %v5935_v58  ;;  %v5980_v58 = vld [vmem:[%s6073_s29 + $0x38] sm:$0xff] }
 0x4e9   : > { %5843 = vmatmul.msk.bf16.gmra.mxu3 %vm4602_vm1, %v5937_v54 }
 0x4f7   : > { %5850 = vmatmul.msk.bf16.gmra.mxu0 %vm4602_vm1, %v5936_v26 }
 0x4f9   : > { %5844 = vmatmul.msk.bf16.gmra.mxu3 %vm4602_vm1, %v5938_v47 }
 0x507   : > { %5851 = vmatmul.msk.bf16.gmra.mxu0 %vm4602_vm1, %v5937_v54  ;;  %v5982_v54 = vld [vmem:[%s6073_s29 + $0x28] sm:$0xff] }
 0x508   : > { %v5016_v10 = vpop.permute.xlu1 %5015  ;;  %v5011_v43 = vpop.permute.xlu0 %5010 }
 0x509   : > { %5845 = vmatmul.msk.bf16.gmra.mxu3 %vm4602_vm1, %v5939_v60 }
 0x517   : > { %5852 = vmatmul.msk.bf16.gmra.mxu0 %vm4602_vm1, %v5938_v47 }
 0x519   : > { %5846 = vmatmul.msk.bf16.gmra.mxu3 %vm4602_vm1, %v5940_v32 }
 0x527   : > { %5853 = vmatmul.msk.bf16.gmra.mxu0 %vm4602_vm1, %v5939_v60 }
 0x529   : > { %5847 = vmatmul.msk.bf16.gmra.mxu3 %vm4602_vm1, %v5941_v28 }
 0x537   : > { %5854 = vmatmul.msk.bf16.gmra.mxu0 %vm4602_vm1, %v5940_v32 }
 0x53c   : > { %v5199_v61 = vpop.f32.mrf.mxu3 }
 0x53d   : > { %v5200_v59 = vadd.f32 %v5199_v61, %v5001_v0  ;;  %v5026_v61 = vpop.permute.xlu1 %5025 }
 0x53f   : > { %v5288_v1 = vadd.f32 %v5975_v42, %v5200_v59  ;;  %v5031_v42 = vpop.permute.xlu2 %5030 }
 0x541   : > { %v5320_v33 = vmax.f32 %v5288_v1, 0.0 }
 0x544   : > { %v5201_v13 = vpop.f32.mrf.mxu3 }
 0x545   : > { %v5202_v55 = vadd.f32 %v5201_v13, %v5006_v19 }
 0x547   : > { %5855 = vmatmul.msk.bf16.gmra.mxu0 %vm4602_vm1, %v5941_v28  ;;  %v5290_v3 = vadd.f32 %v5977_v14, %v5202_v55  ;;  %v5988_v14 = vld [vmem:[%s6073_s29 + $0x68] sm:$0xff] }
 0x549   : > { %v5322_v24 = vmax.f32 %v5290_v3, 0.0 }
 0x54c   : > { %v5204_v25 = vpop.f32.mrf.mxu3 }
 0x54d   : > { %v5205_v40 = vadd.f32 %v5204_v25, %v5011_v43 }
 0x54f   : > { %v5292_v26 = vadd.f32 %v5981_v29, %v5205_v40 }
 0x551   : > { %v5324_v51 = vmax.f32 %v5292_v26, 0.0  ;;  %v5991_v26 = vld [vmem:[%s6073_s29 + $0x80] sm:$0xff] }
 0x554   : > { %v5248_v45 = vpop.f32.mrf.mxu0  ;;  %v5206_v23 = vpop.f32.mrf.mxu3 }
 0x555   : > { %v5249_v57 = vadd.f32 %v5248_v45, %v5001_v0  ;;  %v5207_v49 = vadd.f32 %v5206_v23, %v5016_v10  ;;  %v5985_v45 = vld [vmem:[%s6073_s29 + $0x50] sm:$0xff] }
 0x557   : > { %v5289_v39 = vadd.f32 %v5976_v21, %v5249_v57  ;;  %v5294_v38 = vadd.f32 %v5979_v62, %v5207_v49 }
 0x559   : > { %v5321_v27 = vmax.f32 %v5289_v39, 0.0  ;;  %v5326_v47 = vmax.f32 %v5294_v38, 0.0  ;;  %v5987_v39 = vld [vmem:[%s6073_s29 + $0x60] sm:$0xff] }
 0x55b   : > { %v5352_v41 = vpack.c.bf16 %v5321_v27, %v5320_v33 }
 0x55c   : > { %v5250_v35 = vpop.f32.mrf.mxu0  ;;  %v5209_v56 = vpop.f32.mrf.mxu3 }
 0x55d   : > { %v5251_v46 = vadd.f32 %v5250_v35, %v5006_v19  ;;  %5368 = vst [vmem:[%s8335_s15] sm:$0xff] %v5352_v41  ;;  %v5210_v28 = vadd.f32 %v5209_v56, %v5021_v4  ;;  %v5986_v19 = vld [vmem:[%s6073_s29 + $0x58] sm:$0xff] }
 0x55f   : > { %v5291_v37 = vadd.f32 %v5978_v50, %v5251_v46  ;;  %v5296_v34 = vadd.f32 %v5983_v16, %v5210_v28 }
 0x561   : > { %v5323_v9 = vmax.f32 %v5291_v37, 0.0  ;;  %v5328_v30 = vmax.f32 %v5296_v34, 0.0 }
 0x563   : > { %v5353_v17 = vpack.c.bf16 %v5323_v9, %v5322_v24  ;;  %v5036_v24 = vpop.permute.xlu0 %5035 }
 0x564   : > { %v5253_v22 = vpop.f32.mrf.mxu0  ;;  %v5211_v18 = vpop.f32.mrf.mxu3 }
 0x565   : > { %5369 = vst [vmem:[%s8335_s15 + $0x8] sm:$0xff] %v5353_v17  ;;  %v5254_v31 = vadd.f32 %v5253_v22, %v5011_v43  ;;  %v5212_v15 = vadd.f32 %v5211_v18, %v5026_v61  ;;  %v5989_v22 = vld [vmem:[%s6073_s29 + $0x70] sm:$0xff]  ;;  %v5046_v43 = vpop.permute.xlu2 %5045 }
 0x567   : > { %v5293_v52 = vadd.f32 %v5982_v54, %v5254_v31  ;;  %v5298_v23 = vadd.f32 %v5985_v45, %v5212_v15  ;;  %v5041_v31 = vpop.permute.xlu1 %5040 }
 0x569   : > { %v5325_v5 = vmax.f32 %v5293_v52, 0.0  ;;  %v5330_v59 = vmax.f32 %v5298_v23, 0.0  ;;  %v5992_v52 = vld [vmem:[%s6073_s29 + $0x88] sm:$0xff] }
 0x56b   : > { %v5354_v32 = vpack.c.bf16 %v5325_v5, %v5324_v51  ;;  %v5993_v51 = vld [vmem:[%s6073_s29 + $0x90] sm:$0xff] }
 0x56c   : > { %v5255_v6 = vpop.f32.mrf.mxu0  ;;  %v5214_v11 = vpop.f32.mrf.mxu3 }
 0x56d   : > { %v5256_v12 = vadd.f32 %v5255_v6, %v5016_v10  ;;  %5370 = vst [vmem:[%s8335_s15 + $0x10] sm:$0xff] %v5354_v32  ;;  %v5215_v1 = vadd.f32 %v5214_v11, %v5031_v42  ;;  %v5990_v10 = vld [vmem:[%s6073_s29 + $0x78] sm:$0xff]  ;;  %v5061_v23 = vpop.permute.xlu2 %5060 }
 0x56f   : > { %v5295_v53 = vadd.f32 %v5980_v58, %v5256_v12  ;;  %v5300_v46 = vadd.f32 %v5987_v39, %v5215_v1 }
 0x571   : > { %v5327_v63 = vmax.f32 %v5295_v53, 0.0  ;;  %v5332_v27 = vmax.f32 %v5300_v46, 0.0 }
 0x573   : > { %v5355_v60 = vpack.c.bf16 %v5327_v63, %v5326_v47 }
 0x574   : > { %v5258_v2 = vpop.f32.mrf.mxu0  ;;  %v5216_v8 = vpop.f32.mrf.mxu3 }
 0x575   : > { %5371 = vst [vmem:[%s8335_s15 + $0x18] sm:$0xff] %v5355_v60  ;;  %v5259_v7 = vadd.f32 %v5258_v2, %v5021_v4  ;;  %v5217_v9 = vadd.f32 %v5216_v8, %v5036_v24  ;;  %v5994_v4 = vld [vmem:[%s6073_s29 + $0x98] sm:$0xff] }
 0x577   : > { %v5297_v44 = vadd.f32 %v5984_v36, %v5259_v7  ;;  %v5302_v18 = vadd.f32 %v5989_v22, %v5217_v9 }
 0x579   : > { %v5329_v13 = vmax.f32 %v5297_v44, 0.0  ;;  %v5334_v6 = vmax.f32 %v5302_v18, 0.0 }
 0x57b   : > { %v5356_v25 = vpack.c.bf16 %v5329_v13, %v5328_v30 }
 0x57c   : > { %v5260_v20 = vpop.f32.mrf.mxu0  ;;  %v5219_v0 = vpop.f32.mrf.mxu3 }
 0x57d   : > { %v5261_v48 = vadd.f32 %v5260_v20, %v5026_v61  ;;  %5372 = vst [vmem:[%s8335_s15 + $0x20] sm:$0xff] %v5356_v25  ;;  %v5220_v58 = vadd.f32 %v5219_v0, %v5041_v31  ;;  %v5056_v61 = vpop.permute.xlu1 %5055  ;;  %v5995_v20 = vld [vmem:[%s6073_s29 + $0xb0] sm:$0xff] }
 0x57f   : > { %v5299_v55 = vadd.f32 %v5986_v19, %v5261_v48  ;;  %v5304_v54 = vadd.f32 %v5991_v26, %v5220_v58  ;;  %v5996_v48 = vld [vmem:[%s6073_s29 + $0xb8] sm:$0xff] }
 0x581   : > { %v5331_v57 = vmax.f32 %v5299_v55, 0.0  ;;  %v5336_v2 = vmax.f32 %v5304_v54, 0.0 }
 0x583   : > { %v5357_v35 = vpack.c.bf16 %v5331_v57, %v5330_v59 }
 0x584   : > { %v5263_v56 = vpop.f32.mrf.mxu0  ;;  %v5221_v33 = vpop.f32.mrf.mxu3 }
 0x585   : > { %5373 = vst [vmem:[%s8335_s15 + $0x28] sm:$0xff] %v5357_v35  ;;  %v5264_v21 = vadd.f32 %v5263_v56, %v5031_v42  ;;  %v5222_v40 = vadd.f32 %v5221_v33, %v5046_v43  ;;  %v5997_v42 = vld [vmem:[%s6073_s29 + $0xc0] sm:$0xff] }
 0x586   : > { %v5999_v33 = vld [vmem:[%s6073_s29 + $0xa0] sm:$0xff] }
 0x587   : > { %v5301_v3 = vadd.f32 %v5988_v14, %v5264_v21  ;;  %v5306_v5 = vadd.f32 %v5993_v51, %v5222_v40  ;;  %v5051_v21 = vpop.permute.xlu0 %5050  ;;  %v5998_v14 = vld [vmem:[%s6073_s29 + $0xc8] sm:$0xff]  ;;  %v6002_v40 = vld [vmem:[%s6073_s29 + $0xd8] sm:$0xff] }
 0x589   : > { %v5333_v50 = vmax.f32 %v5301_v3, 0.0  ;;  %v5338_v7 = vmax.f32 %v5306_v5, 0.0  ;;  %v6004_v5 = vld [vmem:[%s6073_s29 + $0xe8] sm:$0xff] }
 0x58b   : > { %v5358_v41 = vpack.c.bf16 %v5333_v50, %v5332_v27  ;;  %v6000_v50 = vld [vmem:[%s6073_s29 + $0xa8] sm:$0xff] }
 0x58c   : > { %v5265_v37 = vpop.f32.mrf.mxu0  ;;  %v5224_v62 = vpop.f32.mrf.mxu3 }
 0x58d   : > { %5374 = vst [vmem:[%s8335_s15 + $0x30] sm:$0xff] %v5358_v41  ;;  %v5266_v17 = vadd.f32 %v5265_v37, %v5036_v24  ;;  %v5225_v39 = vadd.f32 %v5224_v62, %v5051_v21  ;;  %v5071_v62 = vpop.permute.xlu1 %5070 }
 0x58f   : > { %v5303_v49 = vadd.f32 %v5990_v10, %v5266_v17  ;;  %v5308_v27 = vadd.f32 %v5999_v33, %v5225_v39 }
 0x591   : > { %v5335_v11 = vmax.f32 %v5303_v49, 0.0  ;;  %v5340_v9 = vmax.f32 %v5308_v27, 0.0 }
 0x593   : > { %v5359_v38 = vpack.c.bf16 %v5335_v11, %v5334_v6  ;;  %v5066_v6 = vpop.permute.xlu0 %5065 }
 0x594   : > { %v5268_v12 = vpop.f32.mrf.mxu0  ;;  %v5226_v60 = vpop.f32.mrf.mxu3 }
 0x595   : > { %5375 = vst [vmem:[%s8335_s15 + $0x38] sm:$0xff] %v5359_v38  ;;  %v5269_v53 = vadd.f32 %v5268_v12, %v5041_v31  ;;  %v5227_v30 = vadd.f32 %v5226_v60, %v5056_v61  ;;  %v6001_v38 = vld [vmem:[%s6073_s29 + $0xd0] sm:$0xff] }
 0x597   : > { %v5305_v47 = vadd.f32 %v5992_v52, %v5269_v53  ;;  %v5310_v25 = vadd.f32 %v5995_v20, %v5227_v30 }
 0x599   : > { %v5337_v32 = vmax.f32 %v5305_v47, 0.0  ;;  %v5342_v19 = vmax.f32 %v5310_v25, 0.0  ;;  %v6003_v47 = vld [vmem:[%s6073_s29 + $0xe0] sm:$0xff] }
 0x59b   : > { %v5360_v28 = vpack.c.bf16 %v5337_v32, %v5336_v2  ;;  %v5076_v2 = vpop.permute.xlu2 %5075 }
 0x59c   : > { %v5270_v29 = vpop.f32.mrf.mxu0  ;;  %v5229_v44 = vpop.f32.mrf.mxu3 }
 0x59d   : > { %v5271_v63 = vadd.f32 %v5270_v29, %v5046_v43  ;;  %5376 = vst [vmem:[%s8335_s15 + $0x40] sm:$0xff] %v5360_v28  ;;  %v5230_v0 = vadd.f32 %v5229_v44, %v5061_v23  ;;  %v6006_v44 = vld [vmem:[%s6073_s29 + $0xf8] sm:$0xff] }
 0x59f   : > { %v5307_v8 = vadd.f32 %v5994_v4, %v5271_v63  ;;  %v5312_v1 = vadd.f32 %v5997_v42, %v5230_v0 }
 0x5a1   : > { %v5339_v16 = vmax.f32 %v5307_v8, 0.0  ;;  %v5344_v41 = vmax.f32 %v5312_v1, 0.0 }
 0x5a3   : > { %v5361_v34 = vpack.c.bf16 %v5339_v16, %v5338_v7  ;;  %v6005_v16 = vld [vmem:[%s6073_s29 + $0xf0] sm:$0xff] }
 0x5a4   : > { %v5273_v36 = vpop.f32.mrf.mxu0  ;;  %v5231_v59 = vpop.f32.mrf.mxu3 }
 0x5a5   : > { %5377 = vst [vmem:[%s8335_s15 + $0x48] sm:$0xff] %v5361_v34  ;;  %v5274_v46 = vadd.f32 %v5273_v36, %v5051_v21  ;;  %v5232_v11 = vadd.f32 %v5231_v59, %v5066_v6 }
 0x5a7   : > { %v5309_v37 = vadd.f32 %v6000_v50, %v5274_v46  ;;  %v5314_v43 = vadd.f32 %v6001_v38, %v5232_v11 }
 0x5a9   : > { %v5341_v17 = vmax.f32 %v5309_v37, 0.0  ;;  %v5346_v53 = vmax.f32 %v5314_v43, 0.0 }
 0x5ab   : > { %v5362_v49 = vpack.c.bf16 %v5341_v17, %v5340_v9 }
 0x5ac   : > { %v5275_v13 = vpop.f32.mrf.mxu0  ;;  %v5234_v10 = vpop.f32.mrf.mxu3 }
 0x5ad   : > { %v5276_v15 = vadd.f32 %v5275_v13, %v5056_v61  ;;  %5378 = vst [vmem:[%s8335_s15 + $0x50] sm:$0xff] %v5362_v49  ;;  %v5235_v58 = vadd.f32 %v5234_v10, %v5071_v62 }
 0x5af   : > { %v5311_v45 = vadd.f32 %v5996_v48, %v5276_v15  ;;  %v5316_v63 = vadd.f32 %v6003_v47, %v5235_v58 }
 0x5b1   : > { %v5343_v55 = vmax.f32 %v5311_v45, 0.0  ;;  %v5348_v32 = vmax.f32 %v5316_v63, 0.0 }
 0x5b3   : > { %v5363_v57 = vpack.c.bf16 %v5343_v55, %v5342_v19 }
 0x5b4   : > { %v5278_v35 = vpop.f32.mrf.mxu0  ;;  %v5236_v51 = vpop.f32.mrf.mxu3 }
 0x5b5   : > { %5379 = vst [vmem:[%s8335_s15 + $0x58] sm:$0xff] %v5363_v57  ;;  %v5279_v56 = vadd.f32 %v5278_v35, %v5061_v23  ;;  %v5237_v8 = vadd.f32 %v5236_v51, %v5076_v2 }
 0x5b7   : > { %v5313_v3 = vadd.f32 %v5998_v14, %v5279_v56  ;;  %v5318_v34 = vadd.f32 %v6005_v16, %v5237_v8 }
 0x5b9   : > { %v5345_v24 = vmax.f32 %v5313_v3, 0.0  ;;  %v5350_v30 = vmax.f32 %v5318_v34, 0.0 }
 0x5bb   : > { %v5364_v22 = vpack.c.bf16 %v5345_v24, %v5344_v41 }
 0x5bc   : > { %v5280_v18 = vpop.f32.mrf.mxu0 }
 0x5bd   : > { %5380 = vst [vmem:[%s8335_s15 + $0x60] sm:$0xff] %v5364_v22  ;;  %v5281_v12 = vadd.f32 %v5280_v18, %v5066_v6 }
 0x5bf   : > { %v5315_v31 = vadd.f32 %v6002_v40, %v5281_v12 }
 0x5c1   : > { %v5347_v29 = vmax.f32 %v5315_v31, 0.0 }
 0x5c3   : > { %v5365_v54 = vpack.c.bf16 %v5347_v29, %v5346_v53 }
 0x5c4   : > { %v5283_v26 = vpop.f32.mrf.mxu0 }
 0x5c5   : > { %v5284_v52 = vadd.f32 %v5283_v26, %v5071_v62  ;;  %5381 = vst [vmem:[%s8335_s15 + $0x68] sm:$0xff] %v5365_v54 }
 0x5c7   : > { %v5317_v60 = vadd.f32 %v6004_v5, %v5284_v52 }
 0x5c9   : > { %v5349_v4 = vmax.f32 %v5317_v60, 0.0 }
 0x5cb   : > { %v5366_v28 = vpack.c.bf16 %v5349_v4, %v5348_v32 }
 0x5cc   : > { %v5285_v7 = vpop.f32.mrf.mxu0 }
 0x5cd   : > { %5382 = vst [vmem:[%s8335_s15 + $0x70] sm:$0xff] %v5366_v28  ;;  %v5286_v36 = vadd.f32 %v5285_v7, %v5076_v2 }
 0x5cf   : > { %v5319_v61 = vadd.f32 %v6006_v44, %v5286_v36 }
 0x5d1   : > { %v5351_v13 = vmax.f32 %v5319_v61, 0.0 }
 0x5d3   : > { %v5367_v15 = vpack.c.bf16 %v5351_v13, %v5350_v30 }
 0x5d5   : > { %5383 = vst [vmem:[%s8335_s15 + $0x78] sm:$0xff] %v5367_v15 }
 0x5d6 PF: > { %s17_s24 = sadd.s32 1, %s6013_s24  }
 0x5d7   : > { %p14_p4 = scmp.ge.s32.totalorder %s17_s24, 4  }
 0x5d9   :  { %16 = sbr.rel (!%p14_p4) target bundleno = 1 (0x1), region = 81 }

</bundles_post_ra>
